<compile_context>
chip_gen: v7x
topology: tpu7x:2x2x1
jax: 0.10.0
libtpu: 0.0.40
codegen_flags: <defaults>
</compile_context>

<pallas_src>
import functools

import jax
import jax.numpy as jnp
from jax.experimental import pallas as pl
from jax.experimental.pallas import tpu as pltpu


def bilstm_head_kernel(x_ref, lens_ref, wih_ref, bih_ref,
                       whhf_ref, whhr_ref,
                       wdf_ref, wdr_ref, bd_ref, wo_ref, bo_ref,
                       logits_ref, *, seq_len):
    """Bi-LSTM recurrence + classification head for one batch block.

    x_ref    : (Bt*T, D)  bf16, batch-major flattened embedded tokens
    lens_ref : (Bt, 1)    f32, valid-token count per example (right padding)
    wih_ref  : (D, 8H)    bf16, [W_ih_fwd | W_ih_rev], gate order i,f,g,o
    bih_ref  : (1, 8H)    f32, [b_fwd | b_rev] (b_ih + b_hh combined)
    whh*_ref : (H, 4H)    f32, hidden->gates weights per direction
    wd{f,r}  : (H, 2H)    f32, classifier dense split into fwd/rev halves
    bd_ref   : (1, 2H)    f32
    wo_ref   : (2H, L)    f32 ; bo_ref (1, L)
    logits_ref : (Bt, L)  f32
    """
    T = seq_len
    Bt = lens_ref.shape[0]
    H = whhf_ref.shape[0]
    H4 = 4 * H

    # ---- Hoisted input projection: one big bf16 MXU matmul for both
    # directions and every timestep of this batch block.
    gx = (jnp.dot(x_ref[...], wih_ref[...], preferred_element_type=jnp.float32)
          + bih_ref[...])                       # (Bt*T, 8H) f32
    gx3 = gx.reshape(Bt, T, 2 * H4)             # clean slab regrouping

    lens = lens_ref[...]                        # (Bt, 1) f32
    whhf = whhf_ref[...]
    whhr = whhr_ref[...]

    def lstm_cell(gates, c):
        i_g = jax.nn.sigmoid(gates[:, 0 * H:1 * H])
        f_g = jax.nn.sigmoid(gates[:, 1 * H:2 * H])
        g_g = jnp.tanh(gates[:, 2 * H:3 * H])
        o_g = jax.nn.sigmoid(gates[:, 3 * H:4 * H])
        c_new = f_g * c + i_g * g_g
        h_new = o_g * jnp.tanh(c_new)
        return h_new, c_new

    zero = jnp.zeros((Bt, H), jnp.float32)
    h_f, c_f, h_r, c_r = zero, zero, zero, zero

    # ---- Fused forward/reverse recurrence, statically unrolled (T is small
    # and static here). Padded steps leave (h, c) untouched, reproducing
    # pack_padded_sequence for right-padded input.
    # TODO(synk): for long sequences, stream the time axis via an "arbitrary"
    # grid dimension with h/c carried in VMEM scratch and bound the trip count
    # with a scalar-prefetched per-block max length instead of full unroll.
    for t in range(T):
        tr = T - 1 - t
        g_f = gx3[:, t, :H4] + jnp.dot(h_f, whhf,
                                       preferred_element_type=jnp.float32)
        g_r = gx3[:, tr, H4:] + jnp.dot(h_r, whhr,
                                        preferred_element_type=jnp.float32)
        hf_new, cf_new = lstm_cell(g_f, c_f)
        hr_new, cr_new = lstm_cell(g_r, c_r)
        vf = lens > float(t)    # token t valid for the forward direction
        vr = lens > float(tr)   # token tr valid for the reverse direction
        h_f = jnp.where(vf, hf_new, h_f)
        c_f = jnp.where(vf, cf_new, c_f)
        h_r = jnp.where(vr, hr_new, h_r)
        c_r = jnp.where(vr, cr_new, c_r)

    # ---- Classification head (dropout = identity in eval). Dense weight is
    # split into fwd/rev halves so no lane concat of the two H-wide states.
    hidden = jnp.tanh(
        jnp.dot(h_f, wdf_ref[...], preferred_element_type=jnp.float32)
        + jnp.dot(h_r, wdr_ref[...], preferred_element_type=jnp.float32)
        + bd_ref[...])
    logits = (jnp.dot(hidden, wo_ref[...], preferred_element_type=jnp.float32)
              + bo_ref[...])
    logits_ref[...] = logits.astype(logits_ref.dtype)


def _pick_batch_tile(batch, seq_len):
    """Largest batch tile that divides B and keeps the flattened rows 8-aligned."""
    for cand in (128, 64, 32, 16, 8):
        if batch % cand == 0 and (cand * seq_len) % 8 == 0:
            return cand
    return batch


def init_params(key, input_dim=300, hidden=32, num_labels=3):
    """Deterministic synthetic parameters (PyTorch-like uniform init)."""
    ks = jax.random.split(key, 10)
    bound_lstm = 1.0 / jnp.sqrt(jnp.float32(hidden))
    bound_head = 1.0 / jnp.sqrt(jnp.float32(2 * hidden))

    def u(k, shape, bound):
        return jax.random.uniform(k, shape, jnp.float32, -bound, bound)

    return {
        "w_ih_f": u(ks[0], (input_dim, 4 * hidden), bound_lstm),
        "w_hh_f": u(ks[1], (hidden, 4 * hidden), bound_lstm),
        "b_f":    u(ks[2], (1, 4 * hidden), bound_lstm),
        "w_ih_r": u(ks[3], (input_dim, 4 * hidden), bound_lstm),
        "w_hh_r": u(ks[4], (hidden, 4 * hidden), bound_lstm),
        "b_r":    u(ks[5], (1, 4 * hidden), bound_lstm),
        "w_dense": u(ks[6], (2 * hidden, 2 * hidden), bound_head),
        "b_dense": u(ks[7], (1, 2 * hidden), bound_head),
        "w_out":   u(ks[8], (2 * hidden, num_labels), bound_head),
        "b_out":   u(ks[9], (1, num_labels), bound_head),
    }


@jax.jit
def forward_logits(x, attention_mask, params):
    B, T, D = x.shape
    H = params["w_hh_f"].shape[0]
    L = params["w_out"].shape[1]

    # Batch-first flatten is a free view; bf16 cast halves the HBM footprint of
    # the single largest tensor. No transpose of x.
    x_flat = x.reshape(B * T, D).astype(jnp.bfloat16)
    wih = jnp.concatenate([params["w_ih_f"], params["w_ih_r"]],
                          axis=1).astype(jnp.bfloat16)                # (D, 8H)
    bih = jnp.concatenate([params["b_f"], params["b_r"]],
                          axis=1).astype(jnp.float32)                 # (1, 8H)
    wd_f = params["w_dense"][:H]
    wd_r = params["w_dense"][H:]
    lens = jnp.sum(attention_mask, axis=1, keepdims=True).astype(jnp.float32)

    b_tile = _pick_batch_tile(B, T)
    grid = (B // b_tile,)

    kernel = functools.partial(bilstm_head_kernel, seq_len=T)

    logits = pl.pallas_call(
        kernel,
        out_shape=jax.ShapeDtypeStruct((B, L), jnp.float32),
        grid=grid,
        in_specs=[
            pl.BlockSpec((b_tile * T, D), lambda b: (b, 0)),     # x_flat
            pl.BlockSpec((b_tile, 1), lambda b: (b, 0)),         # lens
            pl.BlockSpec((D, 8 * H), lambda b: (0, 0)),          # fused W_ih
            pl.BlockSpec((1, 8 * H), lambda b: (0, 0)),          # fused bias
            pl.BlockSpec((H, 4 * H), lambda b: (0, 0)),          # W_hh fwd
            pl.BlockSpec((H, 4 * H), lambda b: (0, 0)),          # W_hh rev
            pl.BlockSpec((H, 2 * H), lambda b: (0, 0)),          # W_dense fwd half
            pl.BlockSpec((H, 2 * H), lambda b: (0, 0)),          # W_dense rev half
            pl.BlockSpec((1, 2 * H), lambda b: (0, 0)),          # b_dense
            pl.BlockSpec((2 * H, L), lambda b: (0, 0)),          # W_out
            pl.BlockSpec((1, L), lambda b: (0, 0)),              # b_out
        ],
        out_specs=pl.BlockSpec((b_tile, L), lambda b: (b, 0)),
        compiler_params=pltpu.CompilerParams(
            dimension_semantics=("parallel",),
            vmem_limit_bytes=32 * 1024 * 1024,
        ),
    )(x_flat, lens, wih, bih,
      params["w_hh_f"], params["w_hh_r"],
      wd_f, wd_r, params["b_dense"], params["w_out"], params["b_out"])
    return logits


def bilstm_weighted_seq_cls(x, attention_mask, params,
                            labels=None, class_weight=None):
    """Mirrors BiLSTMForWeightedSequenceClassification.forward."""
    logits = forward_logits(x, attention_mask, params)
    L = logits.shape[-1]
    if labels is None:
        return (logits,)
    if L == 1:
        loss = jnp.mean(
            (logits.reshape(-1) - labels.reshape(-1).astype(jnp.float32)) ** 2)
    else:
        logp = jax.nn.log_softmax(logits.astype(jnp.float32), axis=-1)
        lbl = labels.reshape(-1).astype(jnp.int32)
        w = (class_weight.astype(jnp.float32) if class_weight is not None
             else jnp.ones((L,), jnp.float32))
        sample_w = w[lbl]
        nll = -jnp.take_along_axis(logp, lbl[:, None], axis=1)[:, 0]
        loss = jnp.sum(sample_w * nll) / jnp.sum(sample_w)  # weighted-mean reduction
    return (loss, logits)


def reference_logits(x, attention_mask, params):
    """Pure-JAX f32 reference mirroring the PyTorch forward (for sanity check)."""
    B, T, D = x.shape
    H = params["w_hh_f"].shape[0]
    lens = jnp.sum(attention_mask, axis=1).astype(jnp.int32)

    def run(wih, whh, b, reverse):
        h = jnp.zeros((B, H), jnp.float32)
        c = jnp.zeros((B, H), jnp.float32)
        order = range(T - 1, -1, -1) if reverse else range(T)
        for t in order:
            gates = x[:, t, :] @ wih + h @ whh + b
            i_g = jax.nn.sigmoid(gates[:, :H])
            f_g = jax.nn.sigmoid(gates[:, H:2 * H])
            g_g = jnp.tanh(gates[:, 2 * H:3 * H])
            o_g = jax.nn.sigmoid(gates[:, 3 * H:])
            c_new = f_g * c + i_g * g_g
            h_new = o_g * jnp.tanh(c_new)
            valid = (t < lens)[:, None]
            h = jnp.where(valid, h_new, h)
            c = jnp.where(valid, c_new, c)
        return h

    h_f = run(params["w_ih_f"], params["w_hh_f"], params["b_f"], False)
    h_r = run(params["w_ih_r"], params["w_hh_r"], params["b_r"], True)
    feat = jnp.concatenate([h_f, h_r], axis=1)
    hidden = jnp.tanh(feat @ params["w_dense"] + params["b_dense"])
    return hidden @ params["w_out"] + params["b_out"]


if __name__ == "__main__":
    key = jax.random.PRNGKey(0)
    k_x, k_p = jax.random.split(key)

    B, T, D, H, L = 2, 8, 300, 32, 3
    x = jax.random.normal(k_x, (B, T, D), jnp.float32)   # "input_ids" = embeddings
    lengths = jnp.array([8, 5], jnp.int32)
    attention_mask = (jnp.arange(T)[None, :] < lengths[:, None]).astype(jnp.int32)
    labels = jnp.array([0, 2], jnp.int32)
    class_weight = jnp.array([1.0, 2.0, 0.5], jnp.float32)

    params = init_params(k_p, input_dim=D, hidden=H, num_labels=L)

    loss, logits = bilstm_weighted_seq_cls(x, attention_mask, params,
                                           labels=labels,
                                           class_weight=class_weight)
    jax.block_until_ready((loss, logits))
    assert logits.shape == (B, L)

    # Loose tolerance: kernel runs the hoisted input projection in bf16.
    ref = reference_logits(x, attention_mask, params)
    assert jnp.max(jnp.abs(logits - ref)) < 0.1, "kernel diverges from reference"

    print("KERNEL_OK")
</pallas_src>

<mosaic_0001>
module attributes {stable_mosaic.version = 11 : i64} {
  func.func @bilstm_head_kernel(%arg0: i32, %arg1: memref<16x300xbf16, #tpu.memory_space<vmem>>, %arg2: memref<2x1xf32, #tpu.memory_space<vmem>>, %arg3: memref<300x256xbf16, #tpu.memory_space<vmem>>, %arg4: memref<1x256xf32, #tpu.memory_space<vmem>>, %arg5: memref<32x128xf32, #tpu.memory_space<vmem>>, %arg6: memref<32x128xf32, #tpu.memory_space<vmem>>, %arg7: memref<32x64xf32, #tpu.memory_space<vmem>>, %arg8: memref<32x64xf32, #tpu.memory_space<vmem>>, %arg9: memref<1x64xf32, #tpu.memory_space<vmem>>, %arg10: memref<64x3xf32, #tpu.memory_space<vmem>>, %arg11: memref<1x3xf32, #tpu.memory_space<vmem>>, %arg12: memref<2x3xf32, #tpu.memory_space<vmem>>) attributes {dimension_semantics = [#tpu.dimension_semantics<parallel>], iteration_bounds = array<i64: 1>, scalar_prefetch = 0 : i64, scratch_operands = 0 : i64, tpu.core_type = #tpu.core_type<tc>, window_params = [{transform_indices = @transform_0, window_bounds = array<i64: 16, 300>}, {transform_indices = @transform_1, window_bounds = array<i64: 2, 1>}, {pipeline_mode = #tpu.pipeline_mode<synchronous>, transform_indices = @transform_2, window_bounds = array<i64: 300, 256>}, {pipeline_mode = #tpu.pipeline_mode<synchronous>, transform_indices = @transform_3, window_bounds = array<i64: 1, 256>}, {pipeline_mode = #tpu.pipeline_mode<synchronous>, transform_indices = @transform_4, window_bounds = array<i64: 32, 128>}, {pipeline_mode = #tpu.pipeline_mode<synchronous>, transform_indices = @transform_5, window_bounds = array<i64: 32, 128>}, {pipeline_mode = #tpu.pipeline_mode<synchronous>, transform_indices = @transform_6, window_bounds = array<i64: 32, 64>}, {pipeline_mode = #tpu.pipeline_mode<synchronous>, transform_indices = @transform_7, window_bounds = array<i64: 32, 64>}, {pipeline_mode = #tpu.pipeline_mode<synchronous>, transform_indices = @transform_8, window_bounds = array<i64: 1, 64>}, {pipeline_mode = #tpu.pipeline_mode<synchronous>, transform_indices = @transform_9, window_bounds = array<i64: 64, 3>}, {pipeline_mode = #tpu.pipeline_mode<synchronous>, transform_indices = @transform_10, window_bounds = array<i64: 1, 3>}, {transform_indices = @transform_11, window_bounds = array<i64: 2, 3>}]} {
    %c0 = arith.constant 0 : index
    %c0_0 = arith.constant 0 : index
    %0 = vector.load %arg1[%c0, %c0_0] : memref<16x300xbf16, #tpu.memory_space<vmem>>, vector<16x300xbf16>
    %c0_1 = arith.constant 0 : index
    %c0_2 = arith.constant 0 : index
    %1 = vector.load %arg3[%c0_1, %c0_2] : memref<300x256xbf16, #tpu.memory_space<vmem>>, vector<300x256xbf16>
    %cst = arith.constant dense<0.000000e+00> : vector<16x256xf32>
    %2 = tpu.matmul %0, %1, %cst {dimension_numbers = #tpu.dot_dimension_numbers<[1], [0], [0], [1], [0, 0, 1, 1], [], []>} : vector<16x300xbf16>, vector<300x256xbf16>, vector<16x256xf32> -> vector<16x256xf32>
    %c0_3 = arith.constant 0 : index
    %c0_4 = arith.constant 0 : index
    %3 = vector.load %arg4[%c0_3, %c0_4] : memref<1x256xf32, #tpu.memory_space<vmem>>, vector<1x256xf32>
    %4 = vector.broadcast %3 : vector<1x256xf32> to vector<16x256xf32>
    %5 = arith.addf %2, %4 : vector<16x256xf32>
    %6 = vector.shape_cast %5 : vector<16x256xf32> to vector<2x8x256xf32>
    %c0_5 = arith.constant 0 : index
    %c0_6 = arith.constant 0 : index
    %7 = vector.load %arg2[%c0_5, %c0_6] : memref<2x1xf32, #tpu.memory_space<vmem>>, vector<2x1xf32>
    %c0_7 = arith.constant 0 : index
    %c0_8 = arith.constant 0 : index
    %8 = vector.load %arg5[%c0_7, %c0_8] : memref<32x128xf32, #tpu.memory_space<vmem>>, vector<32x128xf32>
    %c0_9 = arith.constant 0 : index
    %c0_10 = arith.constant 0 : index
    %9 = vector.load %arg6[%c0_9, %c0_10] : memref<32x128xf32, #tpu.memory_space<vmem>>, vector<32x128xf32>
    %cst_11 = arith.constant 0.000000e+00 : f32
    %10 = vector.broadcast %cst_11 : f32 to vector<2x32xf32>
    %11 = vector.extract_strided_slice %6 {offsets = [0, 0, 0], sizes = [2, 1, 128], strides = [1, 1, 1]} : vector<2x8x256xf32> to vector<2x1x128xf32>
    %12 = vector.shape_cast %11 : vector<2x1x128xf32> to vector<2x128xf32>
    %cst_12 = arith.constant dense<0.000000e+00> : vector<2x128xf32>
    %13 = tpu.matmul %10, %8, %cst_12 {dimension_numbers = #tpu.dot_dimension_numbers<[1], [0], [0], [1], [0, 0, 1, 1], [], []>} : vector<2x32xf32>, vector<32x128xf32>, vector<2x128xf32> -> vector<2x128xf32>
    %14 = arith.addf %12, %13 : vector<2x128xf32>
    %15 = vector.extract_strided_slice %6 {offsets = [0, 7, 128], sizes = [2, 1, 128], strides = [1, 1, 1]} : vector<2x8x256xf32> to vector<2x1x128xf32>
    %16 = vector.shape_cast %15 : vector<2x1x128xf32> to vector<2x128xf32>
    %cst_13 = arith.constant dense<0.000000e+00> : vector<2x128xf32>
    %17 = tpu.matmul %10, %9, %cst_13 {dimension_numbers = #tpu.dot_dimension_numbers<[1], [0], [0], [1], [0, 0, 1, 1], [], []>} : vector<2x32xf32>, vector<32x128xf32>, vector<2x128xf32> -> vector<2x128xf32>
    %18 = arith.addf %16, %17 : vector<2x128xf32>
    %19 = vector.extract_strided_slice %14 {offsets = [0, 0], sizes = [2, 32], strides = [1, 1]} : vector<2x128xf32> to vector<2x32xf32>
    %20 = arith.negf %19 : vector<2x32xf32>
    %21 = math.exp %20 : vector<2x32xf32>
    %cst_14 = arith.constant 1.000000e+00 : f32
    %22 = vector.broadcast %cst_14 : f32 to vector<2x32xf32>
    %23 = arith.addf %22, %21 : vector<2x32xf32>
    %24 = arith.divf %22, %23 : vector<2x32xf32>
    %25 = vector.extract_strided_slice %14 {offsets = [0, 32], sizes = [2, 32], strides = [1, 1]} : vector<2x128xf32> to vector<2x32xf32>
    %26 = arith.negf %25 : vector<2x32xf32>
    %27 = math.exp %26 : vector<2x32xf32>
    %cst_15 = arith.constant 1.000000e+00 : f32
    %28 = vector.broadcast %cst_15 : f32 to vector<2x32xf32>
    %29 = arith.addf %28, %27 : vector<2x32xf32>
    %30 = arith.divf %28, %29 : vector<2x32xf32>
    %31 = vector.extract_strided_slice %14 {offsets = [0, 64], sizes = [2, 32], strides = [1, 1]} : vector<2x128xf32> to vector<2x32xf32>
    %32 = math.tanh %31 : vector<2x32xf32>
    %33 = vector.extract_strided_slice %14 {offsets = [0, 96], sizes = [2, 32], strides = [1, 1]} : vector<2x128xf32> to vector<2x32xf32>
    %34 = arith.negf %33 : vector<2x32xf32>
    %35 = math.exp %34 : vector<2x32xf32>
    %cst_16 = arith.constant 1.000000e+00 : f32
    %36 = vector.broadcast %cst_16 : f32 to vector<2x32xf32>
    %37 = arith.addf %36, %35 : vector<2x32xf32>
    %38 = arith.divf %36, %37 : vector<2x32xf32>
    %39 = arith.mulf %30, %10 : vector<2x32xf32>
    %40 = arith.mulf %24, %32 : vector<2x32xf32>
    %41 = arith.addf %39, %40 : vector<2x32xf32>
    %42 = math.tanh %41 : vector<2x32xf32>
    %43 = arith.mulf %38, %42 : vector<2x32xf32>
    %44 = vector.extract_strided_slice %18 {offsets = [0, 0], sizes = [2, 32], strides = [1, 1]} : vector<2x128xf32> to vector<2x32xf32>
    %45 = arith.negf %44 : vector<2x32xf32>
    %46 = math.exp %45 : vector<2x32xf32>
    %cst_17 = arith.constant 1.000000e+00 : f32
    %47 = vector.broadcast %cst_17 : f32 to vector<2x32xf32>
    %48 = arith.addf %47, %46 : vector<2x32xf32>
    %49 = arith.divf %47, %48 : vector<2x32xf32>
    %50 = vector.extract_strided_slice %18 {offsets = [0, 32], sizes = [2, 32], strides = [1, 1]} : vector<2x128xf32> to vector<2x32xf32>
    %51 = arith.negf %50 : vector<2x32xf32>
    %52 = math.exp %51 : vector<2x32xf32>
    %cst_18 = arith.constant 1.000000e+00 : f32
    %53 = vector.broadcast %cst_18 : f32 to vector<2x32xf32>
    %54 = arith.addf %53, %52 : vector<2x32xf32>
    %55 = arith.divf %53, %54 : vector<2x32xf32>
    %56 = vector.extract_strided_slice %18 {offsets = [0, 64], sizes = [2, 32], strides = [1, 1]} : vector<2x128xf32> to vector<2x32xf32>
    %57 = math.tanh %56 : vector<2x32xf32>
    %58 = vector.extract_strided_slice %18 {offsets = [0, 96], sizes = [2, 32], strides = [1, 1]} : vector<2x128xf32> to vector<2x32xf32>
    %59 = arith.negf %58 : vector<2x32xf32>
    %60 = math.exp %59 : vector<2x32xf32>
    %cst_19 = arith.constant 1.000000e+00 : f32
    %61 = vector.broadcast %cst_19 : f32 to vector<2x32xf32>
    %62 = arith.addf %61, %60 : vector<2x32xf32>
    %63 = arith.divf %61, %62 : vector<2x32xf32>
    %64 = arith.mulf %55, %10 : vector<2x32xf32>
    %65 = arith.mulf %49, %57 : vector<2x32xf32>
    %66 = arith.addf %64, %65 : vector<2x32xf32>
    %67 = math.tanh %66 : vector<2x32xf32>
    %68 = arith.mulf %63, %67 : vector<2x32xf32>
    %cst_20 = arith.constant 0.000000e+00 : f32
    %69 = vector.broadcast %cst_20 : f32 to vector<2x1xf32>
    %70 = arith.cmpf ogt, %7, %69 : vector<2x1xf32>
    %cst_21 = arith.constant 7.000000e+00 : f32
    %71 = vector.broadcast %cst_21 : f32 to vector<2x1xf32>
    %72 = arith.cmpf ogt, %7, %71 : vector<2x1xf32>
    %73 = vector.shape_cast %70 : vector<2x1xi1> to vector<2x1xi1>
    %74 = vector.broadcast %73 : vector<2x1xi1> to vector<2x32xi1>
    %75 = arith.select %74, %43, %10 : vector<2x32xi1>, vector<2x32xf32>
    %76 = vector.shape_cast %70 : vector<2x1xi1> to vector<2x1xi1>
    %77 = vector.broadcast %76 : vector<2x1xi1> to vector<2x32xi1>
    %78 = arith.select %77, %41, %10 : vector<2x32xi1>, vector<2x32xf32>
    %79 = vector.shape_cast %72 : vector<2x1xi1> to vector<2x1xi1>
    %80 = vector.broadcast %79 : vector<2x1xi1> to vector<2x32xi1>
    %81 = arith.select %80, %68, %10 : vector<2x32xi1>, vector<2x32xf32>
    %82 = vector.shape_cast %72 : vector<2x1xi1> to vector<2x1xi1>
    %83 = vector.broadcast %82 : vector<2x1xi1> to vector<2x32xi1>
    %84 = arith.select %83, %66, %10 : vector<2x32xi1>, vector<2x32xf32>
    %85 = vector.extract_strided_slice %6 {offsets = [0, 1, 0], sizes = [2, 1, 128], strides = [1, 1, 1]} : vector<2x8x256xf32> to vector<2x1x128xf32>
    %86 = vector.shape_cast %85 : vector<2x1x128xf32> to vector<2x128xf32>
    %cst_22 = arith.constant dense<0.000000e+00> : vector<2x128xf32>
    %87 = tpu.matmul %75, %8, %cst_22 {dimension_numbers = #tpu.dot_dimension_numbers<[1], [0], [0], [1], [0, 0, 1, 1], [], []>} : vector<2x32xf32>, vector<32x128xf32>, vector<2x128xf32> -> vector<2x128xf32>
    %88 = arith.addf %86, %87 : vector<2x128xf32>
    %89 = vector.extract_strided_slice %6 {offsets = [0, 6, 128], sizes = [2, 1, 128], strides = [1, 1, 1]} : vector<2x8x256xf32> to vector<2x1x128xf32>
    %90 = vector.shape_cast %89 : vector<2x1x128xf32> to vector<2x128xf32>
    %cst_23 = arith.constant dense<0.000000e+00> : vector<2x128xf32>
    %91 = tpu.matmul %81, %9, %cst_23 {dimension_numbers = #tpu.dot_dimension_numbers<[1], [0], [0], [1], [0, 0, 1, 1], [], []>} : vector<2x32xf32>, vector<32x128xf32>, vector<2x128xf32> -> vector<2x128xf32>
    %92 = arith.addf %90, %91 : vector<2x128xf32>
    %93 = vector.extract_strided_slice %88 {offsets = [0, 0], sizes = [2, 32], strides = [1, 1]} : vector<2x128xf32> to vector<2x32xf32>
    %94 = arith.negf %93 : vector<2x32xf32>
    %95 = math.exp %94 : vector<2x32xf32>
    %cst_24 = arith.constant 1.000000e+00 : f32
    %96 = vector.broadcast %cst_24 : f32 to vector<2x32xf32>
    %97 = arith.addf %96, %95 : vector<2x32xf32>
    %98 = arith.divf %96, %97 : vector<2x32xf32>
    %99 = vector.extract_strided_slice %88 {offsets = [0, 32], sizes = [2, 32], strides = [1, 1]} : vector<2x128xf32> to vector<2x32xf32>
    %100 = arith.negf %99 : vector<2x32xf32>
    %101 = math.exp %100 : vector<2x32xf32>
    %cst_25 = arith.constant 1.000000e+00 : f32
    %102 = vector.broadcast %cst_25 : f32 to vector<2x32xf32>
    %103 = arith.addf %102, %101 : vector<2x32xf32>
    %104 = arith.divf %102, %103 : vector<2x32xf32>
    %105 = vector.extract_strided_slice %88 {offsets = [0, 64], sizes = [2, 32], strides = [1, 1]} : vector<2x128xf32> to vector<2x32xf32>
    %106 = math.tanh %105 : vector<2x32xf32>
    %107 = vector.extract_strided_slice %88 {offsets = [0, 96], sizes = [2, 32], strides = [1, 1]} : vector<2x128xf32> to vector<2x32xf32>
    %108 = arith.negf %107 : vector<2x32xf32>
    %109 = math.exp %108 : vector<2x32xf32>
    %cst_26 = arith.constant 1.000000e+00 : f32
    %110 = vector.broadcast %cst_26 : f32 to vector<2x32xf32>
    %111 = arith.addf %110, %109 : vector<2x32xf32>
    %112 = arith.divf %110, %111 : vector<2x32xf32>
    %113 = arith.mulf %104, %78 : vector<2x32xf32>
    %114 = arith.mulf %98, %106 : vector<2x32xf32>
    %115 = arith.addf %113, %114 : vector<2x32xf32>
    %116 = math.tanh %115 : vector<2x32xf32>
    %117 = arith.mulf %112, %116 : vector<2x32xf32>
    %118 = vector.extract_strided_slice %92 {offsets = [0, 0], sizes = [2, 32], strides = [1, 1]} : vector<2x128xf32> to vector<2x32xf32>
    %119 = arith.negf %118 : vector<2x32xf32>
    %120 = math.exp %119 : vector<2x32xf32>
    %cst_27 = arith.constant 1.000000e+00 : f32
    %121 = vector.broadcast %cst_27 : f32 to vector<2x32xf32>
    %122 = arith.addf %121, %120 : vector<2x32xf32>
    %123 = arith.divf %121, %122 : vector<2x32xf32>
    %124 = vector.extract_strided_slice %92 {offsets = [0, 32], sizes = [2, 32], strides = [1, 1]} : vector<2x128xf32> to vector<2x32xf32>
    %125 = arith.negf %124 : vector<2x32xf32>
    %126 = math.exp %125 : vector<2x32xf32>
    %cst_28 = arith.constant 1.000000e+00 : f32
    %127 = vector.broadcast %cst_28 : f32 to vector<2x32xf32>
    %128 = arith.addf %127, %126 : vector<2x32xf32>
    %129 = arith.divf %127, %128 : vector<2x32xf32>
    %130 = vector.extract_strided_slice %92 {offsets = [0, 64], sizes = [2, 32], strides = [1, 1]} : vector<2x128xf32> to vector<2x32xf32>
    %131 = math.tanh %130 : vector<2x32xf32>
    %132 = vector.extract_strided_slice %92 {offsets = [0, 96], sizes = [2, 32], strides = [1, 1]} : vector<2x128xf32> to vector<2x32xf32>
    %133 = arith.negf %132 : vector<2x32xf32>
    %134 = math.exp %133 : vector<2x32xf32>
    %cst_29 = arith.constant 1.000000e+00 : f32
    %135 = vector.broadcast %cst_29 : f32 to vector<2x32xf32>
    %136 = arith.addf %135, %134 : vector<2x32xf32>
    %137 = arith.divf %135, %136 : vector<2x32xf32>
    %138 = arith.mulf %129, %84 : vector<2x32xf32>
    %139 = arith.mulf %123, %131 : vector<2x32xf32>
    %140 = arith.addf %138, %139 : vector<2x32xf32>
    %141 = math.tanh %140 : vector<2x32xf32>
    %142 = arith.mulf %137, %141 : vector<2x32xf32>
    %cst_30 = arith.constant 1.000000e+00 : f32
    %143 = vector.broadcast %cst_30 : f32 to vector<2x1xf32>
    %144 = arith.cmpf ogt, %7, %143 : vector<2x1xf32>
    %cst_31 = arith.constant 6.000000e+00 : f32
    %145 = vector.broadcast %cst_31 : f32 to vector<2x1xf32>
    %146 = arith.cmpf ogt, %7, %145 : vector<2x1xf32>
    %147 = vector.shape_cast %144 : vector<2x1xi1> to vector<2x1xi1>
    %148 = vector.broadcast %147 : vector<2x1xi1> to vector<2x32xi1>
    %149 = arith.select %148, %117, %75 : vector<2x32xi1>, vector<2x32xf32>
    %150 = vector.shape_cast %144 : vector<2x1xi1> to vector<2x1xi1>
    %151 = vector.broadcast %150 : vector<2x1xi1> to vector<2x32xi1>
    %152 = arith.select %151, %115, %78 : vector<2x32xi1>, vector<2x32xf32>
    %153 = vector.shape_cast %146 : vector<2x1xi1> to vector<2x1xi1>
    %154 = vector.broadcast %153 : vector<2x1xi1> to vector<2x32xi1>
    %155 = arith.select %154, %142, %81 : vector<2x32xi1>, vector<2x32xf32>
    %156 = vector.shape_cast %146 : vector<2x1xi1> to vector<2x1xi1>
    %157 = vector.broadcast %156 : vector<2x1xi1> to vector<2x32xi1>
    %158 = arith.select %157, %140, %84 : vector<2x32xi1>, vector<2x32xf32>
    %159 = vector.extract_strided_slice %6 {offsets = [0, 2, 0], sizes = [2, 1, 128], strides = [1, 1, 1]} : vector<2x8x256xf32> to vector<2x1x128xf32>
    %160 = vector.shape_cast %159 : vector<2x1x128xf32> to vector<2x128xf32>
    %cst_32 = arith.constant dense<0.000000e+00> : vector<2x128xf32>
    %161 = tpu.matmul %149, %8, %cst_32 {dimension_numbers = #tpu.dot_dimension_numbers<[1], [0], [0], [1], [0, 0, 1, 1], [], []>} : vector<2x32xf32>, vector<32x128xf32>, vector<2x128xf32> -> vector<2x128xf32>
    %162 = arith.addf %160, %161 : vector<2x128xf32>
    %163 = vector.extract_strided_slice %6 {offsets = [0, 5, 128], sizes = [2, 1, 128], strides = [1, 1, 1]} : vector<2x8x256xf32> to vector<2x1x128xf32>
    %164 = vector.shape_cast %163 : vector<2x1x128xf32> to vector<2x128xf32>
    %cst_33 = arith.constant dense<0.000000e+00> : vector<2x128xf32>
    %165 = tpu.matmul %155, %9, %cst_33 {dimension_numbers = #tpu.dot_dimension_numbers<[1], [0], [0], [1], [0, 0, 1, 1], [], []>} : vector<2x32xf32>, vector<32x128xf32>, vector<2x128xf32> -> vector<2x128xf32>
    %166 = arith.addf %164, %165 : vector<2x128xf32>
    %167 = vector.extract_strided_slice %162 {offsets = [0, 0], sizes = [2, 32], strides = [1, 1]} : vector<2x128xf32> to vector<2x32xf32>
    %168 = arith.negf %167 : vector<2x32xf32>
    %169 = math.exp %168 : vector<2x32xf32>
    %cst_34 = arith.constant 1.000000e+00 : f32
    %170 = vector.broadcast %cst_34 : f32 to vector<2x32xf32>
    %171 = arith.addf %170, %169 : vector<2x32xf32>
    %172 = arith.divf %170, %171 : vector<2x32xf32>
    %173 = vector.extract_strided_slice %162 {offsets = [0, 32], sizes = [2, 32], strides = [1, 1]} : vector<2x128xf32> to vector<2x32xf32>
    %174 = arith.negf %173 : vector<2x32xf32>
    %175 = math.exp %174 : vector<2x32xf32>
    %cst_35 = arith.constant 1.000000e+00 : f32
    %176 = vector.broadcast %cst_35 : f32 to vector<2x32xf32>
    %177 = arith.addf %176, %175 : vector<2x32xf32>
    %178 = arith.divf %176, %177 : vector<2x32xf32>
    %179 = vector.extract_strided_slice %162 {offsets = [0, 64], sizes = [2, 32], strides = [1, 1]} : vector<2x128xf32> to vector<2x32xf32>
    %180 = math.tanh %179 : vector<2x32xf32>
    %181 = vector.extract_strided_slice %162 {offsets = [0, 96], sizes = [2, 32], strides = [1, 1]} : vector<2x128xf32> to vector<2x32xf32>
    %182 = arith.negf %181 : vector<2x32xf32>
    %183 = math.exp %182 : vector<2x32xf32>
    %cst_36 = arith.constant 1.000000e+00 : f32
    %184 = vector.broadcast %cst_36 : f32 to vector<2x32xf32>
    %185 = arith.addf %184, %183 : vector<2x32xf32>
    %186 = arith.divf %184, %185 : vector<2x32xf32>
    %187 = arith.mulf %178, %152 : vector<2x32xf32>
    %188 = arith.mulf %172, %180 : vector<2x32xf32>
    %189 = arith.addf %187, %188 : vector<2x32xf32>
    %190 = math.tanh %189 : vector<2x32xf32>
    %191 = arith.mulf %186, %190 : vector<2x32xf32>
    %192 = vector.extract_strided_slice %166 {offsets = [0, 0], sizes = [2, 32], strides = [1, 1]} : vector<2x128xf32> to vector<2x32xf32>
    %193 = arith.negf %192 : vector<2x32xf32>
    %194 = math.exp %193 : vector<2x32xf32>
    %cst_37 = arith.constant 1.000000e+00 : f32
    %195 = vector.broadcast %cst_37 : f32 to vector<2x32xf32>
    %196 = arith.addf %195, %194 : vector<2x32xf32>
    %197 = arith.divf %195, %196 : vector<2x32xf32>
    %198 = vector.extract_strided_slice %166 {offsets = [0, 32], sizes = [2, 32], strides = [1, 1]} : vector<2x128xf32> to vector<2x32xf32>
    %199 = arith.negf %198 : vector<2x32xf32>
    %200 = math.exp %199 : vector<2x32xf32>
    %cst_38 = arith.constant 1.000000e+00 : f32
    %201 = vector.broadcast %cst_38 : f32 to vector<2x32xf32>
    %202 = arith.addf %201, %200 : vector<2x32xf32>
    %203 = arith.divf %201, %202 : vector<2x32xf32>
    %204 = vector.extract_strided_slice %166 {offsets = [0, 64], sizes = [2, 32], strides = [1, 1]} : vector<2x128xf32> to vector<2x32xf32>
    %205 = math.tanh %204 : vector<2x32xf32>
    %206 = vector.extract_strided_slice %166 {offsets = [0, 96], sizes = [2, 32], strides = [1, 1]} : vector<2x128xf32> to vector<2x32xf32>
    %207 = arith.negf %206 : vector<2x32xf32>
    %208 = math.exp %207 : vector<2x32xf32>
    %cst_39 = arith.constant 1.000000e+00 : f32
    %209 = vector.broadcast %cst_39 : f32 to vector<2x32xf32>
    %210 = arith.addf %209, %208 : vector<2x32xf32>
    %211 = arith.divf %209, %210 : vector<2x32xf32>
    %212 = arith.mulf %203, %158 : vector<2x32xf32>
    %213 = arith.mulf %197, %205 : vector<2x32xf32>
    %214 = arith.addf %212, %213 : vector<2x32xf32>
    %215 = math.tanh %214 : vector<2x32xf32>
    %216 = arith.mulf %211, %215 : vector<2x32xf32>
    %cst_40 = arith.constant 2.000000e+00 : f32
    %217 = vector.broadcast %cst_40 : f32 to vector<2x1xf32>
    %218 = arith.cmpf ogt, %7, %217 : vector<2x1xf32>
    %cst_41 = arith.constant 5.000000e+00 : f32
    %219 = vector.broadcast %cst_41 : f32 to vector<2x1xf32>
    %220 = arith.cmpf ogt, %7, %219 : vector<2x1xf32>
    %221 = vector.shape_cast %218 : vector<2x1xi1> to vector<2x1xi1>
    %222 = vector.broadcast %221 : vector<2x1xi1> to vector<2x32xi1>
    %223 = arith.select %222, %191, %149 : vector<2x32xi1>, vector<2x32xf32>
    %224 = vector.shape_cast %218 : vector<2x1xi1> to vector<2x1xi1>
    %225 = vector.broadcast %224 : vector<2x1xi1> to vector<2x32xi1>
    %226 = arith.select %225, %189, %152 : vector<2x32xi1>, vector<2x32xf32>
    %227 = vector.shape_cast %220 : vector<2x1xi1> to vector<2x1xi1>
    %228 = vector.broadcast %227 : vector<2x1xi1> to vector<2x32xi1>
    %229 = arith.select %228, %216, %155 : vector<2x32xi1>, vector<2x32xf32>
    %230 = vector.shape_cast %220 : vector<2x1xi1> to vector<2x1xi1>
    %231 = vector.broadcast %230 : vector<2x1xi1> to vector<2x32xi1>
    %232 = arith.select %231, %214, %158 : vector<2x32xi1>, vector<2x32xf32>
    %233 = vector.extract_strided_slice %6 {offsets = [0, 3, 0], sizes = [2, 1, 128], strides = [1, 1, 1]} : vector<2x8x256xf32> to vector<2x1x128xf32>
    %234 = vector.shape_cast %233 : vector<2x1x128xf32> to vector<2x128xf32>
    %cst_42 = arith.constant dense<0.000000e+00> : vector<2x128xf32>
    %235 = tpu.matmul %223, %8, %cst_42 {dimension_numbers = #tpu.dot_dimension_numbers<[1], [0], [0], [1], [0, 0, 1, 1], [], []>} : vector<2x32xf32>, vector<32x128xf32>, vector<2x128xf32> -> vector<2x128xf32>
    %236 = arith.addf %234, %235 : vector<2x128xf32>
    %237 = vector.extract_strided_slice %6 {offsets = [0, 4, 128], sizes = [2, 1, 128], strides = [1, 1, 1]} : vector<2x8x256xf32> to vector<2x1x128xf32>
    %238 = vector.shape_cast %237 : vector<2x1x128xf32> to vector<2x128xf32>
    %cst_43 = arith.constant dense<0.000000e+00> : vector<2x128xf32>
    %239 = tpu.matmul %229, %9, %cst_43 {dimension_numbers = #tpu.dot_dimension_numbers<[1], [0], [0], [1], [0, 0, 1, 1], [], []>} : vector<2x32xf32>, vector<32x128xf32>, vector<2x128xf32> -> vector<2x128xf32>
    %240 = arith.addf %238, %239 : vector<2x128xf32>
    %241 = vector.extract_strided_slice %236 {offsets = [0, 0], sizes = [2, 32], strides = [1, 1]} : vector<2x128xf32> to vector<2x32xf32>
    %242 = arith.negf %241 : vector<2x32xf32>
    %243 = math.exp %242 : vector<2x32xf32>
    %cst_44 = arith.constant 1.000000e+00 : f32
    %244 = vector.broadcast %cst_44 : f32 to vector<2x32xf32>
    %245 = arith.addf %244, %243 : vector<2x32xf32>
    %246 = arith.divf %244, %245 : vector<2x32xf32>
    %247 = vector.extract_strided_slice %236 {offsets = [0, 32], sizes = [2, 32], strides = [1, 1]} : vector<2x128xf32> to vector<2x32xf32>
    %248 = arith.negf %247 : vector<2x32xf32>
    %249 = math.exp %248 : vector<2x32xf32>
    %cst_45 = arith.constant 1.000000e+00 : f32
    %250 = vector.broadcast %cst_45 : f32 to vector<2x32xf32>
    %251 = arith.addf %250, %249 : vector<2x32xf32>
    %252 = arith.divf %250, %251 : vector<2x32xf32>
    %253 = vector.extract_strided_slice %236 {offsets = [0, 64], sizes = [2, 32], strides = [1, 1]} : vector<2x128xf32> to vector<2x32xf32>
    %254 = math.tanh %253 : vector<2x32xf32>
    %255 = vector.extract_strided_slice %236 {offsets = [0, 96], sizes = [2, 32], strides = [1, 1]} : vector<2x128xf32> to vector<2x32xf32>
    %256 = arith.negf %255 : vector<2x32xf32>
    %257 = math.exp %256 : vector<2x32xf32>
    %cst_46 = arith.constant 1.000000e+00 : f32
    %258 = vector.broadcast %cst_46 : f32 to vector<2x32xf32>
    %259 = arith.addf %258, %257 : vector<2x32xf32>
    %260 = arith.divf %258, %259 : vector<2x32xf32>
    %261 = arith.mulf %252, %226 : vector<2x32xf32>
    %262 = arith.mulf %246, %254 : vector<2x32xf32>
    %263 = arith.addf %261, %262 : vector<2x32xf32>
    %264 = math.tanh %263 : vector<2x32xf32>
    %265 = arith.mulf %260, %264 : vector<2x32xf32>
    %266 = vector.extract_strided_slice %240 {offsets = [0, 0], sizes = [2, 32], strides = [1, 1]} : vector<2x128xf32> to vector<2x32xf32>
    %267 = arith.negf %266 : vector<2x32xf32>
    %268 = math.exp %267 : vector<2x32xf32>
    %cst_47 = arith.constant 1.000000e+00 : f32
    %269 = vector.broadcast %cst_47 : f32 to vector<2x32xf32>
    %270 = arith.addf %269, %268 : vector<2x32xf32>
    %271 = arith.divf %269, %270 : vector<2x32xf32>
    %272 = vector.extract_strided_slice %240 {offsets = [0, 32], sizes = [2, 32], strides = [1, 1]} : vector<2x128xf32> to vector<2x32xf32>
    %273 = arith.negf %272 : vector<2x32xf32>
    %274 = math.exp %273 : vector<2x32xf32>
    %cst_48 = arith.constant 1.000000e+00 : f32
    %275 = vector.broadcast %cst_48 : f32 to vector<2x32xf32>
    %276 = arith.addf %275, %274 : vector<2x32xf32>
    %277 = arith.divf %275, %276 : vector<2x32xf32>
    %278 = vector.extract_strided_slice %240 {offsets = [0, 64], sizes = [2, 32], strides = [1, 1]} : vector<2x128xf32> to vector<2x32xf32>
    %279 = math.tanh %278 : vector<2x32xf32>
    %280 = vector.extract_strided_slice %240 {offsets = [0, 96], sizes = [2, 32], strides = [1, 1]} : vector<2x128xf32> to vector<2x32xf32>
    %281 = arith.negf %280 : vector<2x32xf32>
    %282 = math.exp %281 : vector<2x32xf32>
    %cst_49 = arith.constant 1.000000e+00 : f32
    %283 = vector.broadcast %cst_49 : f32 to vector<2x32xf32>
    %284 = arith.addf %283, %282 : vector<2x32xf32>
    %285 = arith.divf %283, %284 : vector<2x32xf32>
    %286 = arith.mulf %277, %232 : vector<2x32xf32>
    %287 = arith.mulf %271, %279 : vector<2x32xf32>
    %288 = arith.addf %286, %287 : vector<2x32xf32>
    %289 = math.tanh %288 : vector<2x32xf32>
    %290 = arith.mulf %285, %289 : vector<2x32xf32>
    %cst_50 = arith.constant 3.000000e+00 : f32
    %291 = vector.broadcast %cst_50 : f32 to vector<2x1xf32>
    %292 = arith.cmpf ogt, %7, %291 : vector<2x1xf32>
    %cst_51 = arith.constant 4.000000e+00 : f32
    %293 = vector.broadcast %cst_51 : f32 to vector<2x1xf32>
    %294 = arith.cmpf ogt, %7, %293 : vector<2x1xf32>
    %295 = vector.shape_cast %292 : vector<2x1xi1> to vector<2x1xi1>
    %296 = vector.broadcast %295 : vector<2x1xi1> to vector<2x32xi1>
    %297 = arith.select %296, %265, %223 : vector<2x32xi1>, vector<2x32xf32>
    %298 = vector.shape_cast %292 : vector<2x1xi1> to vector<2x1xi1>
    %299 = vector.broadcast %298 : vector<2x1xi1> to vector<2x32xi1>
    %300 = arith.select %299, %263, %226 : vector<2x32xi1>, vector<2x32xf32>
    %301 = vector.shape_cast %294 : vector<2x1xi1> to vector<2x1xi1>
    %302 = vector.broadcast %301 : vector<2x1xi1> to vector<2x32xi1>
    %303 = arith.select %302, %290, %229 : vector<2x32xi1>, vector<2x32xf32>
    %304 = vector.shape_cast %294 : vector<2x1xi1> to vector<2x1xi1>
    %305 = vector.broadcast %304 : vector<2x1xi1> to vector<2x32xi1>
    %306 = arith.select %305, %288, %232 : vector<2x32xi1>, vector<2x32xf32>
    %307 = vector.extract_strided_slice %6 {offsets = [0, 4, 0], sizes = [2, 1, 128], strides = [1, 1, 1]} : vector<2x8x256xf32> to vector<2x1x128xf32>
    %308 = vector.shape_cast %307 : vector<2x1x128xf32> to vector<2x128xf32>
    %cst_52 = arith.constant dense<0.000000e+00> : vector<2x128xf32>
    %309 = tpu.matmul %297, %8, %cst_52 {dimension_numbers = #tpu.dot_dimension_numbers<[1], [0], [0], [1], [0, 0, 1, 1], [], []>} : vector<2x32xf32>, vector<32x128xf32>, vector<2x128xf32> -> vector<2x128xf32>
    %310 = arith.addf %308, %309 : vector<2x128xf32>
    %311 = vector.extract_strided_slice %6 {offsets = [0, 3, 128], sizes = [2, 1, 128], strides = [1, 1, 1]} : vector<2x8x256xf32> to vector<2x1x128xf32>
    %312 = vector.shape_cast %311 : vector<2x1x128xf32> to vector<2x128xf32>
    %cst_53 = arith.constant dense<0.000000e+00> : vector<2x128xf32>
    %313 = tpu.matmul %303, %9, %cst_53 {dimension_numbers = #tpu.dot_dimension_numbers<[1], [0], [0], [1], [0, 0, 1, 1], [], []>} : vector<2x32xf32>, vector<32x128xf32>, vector<2x128xf32> -> vector<2x128xf32>
    %314 = arith.addf %312, %313 : vector<2x128xf32>
    %315 = vector.extract_strided_slice %310 {offsets = [0, 0], sizes = [2, 32], strides = [1, 1]} : vector<2x128xf32> to vector<2x32xf32>
    %316 = arith.negf %315 : vector<2x32xf32>
    %317 = math.exp %316 : vector<2x32xf32>
    %cst_54 = arith.constant 1.000000e+00 : f32
    %318 = vector.broadcast %cst_54 : f32 to vector<2x32xf32>
    %319 = arith.addf %318, %317 : vector<2x32xf32>
    %320 = arith.divf %318, %319 : vector<2x32xf32>
    %321 = vector.extract_strided_slice %310 {offsets = [0, 32], sizes = [2, 32], strides = [1, 1]} : vector<2x128xf32> to vector<2x32xf32>
    %322 = arith.negf %321 : vector<2x32xf32>
    %323 = math.exp %322 : vector<2x32xf32>
    %cst_55 = arith.constant 1.000000e+00 : f32
    %324 = vector.broadcast %cst_55 : f32 to vector<2x32xf32>
    %325 = arith.addf %324, %323 : vector<2x32xf32>
    %326 = arith.divf %324, %325 : vector<2x32xf32>
    %327 = vector.extract_strided_slice %310 {offsets = [0, 64], sizes = [2, 32], strides = [1, 1]} : vector<2x128xf32> to vector<2x32xf32>
    %328 = math.tanh %327 : vector<2x32xf32>
    %329 = vector.extract_strided_slice %310 {offsets = [0, 96], sizes = [2, 32], strides = [1, 1]} : vector<2x128xf32> to vector<2x32xf32>
    %330 = arith.negf %329 : vector<2x32xf32>
    %331 = math.exp %330 : vector<2x32xf32>
    %cst_56 = arith.constant 1.000000e+00 : f32
    %332 = vector.broadcast %cst_56 : f32 to vector<2x32xf32>
    %333 = arith.addf %332, %331 : vector<2x32xf32>
    %334 = arith.divf %332, %333 : vector<2x32xf32>
    %335 = arith.mulf %326, %300 : vector<2x32xf32>
    %336 = arith.mulf %320, %328 : vector<2x32xf32>
    %337 = arith.addf %335, %336 : vector<2x32xf32>
    %338 = math.tanh %337 : vector<2x32xf32>
    %339 = arith.mulf %334, %338 : vector<2x32xf32>
    %340 = vector.extract_strided_slice %314 {offsets = [0, 0], sizes = [2, 32], strides = [1, 1]} : vector<2x128xf32> to vector<2x32xf32>
    %341 = arith.negf %340 : vector<2x32xf32>
    %342 = math.exp %341 : vector<2x32xf32>
    %cst_57 = arith.constant 1.000000e+00 : f32
    %343 = vector.broadcast %cst_57 : f32 to vector<2x32xf32>
    %344 = arith.addf %343, %342 : vector<2x32xf32>
    %345 = arith.divf %343, %344 : vector<2x32xf32>
    %346 = vector.extract_strided_slice %314 {offsets = [0, 32], sizes = [2, 32], strides = [1, 1]} : vector<2x128xf32> to vector<2x32xf32>
    %347 = arith.negf %346 : vector<2x32xf32>
    %348 = math.exp %347 : vector<2x32xf32>
    %cst_58 = arith.constant 1.000000e+00 : f32
    %349 = vector.broadcast %cst_58 : f32 to vector<2x32xf32>
    %350 = arith.addf %349, %348 : vector<2x32xf32>
    %351 = arith.divf %349, %350 : vector<2x32xf32>
    %352 = vector.extract_strided_slice %314 {offsets = [0, 64], sizes = [2, 32], strides = [1, 1]} : vector<2x128xf32> to vector<2x32xf32>
    %353 = math.tanh %352 : vector<2x32xf32>
    %354 = vector.extract_strided_slice %314 {offsets = [0, 96], sizes = [2, 32], strides = [1, 1]} : vector<2x128xf32> to vector<2x32xf32>
    %355 = arith.negf %354 : vector<2x32xf32>
    %356 = math.exp %355 : vector<2x32xf32>
    %cst_59 = arith.constant 1.000000e+00 : f32
    %357 = vector.broadcast %cst_59 : f32 to vector<2x32xf32>
    %358 = arith.addf %357, %356 : vector<2x32xf32>
    %359 = arith.divf %357, %358 : vector<2x32xf32>
    %360 = arith.mulf %351, %306 : vector<2x32xf32>
    %361 = arith.mulf %345, %353 : vector<2x32xf32>
    %362 = arith.addf %360, %361 : vector<2x32xf32>
    %363 = math.tanh %362 : vector<2x32xf32>
    %364 = arith.mulf %359, %363 : vector<2x32xf32>
    %cst_60 = arith.constant 4.000000e+00 : f32
    %365 = vector.broadcast %cst_60 : f32 to vector<2x1xf32>
    %366 = arith.cmpf ogt, %7, %365 : vector<2x1xf32>
    %cst_61 = arith.constant 3.000000e+00 : f32
    %367 = vector.broadcast %cst_61 : f32 to vector<2x1xf32>
    %368 = arith.cmpf ogt, %7, %367 : vector<2x1xf32>
    %369 = vector.shape_cast %366 : vector<2x1xi1> to vector<2x1xi1>
    %370 = vector.broadcast %369 : vector<2x1xi1> to vector<2x32xi1>
    %371 = arith.select %370, %339, %297 : vector<2x32xi1>, vector<2x32xf32>
    %372 = vector.shape_cast %366 : vector<2x1xi1> to vector<2x1xi1>
    %373 = vector.broadcast %372 : vector<2x1xi1> to vector<2x32xi1>
    %374 = arith.select %373, %337, %300 : vector<2x32xi1>, vector<2x32xf32>
    %375 = vector.shape_cast %368 : vector<2x1xi1> to vector<2x1xi1>
    %376 = vector.broadcast %375 : vector<2x1xi1> to vector<2x32xi1>
    %377 = arith.select %376, %364, %303 : vector<2x32xi1>, vector<2x32xf32>
    %378 = vector.shape_cast %368 : vector<2x1xi1> to vector<2x1xi1>
    %379 = vector.broadcast %378 : vector<2x1xi1> to vector<2x32xi1>
    %380 = arith.select %379, %362, %306 : vector<2x32xi1>, vector<2x32xf32>
    %381 = vector.extract_strided_slice %6 {offsets = [0, 5, 0], sizes = [2, 1, 128], strides = [1, 1, 1]} : vector<2x8x256xf32> to vector<2x1x128xf32>
    %382 = vector.shape_cast %381 : vector<2x1x128xf32> to vector<2x128xf32>
    %cst_62 = arith.constant dense<0.000000e+00> : vector<2x128xf32>
    %383 = tpu.matmul %371, %8, %cst_62 {dimension_numbers = #tpu.dot_dimension_numbers<[1], [0], [0], [1], [0, 0, 1, 1], [], []>} : vector<2x32xf32>, vector<32x128xf32>, vector<2x128xf32> -> vector<2x128xf32>
    %384 = arith.addf %382, %383 : vector<2x128xf32>
    %385 = vector.extract_strided_slice %6 {offsets = [0, 2, 128], sizes = [2, 1, 128], strides = [1, 1, 1]} : vector<2x8x256xf32> to vector<2x1x128xf32>
    %386 = vector.shape_cast %385 : vector<2x1x128xf32> to vector<2x128xf32>
    %cst_63 = arith.constant dense<0.000000e+00> : vector<2x128xf32>
    %387 = tpu.matmul %377, %9, %cst_63 {dimension_numbers = #tpu.dot_dimension_numbers<[1], [0], [0], [1], [0, 0, 1, 1], [], []>} : vector<2x32xf32>, vector<32x128xf32>, vector<2x128xf32> -> vector<2x128xf32>
    %388 = arith.addf %386, %387 : vector<2x128xf32>
    %389 = vector.extract_strided_slice %384 {offsets = [0, 0], sizes = [2, 32], strides = [1, 1]} : vector<2x128xf32> to vector<2x32xf32>
    %390 = arith.negf %389 : vector<2x32xf32>
    %391 = math.exp %390 : vector<2x32xf32>
    %cst_64 = arith.constant 1.000000e+00 : f32
    %392 = vector.broadcast %cst_64 : f32 to vector<2x32xf32>
    %393 = arith.addf %392, %391 : vector<2x32xf32>
    %394 = arith.divf %392, %393 : vector<2x32xf32>
    %395 = vector.extract_strided_slice %384 {offsets = [0, 32], sizes = [2, 32], strides = [1, 1]} : vector<2x128xf32> to vector<2x32xf32>
    %396 = arith.negf %395 : vector<2x32xf32>
    %397 = math.exp %396 : vector<2x32xf32>
    %cst_65 = arith.constant 1.000000e+00 : f32
    %398 = vector.broadcast %cst_65 : f32 to vector<2x32xf32>
    %399 = arith.addf %398, %397 : vector<2x32xf32>
    %400 = arith.divf %398, %399 : vector<2x32xf32>
    %401 = vector.extract_strided_slice %384 {offsets = [0, 64], sizes = [2, 32], strides = [1, 1]} : vector<2x128xf32> to vector<2x32xf32>
    %402 = math.tanh %401 : vector<2x32xf32>
    %403 = vector.extract_strided_slice %384 {offsets = [0, 96], sizes = [2, 32], strides = [1, 1]} : vector<2x128xf32> to vector<2x32xf32>
    %404 = arith.negf %403 : vector<2x32xf32>
    %405 = math.exp %404 : vector<2x32xf32>
    %cst_66 = arith.constant 1.000000e+00 : f32
    %406 = vector.broadcast %cst_66 : f32 to vector<2x32xf32>
    %407 = arith.addf %406, %405 : vector<2x32xf32>
    %408 = arith.divf %406, %407 : vector<2x32xf32>
    %409 = arith.mulf %400, %374 : vector<2x32xf32>
    %410 = arith.mulf %394, %402 : vector<2x32xf32>
    %411 = arith.addf %409, %410 : vector<2x32xf32>
    %412 = math.tanh %411 : vector<2x32xf32>
    %413 = arith.mulf %408, %412 : vector<2x32xf32>
    %414 = vector.extract_strided_slice %388 {offsets = [0, 0], sizes = [2, 32], strides = [1, 1]} : vector<2x128xf32> to vector<2x32xf32>
    %415 = arith.negf %414 : vector<2x32xf32>
    %416 = math.exp %415 : vector<2x32xf32>
    %cst_67 = arith.constant 1.000000e+00 : f32
    %417 = vector.broadcast %cst_67 : f32 to vector<2x32xf32>
    %418 = arith.addf %417, %416 : vector<2x32xf32>
    %419 = arith.divf %417, %418 : vector<2x32xf32>
    %420 = vector.extract_strided_slice %388 {offsets = [0, 32], sizes = [2, 32], strides = [1, 1]} : vector<2x128xf32> to vector<2x32xf32>
    %421 = arith.negf %420 : vector<2x32xf32>
    %422 = math.exp %421 : vector<2x32xf32>
    %cst_68 = arith.constant 1.000000e+00 : f32
    %423 = vector.broadcast %cst_68 : f32 to vector<2x32xf32>
    %424 = arith.addf %423, %422 : vector<2x32xf32>
    %425 = arith.divf %423, %424 : vector<2x32xf32>
    %426 = vector.extract_strided_slice %388 {offsets = [0, 64], sizes = [2, 32], strides = [1, 1]} : vector<2x128xf32> to vector<2x32xf32>
    %427 = math.tanh %426 : vector<2x32xf32>
    %428 = vector.extract_strided_slice %388 {offsets = [0, 96], sizes = [2, 32], strides = [1, 1]} : vector<2x128xf32> to vector<2x32xf32>
    %429 = arith.negf %428 : vector<2x32xf32>
    %430 = math.exp %429 : vector<2x32xf32>
    %cst_69 = arith.constant 1.000000e+00 : f32
    %431 = vector.broadcast %cst_69 : f32 to vector<2x32xf32>
    %432 = arith.addf %431, %430 : vector<2x32xf32>
    %433 = arith.divf %431, %432 : vector<2x32xf32>
    %434 = arith.mulf %425, %380 : vector<2x32xf32>
    %435 = arith.mulf %419, %427 : vector<2x32xf32>
    %436 = arith.addf %434, %435 : vector<2x32xf32>
    %437 = math.tanh %436 : vector<2x32xf32>
    %438 = arith.mulf %433, %437 : vector<2x32xf32>
    %cst_70 = arith.constant 5.000000e+00 : f32
    %439 = vector.broadcast %cst_70 : f32 to vector<2x1xf32>
    %440 = arith.cmpf ogt, %7, %439 : vector<2x1xf32>
    %cst_71 = arith.constant 2.000000e+00 : f32
    %441 = vector.broadcast %cst_71 : f32 to vector<2x1xf32>
    %442 = arith.cmpf ogt, %7, %441 : vector<2x1xf32>
    %443 = vector.shape_cast %440 : vector<2x1xi1> to vector<2x1xi1>
    %444 = vector.broadcast %443 : vector<2x1xi1> to vector<2x32xi1>
    %445 = arith.select %444, %413, %371 : vector<2x32xi1>, vector<2x32xf32>
    %446 = vector.shape_cast %440 : vector<2x1xi1> to vector<2x1xi1>
    %447 = vector.broadcast %446 : vector<2x1xi1> to vector<2x32xi1>
    %448 = arith.select %447, %411, %374 : vector<2x32xi1>, vector<2x32xf32>
    %449 = vector.shape_cast %442 : vector<2x1xi1> to vector<2x1xi1>
    %450 = vector.broadcast %449 : vector<2x1xi1> to vector<2x32xi1>
    %451 = arith.select %450, %438, %377 : vector<2x32xi1>, vector<2x32xf32>
    %452 = vector.shape_cast %442 : vector<2x1xi1> to vector<2x1xi1>
    %453 = vector.broadcast %452 : vector<2x1xi1> to vector<2x32xi1>
    %454 = arith.select %453, %436, %380 : vector<2x32xi1>, vector<2x32xf32>
    %455 = vector.extract_strided_slice %6 {offsets = [0, 6, 0], sizes = [2, 1, 128], strides = [1, 1, 1]} : vector<2x8x256xf32> to vector<2x1x128xf32>
    %456 = vector.shape_cast %455 : vector<2x1x128xf32> to vector<2x128xf32>
    %cst_72 = arith.constant dense<0.000000e+00> : vector<2x128xf32>
    %457 = tpu.matmul %445, %8, %cst_72 {dimension_numbers = #tpu.dot_dimension_numbers<[1], [0], [0], [1], [0, 0, 1, 1], [], []>} : vector<2x32xf32>, vector<32x128xf32>, vector<2x128xf32> -> vector<2x128xf32>
    %458 = arith.addf %456, %457 : vector<2x128xf32>
    %459 = vector.extract_strided_slice %6 {offsets = [0, 1, 128], sizes = [2, 1, 128], strides = [1, 1, 1]} : vector<2x8x256xf32> to vector<2x1x128xf32>
    %460 = vector.shape_cast %459 : vector<2x1x128xf32> to vector<2x128xf32>
    %cst_73 = arith.constant dense<0.000000e+00> : vector<2x128xf32>
    %461 = tpu.matmul %451, %9, %cst_73 {dimension_numbers = #tpu.dot_dimension_numbers<[1], [0], [0], [1], [0, 0, 1, 1], [], []>} : vector<2x32xf32>, vector<32x128xf32>, vector<2x128xf32> -> vector<2x128xf32>
    %462 = arith.addf %460, %461 : vector<2x128xf32>
    %463 = vector.extract_strided_slice %458 {offsets = [0, 0], sizes = [2, 32], strides = [1, 1]} : vector<2x128xf32> to vector<2x32xf32>
    %464 = arith.negf %463 : vector<2x32xf32>
    %465 = math.exp %464 : vector<2x32xf32>
    %cst_74 = arith.constant 1.000000e+00 : f32
    %466 = vector.broadcast %cst_74 : f32 to vector<2x32xf32>
    %467 = arith.addf %466, %465 : vector<2x32xf32>
    %468 = arith.divf %466, %467 : vector<2x32xf32>
    %469 = vector.extract_strided_slice %458 {offsets = [0, 32], sizes = [2, 32], strides = [1, 1]} : vector<2x128xf32> to vector<2x32xf32>
    %470 = arith.negf %469 : vector<2x32xf32>
    %471 = math.exp %470 : vector<2x32xf32>
    %cst_75 = arith.constant 1.000000e+00 : f32
    %472 = vector.broadcast %cst_75 : f32 to vector<2x32xf32>
    %473 = arith.addf %472, %471 : vector<2x32xf32>
    %474 = arith.divf %472, %473 : vector<2x32xf32>
    %475 = vector.extract_strided_slice %458 {offsets = [0, 64], sizes = [2, 32], strides = [1, 1]} : vector<2x128xf32> to vector<2x32xf32>
    %476 = math.tanh %475 : vector<2x32xf32>
    %477 = vector.extract_strided_slice %458 {offsets = [0, 96], sizes = [2, 32], strides = [1, 1]} : vector<2x128xf32> to vector<2x32xf32>
    %478 = arith.negf %477 : vector<2x32xf32>
    %479 = math.exp %478 : vector<2x32xf32>
    %cst_76 = arith.constant 1.000000e+00 : f32
    %480 = vector.broadcast %cst_76 : f32 to vector<2x32xf32>
    %481 = arith.addf %480, %479 : vector<2x32xf32>
    %482 = arith.divf %480, %481 : vector<2x32xf32>
    %483 = arith.mulf %474, %448 : vector<2x32xf32>
    %484 = arith.mulf %468, %476 : vector<2x32xf32>
    %485 = arith.addf %483, %484 : vector<2x32xf32>
    %486 = math.tanh %485 : vector<2x32xf32>
    %487 = arith.mulf %482, %486 : vector<2x32xf32>
    %488 = vector.extract_strided_slice %462 {offsets = [0, 0], sizes = [2, 32], strides = [1, 1]} : vector<2x128xf32> to vector<2x32xf32>
    %489 = arith.negf %488 : vector<2x32xf32>
    %490 = math.exp %489 : vector<2x32xf32>
    %cst_77 = arith.constant 1.000000e+00 : f32
    %491 = vector.broadcast %cst_77 : f32 to vector<2x32xf32>
    %492 = arith.addf %491, %490 : vector<2x32xf32>
    %493 = arith.divf %491, %492 : vector<2x32xf32>
    %494 = vector.extract_strided_slice %462 {offsets = [0, 32], sizes = [2, 32], strides = [1, 1]} : vector<2x128xf32> to vector<2x32xf32>
    %495 = arith.negf %494 : vector<2x32xf32>
    %496 = math.exp %495 : vector<2x32xf32>
    %cst_78 = arith.constant 1.000000e+00 : f32
    %497 = vector.broadcast %cst_78 : f32 to vector<2x32xf32>
    %498 = arith.addf %497, %496 : vector<2x32xf32>
    %499 = arith.divf %497, %498 : vector<2x32xf32>
    %500 = vector.extract_strided_slice %462 {offsets = [0, 64], sizes = [2, 32], strides = [1, 1]} : vector<2x128xf32> to vector<2x32xf32>
    %501 = math.tanh %500 : vector<2x32xf32>
    %502 = vector.extract_strided_slice %462 {offsets = [0, 96], sizes = [2, 32], strides = [1, 1]} : vector<2x128xf32> to vector<2x32xf32>
    %503 = arith.negf %502 : vector<2x32xf32>
    %504 = math.exp %503 : vector<2x32xf32>
    %cst_79 = arith.constant 1.000000e+00 : f32
    %505 = vector.broadcast %cst_79 : f32 to vector<2x32xf32>
    %506 = arith.addf %505, %504 : vector<2x32xf32>
    %507 = arith.divf %505, %506 : vector<2x32xf32>
    %508 = arith.mulf %499, %454 : vector<2x32xf32>
    %509 = arith.mulf %493, %501 : vector<2x32xf32>
    %510 = arith.addf %508, %509 : vector<2x32xf32>
    %511 = math.tanh %510 : vector<2x32xf32>
    %512 = arith.mulf %507, %511 : vector<2x32xf32>
    %cst_80 = arith.constant 6.000000e+00 : f32
    %513 = vector.broadcast %cst_80 : f32 to vector<2x1xf32>
    %514 = arith.cmpf ogt, %7, %513 : vector<2x1xf32>
    %cst_81 = arith.constant 1.000000e+00 : f32
    %515 = vector.broadcast %cst_81 : f32 to vector<2x1xf32>
    %516 = arith.cmpf ogt, %7, %515 : vector<2x1xf32>
    %517 = vector.shape_cast %514 : vector<2x1xi1> to vector<2x1xi1>
    %518 = vector.broadcast %517 : vector<2x1xi1> to vector<2x32xi1>
    %519 = arith.select %518, %487, %445 : vector<2x32xi1>, vector<2x32xf32>
    %520 = vector.shape_cast %514 : vector<2x1xi1> to vector<2x1xi1>
    %521 = vector.broadcast %520 : vector<2x1xi1> to vector<2x32xi1>
    %522 = arith.select %521, %485, %448 : vector<2x32xi1>, vector<2x32xf32>
    %523 = vector.shape_cast %516 : vector<2x1xi1> to vector<2x1xi1>
    %524 = vector.broadcast %523 : vector<2x1xi1> to vector<2x32xi1>
    %525 = arith.select %524, %512, %451 : vector<2x32xi1>, vector<2x32xf32>
    %526 = vector.shape_cast %516 : vector<2x1xi1> to vector<2x1xi1>
    %527 = vector.broadcast %526 : vector<2x1xi1> to vector<2x32xi1>
    %528 = arith.select %527, %510, %454 : vector<2x32xi1>, vector<2x32xf32>
    %529 = vector.extract_strided_slice %6 {offsets = [0, 7, 0], sizes = [2, 1, 128], strides = [1, 1, 1]} : vector<2x8x256xf32> to vector<2x1x128xf32>
    %530 = vector.shape_cast %529 : vector<2x1x128xf32> to vector<2x128xf32>
    %cst_82 = arith.constant dense<0.000000e+00> : vector<2x128xf32>
    %531 = tpu.matmul %519, %8, %cst_82 {dimension_numbers = #tpu.dot_dimension_numbers<[1], [0], [0], [1], [0, 0, 1, 1], [], []>} : vector<2x32xf32>, vector<32x128xf32>, vector<2x128xf32> -> vector<2x128xf32>
    %532 = arith.addf %530, %531 : vector<2x128xf32>
    %533 = vector.extract_strided_slice %6 {offsets = [0, 0, 128], sizes = [2, 1, 128], strides = [1, 1, 1]} : vector<2x8x256xf32> to vector<2x1x128xf32>
    %534 = vector.shape_cast %533 : vector<2x1x128xf32> to vector<2x128xf32>
    %cst_83 = arith.constant dense<0.000000e+00> : vector<2x128xf32>
    %535 = tpu.matmul %525, %9, %cst_83 {dimension_numbers = #tpu.dot_dimension_numbers<[1], [0], [0], [1], [0, 0, 1, 1], [], []>} : vector<2x32xf32>, vector<32x128xf32>, vector<2x128xf32> -> vector<2x128xf32>
    %536 = arith.addf %534, %535 : vector<2x128xf32>
    %537 = vector.extract_strided_slice %532 {offsets = [0, 0], sizes = [2, 32], strides = [1, 1]} : vector<2x128xf32> to vector<2x32xf32>
    %538 = arith.negf %537 : vector<2x32xf32>
    %539 = math.exp %538 : vector<2x32xf32>
    %cst_84 = arith.constant 1.000000e+00 : f32
    %540 = vector.broadcast %cst_84 : f32 to vector<2x32xf32>
    %541 = arith.addf %540, %539 : vector<2x32xf32>
    %542 = arith.divf %540, %541 : vector<2x32xf32>
    %543 = vector.extract_strided_slice %532 {offsets = [0, 32], sizes = [2, 32], strides = [1, 1]} : vector<2x128xf32> to vector<2x32xf32>
    %544 = arith.negf %543 : vector<2x32xf32>
    %545 = math.exp %544 : vector<2x32xf32>
    %cst_85 = arith.constant 1.000000e+00 : f32
    %546 = vector.broadcast %cst_85 : f32 to vector<2x32xf32>
    %547 = arith.addf %546, %545 : vector<2x32xf32>
    %548 = arith.divf %546, %547 : vector<2x32xf32>
    %549 = vector.extract_strided_slice %532 {offsets = [0, 64], sizes = [2, 32], strides = [1, 1]} : vector<2x128xf32> to vector<2x32xf32>
    %550 = math.tanh %549 : vector<2x32xf32>
    %551 = vector.extract_strided_slice %532 {offsets = [0, 96], sizes = [2, 32], strides = [1, 1]} : vector<2x128xf32> to vector<2x32xf32>
    %552 = arith.negf %551 : vector<2x32xf32>
    %553 = math.exp %552 : vector<2x32xf32>
    %cst_86 = arith.constant 1.000000e+00 : f32
    %554 = vector.broadcast %cst_86 : f32 to vector<2x32xf32>
    %555 = arith.addf %554, %553 : vector<2x32xf32>
    %556 = arith.divf %554, %555 : vector<2x32xf32>
    %557 = arith.mulf %548, %522 : vector<2x32xf32>
    %558 = arith.mulf %542, %550 : vector<2x32xf32>
    %559 = arith.addf %557, %558 : vector<2x32xf32>
    %560 = math.tanh %559 : vector<2x32xf32>
    %561 = arith.mulf %556, %560 : vector<2x32xf32>
    %562 = vector.extract_strided_slice %536 {offsets = [0, 0], sizes = [2, 32], strides = [1, 1]} : vector<2x128xf32> to vector<2x32xf32>
    %563 = arith.negf %562 : vector<2x32xf32>
    %564 = math.exp %563 : vector<2x32xf32>
    %cst_87 = arith.constant 1.000000e+00 : f32
    %565 = vector.broadcast %cst_87 : f32 to vector<2x32xf32>
    %566 = arith.addf %565, %564 : vector<2x32xf32>
    %567 = arith.divf %565, %566 : vector<2x32xf32>
    %568 = vector.extract_strided_slice %536 {offsets = [0, 32], sizes = [2, 32], strides = [1, 1]} : vector<2x128xf32> to vector<2x32xf32>
    %569 = arith.negf %568 : vector<2x32xf32>
    %570 = math.exp %569 : vector<2x32xf32>
    %cst_88 = arith.constant 1.000000e+00 : f32
    %571 = vector.broadcast %cst_88 : f32 to vector<2x32xf32>
    %572 = arith.addf %571, %570 : vector<2x32xf32>
    %573 = arith.divf %571, %572 : vector<2x32xf32>
    %574 = vector.extract_strided_slice %536 {offsets = [0, 64], sizes = [2, 32], strides = [1, 1]} : vector<2x128xf32> to vector<2x32xf32>
    %575 = math.tanh %574 : vector<2x32xf32>
    %576 = vector.extract_strided_slice %536 {offsets = [0, 96], sizes = [2, 32], strides = [1, 1]} : vector<2x128xf32> to vector<2x32xf32>
    %577 = arith.negf %576 : vector<2x32xf32>
    %578 = math.exp %577 : vector<2x32xf32>
    %cst_89 = arith.constant 1.000000e+00 : f32
    %579 = vector.broadcast %cst_89 : f32 to vector<2x32xf32>
    %580 = arith.addf %579, %578 : vector<2x32xf32>
    %581 = arith.divf %579, %580 : vector<2x32xf32>
    %582 = arith.mulf %573, %528 : vector<2x32xf32>
    %583 = arith.mulf %567, %575 : vector<2x32xf32>
    %584 = arith.addf %582, %583 : vector<2x32xf32>
    %585 = math.tanh %584 : vector<2x32xf32>
    %586 = arith.mulf %581, %585 : vector<2x32xf32>
    %cst_90 = arith.constant 7.000000e+00 : f32
    %587 = vector.broadcast %cst_90 : f32 to vector<2x1xf32>
    %588 = arith.cmpf ogt, %7, %587 : vector<2x1xf32>
    %cst_91 = arith.constant 0.000000e+00 : f32
    %589 = vector.broadcast %cst_91 : f32 to vector<2x1xf32>
    %590 = arith.cmpf ogt, %7, %589 : vector<2x1xf32>
    %591 = vector.shape_cast %588 : vector<2x1xi1> to vector<2x1xi1>
    %592 = vector.broadcast %591 : vector<2x1xi1> to vector<2x32xi1>
    %593 = arith.select %592, %561, %519 : vector<2x32xi1>, vector<2x32xf32>
    %594 = vector.shape_cast %590 : vector<2x1xi1> to vector<2x1xi1>
    %595 = vector.broadcast %594 : vector<2x1xi1> to vector<2x32xi1>
    %596 = arith.select %595, %586, %525 : vector<2x32xi1>, vector<2x32xf32>
    %c0_92 = arith.constant 0 : index
    %c0_93 = arith.constant 0 : index
    %597 = vector.load %arg7[%c0_92, %c0_93] : memref<32x64xf32, #tpu.memory_space<vmem>>, vector<32x64xf32>
    %cst_94 = arith.constant dense<0.000000e+00> : vector<2x64xf32>
    %598 = tpu.matmul %593, %597, %cst_94 {dimension_numbers = #tpu.dot_dimension_numbers<[1], [0], [0], [1], [0, 0, 1, 1], [], []>} : vector<2x32xf32>, vector<32x64xf32>, vector<2x64xf32> -> vector<2x64xf32>
    %c0_95 = arith.constant 0 : index
    %c0_96 = arith.constant 0 : index
    %599 = vector.load %arg8[%c0_95, %c0_96] : memref<32x64xf32, #tpu.memory_space<vmem>>, vector<32x64xf32>
    %cst_97 = arith.constant dense<0.000000e+00> : vector<2x64xf32>
    %600 = tpu.matmul %596, %599, %cst_97 {dimension_numbers = #tpu.dot_dimension_numbers<[1], [0], [0], [1], [0, 0, 1, 1], [], []>} : vector<2x32xf32>, vector<32x64xf32>, vector<2x64xf32> -> vector<2x64xf32>
    %601 = arith.addf %598, %600 : vector<2x64xf32>
    %c0_98 = arith.constant 0 : index
    %c0_99 = arith.constant 0 : index
    %602 = vector.load %arg9[%c0_98, %c0_99] : memref<1x64xf32, #tpu.memory_space<vmem>>, vector<1x64xf32>
    %603 = vector.broadcast %602 : vector<1x64xf32> to vector<2x64xf32>
    %604 = arith.addf %601, %603 : vector<2x64xf32>
    %605 = math.tanh %604 : vector<2x64xf32>
    %c0_100 = arith.constant 0 : index
    %c0_101 = arith.constant 0 : index
    %606 = vector.load %arg10[%c0_100, %c0_101] : memref<64x3xf32, #tpu.memory_space<vmem>>, vector<64x3xf32>
    %cst_102 = arith.constant dense<0.000000e+00> : vector<2x3xf32>
    %607 = tpu.matmul %605, %606, %cst_102 {dimension_numbers = #tpu.dot_dimension_numbers<[1], [0], [0], [1], [0, 0, 1, 1], [], []>} : vector<2x64xf32>, vector<64x3xf32>, vector<2x3xf32> -> vector<2x3xf32>
    %c0_103 = arith.constant 0 : index
    %c0_104 = arith.constant 0 : index
    %608 = vector.load %arg11[%c0_103, %c0_104] : memref<1x3xf32, #tpu.memory_space<vmem>>, vector<1x3xf32>
    %609 = vector.broadcast %608 : vector<1x3xf32> to vector<2x3xf32>
    %610 = arith.addf %607, %609 : vector<2x3xf32>
    %c0_105 = arith.constant 0 : index
    %c0_106 = arith.constant 0 : index
    %611 = vector.load %arg12[%c0_105, %c0_106] : memref<2x3xf32, #tpu.memory_space<vmem>>, vector<2x3xf32>
    tpu.vector_store %arg12[%c0_105, %c0_106], %610 {strides = array<i32>} : memref<2x3xf32, #tpu.memory_space<vmem>>, vector<2x3xf32>,
    return
  }
  func.func @transform_0(%arg0: i32) -> (i32, i32) {
    %c0_i32 = arith.constant 0 : i32
    %c0_i32_0 = arith.constant 0 : i32
    return %arg0, %c0_i32 : i32, i32
  }
  func.func @transform_1(%arg0: i32) -> (i32, i32) {
    %c0_i32 = arith.constant 0 : i32
    %c0_i32_0 = arith.constant 0 : i32
    return %arg0, %c0_i32 : i32, i32
  }
  func.func @transform_2(%arg0: i32) -> (i32, i32) {
    %c0_i32 = arith.constant 0 : i32
    %c0_i32_0 = arith.constant 0 : i32
    %c0_i32_1 = arith.constant 0 : i32
    return %c0_i32, %c0_i32_0 : i32, i32
  }
  func.func @transform_3(%arg0: i32) -> (i32, i32) {
    %c0_i32 = arith.constant 0 : i32
    %c0_i32_0 = arith.constant 0 : i32
    %c0_i32_1 = arith.constant 0 : i32
    return %c0_i32, %c0_i32_0 : i32, i32
  }
  func.func @transform_4(%arg0: i32) -> (i32, i32) {
    %c0_i32 = arith.constant 0 : i32
    %c0_i32_0 = arith.constant 0 : i32
    %c0_i32_1 = arith.constant 0 : i32
    return %c0_i32, %c0_i32_0 : i32, i32
  }
  func.func @transform_5(%arg0: i32) -> (i32, i32) {
    %c0_i32 = arith.constant 0 : i32
    %c0_i32_0 = arith.constant 0 : i32
    %c0_i32_1 = arith.constant 0 : i32
    return %c0_i32, %c0_i32_0 : i32, i32
  }
  func.func @transform_6(%arg0: i32) -> (i32, i32) {
    %c0_i32 = arith.constant 0 : i32
    %c0_i32_0 = arith.constant 0 : i32
    %c0_i32_1 = arith.constant 0 : i32
    return %c0_i32, %c0_i32_0 : i32, i32
  }
  func.func @transform_7(%arg0: i32) -> (i32, i32) {
    %c0_i32 = arith.constant 0 : i32
    %c0_i32_0 = arith.constant 0 : i32
    %c0_i32_1 = arith.constant 0 : i32
    return %c0_i32, %c0_i32_0 : i32, i32
  }
  func.func @transform_8(%arg0: i32) -> (i32, i32) {
    %c0_i32 = arith.constant 0 : i32
    %c0_i32_0 = arith.constant 0 : i32
    %c0_i32_1 = arith.constant 0 : i32
    return %c0_i32, %c0_i32_0 : i32, i32
  }
  func.func @transform_9(%arg0: i32) -> (i32, i32) {
    %c0_i32 = arith.constant 0 : i32
    %c0_i32_0 = arith.constant 0 : i32
    %c0_i32_1 = arith.constant 0 : i32
    return %c0_i32, %c0_i32_0 : i32, i32
  }
  func.func @transform_10(%arg0: i32) -> (i32, i32) {
    %c0_i32 = arith.constant 0 : i32
    %c0_i32_0 = arith.constant 0 : i32
    %c0_i32_1 = arith.constant 0 : i32
    return %c0_i32, %c0_i32_0 : i32, i32
  }
  func.func @transform_11(%arg0: i32) -> (i32, i32) {
    %c0_i32 = arith.constant 0 : i32
    %c0_i32_0 = arith.constant 0 : i32
    return %arg0, %c0_i32 : i32, i32
  }
}

</mosaic_0001>

<bundles_post_ra>
// kernel: forward_logits.1
= control target key start
LH: loop header
LB: loop body
LE: loop exit
PB: predicated region body
PF: predicated region fallthrough
CT: control target
= control target key end

     0   :  { %v4039_v2 = vmov 0.0|0.0   ;;  %vm4040_vm0 = vmmov 0   ;;  %v4041_v4 = vmov 0.0   ;;  %v4042_v6 = vmov 0   ;;  %s4959_s0 = inlined_call_operand.vmem [shape: bf16[16,300], index: 0, kind: input, shape index: {}]   ;;  %s4960_s1 = inlined_call_operand.vmem [shape: f32[2,1], index: 1, kind: input, shape index: {}]   ;;  %s4961_s2 = inlined_call_operand.vmem [shape: bf16[300,256], index: 2, kind: input, shape index: {}]   ;;  %s4962_s3 = inlined_call_operand.vmem [shape: f32[1,256], index: 3, kind: input, shape index: {}]   ;;  %s4963_s4 = inlined_call_operand.vmem [shape: f32[32,128], index: 4, kind: input, shape index: {}]   ;;  %s4964_s5 = inlined_call_operand.vmem [shape: f32[32,128], index: 5, kind: input, shape index: {}]   ;;  %s4965_s6 = inlined_call_operand.vmem [shape: f32[32,64], index: 6, kind: input, shape index: {}]   ;;  %s4966_s7 = inlined_call_operand.vmem [shape: f32[32,64], index: 7, kind: input, shape index: {}]   ;;  %s4967_s8 = inlined_call_operand.vmem [shape: f32[1,64], index: 8, kind: input, shape index: {}]   ;;  %s4968_s9 = inlined_call_operand.vmem [shape: f32[64,3], index: 9, kind: input, shape index: {}]   ;;  %s4969_s10 = inlined_call_operand.vmem [shape: f32[1,3], index: 10, kind: input, shape index: {}]   ;;  %s4970_s11 = inlined_call_operand.hbm [shape: f32[2,3], index: 11, kind: output, shape index: {}]  }
   0x1   :  { %v3696_v0 = vld [vmem:[%s4961_s2 + $0x4] ss:$8 sps:$4 sm:$0xff]   ;;  %v3698_v1 = vld [vmem:[%s4961_s2] ss:$8 sps:$4 sm:$0xff]   ;;  %3558 = vmatprep.subr.bf16.mxu1 %v4039_v2  ;;  %v3699_v3 = vld [vmem:[%s4961_s2 + $0x14] ss:$8 sps:$4 sm:$0xff]   ;;  %3349 = vmatprep.mubr.msk.f32.mxu1 %vm4040_vm0, %v4041_v4 }
   0x2   :  { %308 = vmatprep.subr.bf16.mxu0 %v3696_v0  ;;  %v3701_v5 = vld [vmem:[%s4961_s2 + $0x10] ss:$8 sps:$4 sm:$0xff]   ;;  %3695 = vset.pattern.permute.xlu1 %v4042_v6  ;;  %v3702_v7 = vld [vmem:[%s4961_s2 + $0x24] ss:$8 sps:$4 sm:$0xff]   ;;  %v3704_v8 = vld [vmem:[%s4961_s2 + $0x20] ss:$8 sps:$4 sm:$0xff]  }
   0x3   :  { %309 = vmatpush1.bf16.msra.mxu0 %v3698_v1  ;;  %3694 = vset.pattern.permute.xlu0 %v4042_v6  ;;  %v3705_v9 = vld [vmem:[%s4961_s2 + $0x34] ss:$8 sps:$4 sm:$0xff]   ;;  %v3707_v10 = vld [vmem:[%s4961_s2 + $0x30] ss:$8 sps:$4 sm:$0xff]   ;;  %v3708_v11 = vld [vmem:[%s4961_s2 + $0x44] ss:$8 sps:$4 sm:$0xff]  }
   0x4   :  { %310 = vmatprep.subr.bf16.mxu0 %v3699_v3  ;;  %v3710_v12 = vld [vmem:[%s4961_s2 + $0x40] ss:$8 sps:$4 sm:$0xff]   ;;  %v3711_v13 = vld [vmem:[%s4961_s2 + $0x54] ss:$8 sps:$4 sm:$0xff]   ;;  %v3713_v14 = vld [vmem:[%s4961_s2 + $0x50] ss:$8 sps:$4 sm:$0xff]  }
   0x5   :  { %v3714_v15 = vld [vmem:[%s4961_s2 + $0x64] ss:$8 sps:$4 sm:$0xff]   ;;  %v3716_v18 = vld [vmem:[%s4961_s2 + $0x60] ss:$8 sps:$4 sm:$0xff]   ;;  %v3717_v21 = vld [vmem:[%s4961_s2 + $0x74] ss:$8 sps:$4 sm:$0xff]  }
   0x6   :  { %v395_v16 = vld [vmem:[%s4963_s4] sm:$0xff]  ;;  %v396_v17 = vld [vmem:[%s4963_s4 + $0x8] sm:$0xff]  ;;  %v397_v22 = vld [vmem:[%s4963_s4 + $0x10] sm:$0xff] }
   0x7   :  { %311 = vmatpush1.bf16.msra.mxu0 %v3701_v5  ;;  %v4160_v19 = vpack.c.bf16 %v396_v17, %v395_v16  ;;  %v3746_v20 = vld [vmem:[%s4959_s0 + $0x4] ss:$12 sps:$4 sm:$0xff]   ;;  %v398_v23 = vld [vmem:[%s4963_s4 + $0x18] sm:$0xff]  ;;  %v400_v27 = vld [vmem:[%s4964_s5 + $0x8] sm:$0xff] }
   0x8   :  { %312 = vmatprep.subr.bf16.mxu0 %v3702_v7  ;;  %340 = vmatprep.mubr.bf16.mxu0 %v3746_v20  ;;  %v3719_v24 = vld [vmem:[%s4961_s2 + $0x70] ss:$8 sps:$4 sm:$0xff]   ;;  %v4179_v25 = vpack.c.bf16 %v398_v23, %v397_v22  ;;  %v399_v26 = vld [vmem:[%s4964_s5] sm:$0xff] }
   0x9   :  { %3560 = vmatpush3.bf16.msra.mxu1 %v4160_v19  ;;  %v3720_v28 = vld [vmem:[%s4961_s2 + $0x84] ss:$8 sps:$4 sm:$0xff]   ;;  %v4191_v29 = vpack.c.bf16 %v400_v27, %v399_v26  ;;  %v401_v30 = vld [vmem:[%s4964_s5 + $0x10] sm:$0xff]  ;;  %v402_v31 = vld [vmem:[%s4964_s5 + $0x18] sm:$0xff] }
   0xa   :  { %3561 = vmatprep.subr.bf16.mxu1 %v4039_v2  ;;  %v3722_v32 = vld [vmem:[%s4961_s2 + $0x80] ss:$8 sps:$4 sm:$0xff]  }
   0xb   :  { %313 = vmatpush1.bf16.msra.mxu0 %v3704_v8 }
   0xc   :  { %314 = vmatprep.subr.bf16.mxu0 %v3705_v9 }
   0xd   :  { %3563 = vmatpush3.bf16.msra.mxu1 %v4179_v25 }
   0xe   :  { %3564 = vmatprep.subr.bf16.mxu1 %v4039_v2 }
   0xf   :  { %315 = vmatpush1.bf16.msra.mxu0 %v3707_v10 }
  0x10   :  { %316 = vmatprep.subr.bf16.mxu0 %v3708_v11  ;;  %3350 = vmatmul.mubr.f32.vlgmr.msra.gmra.mrb[0].mxu1 %v4041_v4 }
  0x13   :  { %317 = vmatpush1.bf16.msra.mxu0 %v3710_v12 }
  0x14   :  { %318 = vmatprep.subr.bf16.mxu0 %v3711_v13 }
  0x17   :  { %319 = vmatpush1.bf16.msra.mxu0 %v3713_v14 }
  0x18   :  { %320 = vmatprep.subr.bf16.mxu0 %v3714_v15 }
  0x1b   :  { %321 = vmatpush1.bf16.msra.mxu0 %v3716_v18 }
  0x1c   :  { %322 = vmatprep.subr.bf16.mxu0 %v3717_v21 }
  0x1f   :  { %323 = vmatpush1.bf16.msra.mxu0 %v3719_v24 }
  0x20   :  { %16 = vsyncpa [#allocation3], 0  ;;  %324 = vmatprep.subr.bf16.mxu0 %v3720_v28  ;;  %v3723_v33 = vld [vmem:[%s4961_s2 + $0x94] ss:$8 sps:$4 sm:$0xff]   ;;  %3566 = vmatpush3.bf16.msra.mxu1 %v4191_v29  ;;  %v4208_v34 = vpack.c.bf16 %v402_v31, %v401_v30  ;;  %v3725_v35 = vld [vmem:[%s4961_s2 + $0x90] ss:$8 sps:$4 sm:$0xff]   ;;  %v84_v61 = vlaneseq }
  0x21   :  { %3567 = vmatprep.subr.bf16.mxu1 %v4039_v2  ;;  %3360 = vmatprep.mubr.msk.f32.mxu1 %vm4040_vm0, %v4041_v4  ;;  %v3726_v36 = vld [vmem:[%s4961_s2 + $0xa4] ss:$8 sps:$4 sm:$0xff]   ;;  %v3728_v37 = vld [vmem:[%s4961_s2 + $0xa0] ss:$8 sps:$4 sm:$0xff]   ;;  %v3729_v38 = vld [vmem:[%s4961_s2 + $0xb4] ss:$8 sps:$4 sm:$0xff]  }
  0x22   :  { %v3731_v39 = vld [vmem:[%s4961_s2 + $0xb0] ss:$8 sps:$4 sm:$0xff]   ;;  %v3732_v40 = vld [vmem:[%s4961_s2 + $0xc4] ss:$8 sps:$4 sm:$0xff]   ;;  %v3734_v41 = vld [vmem:[%s4961_s2 + $0xc0] ss:$8 sps:$4 sm:$0xff]  }
  0x23   :  { %325 = vmatpush1.bf16.msra.mxu0 %v3722_v32  ;;  %v3735_v42 = vld [vmem:[%s4961_s2 + $0xd4] ss:$8 sps:$4 sm:$0xff]   ;;  %v3737_v43 = vld [vmem:[%s4961_s2 + $0xd0] ss:$8 sps:$4 sm:$0xff]   ;;  %v3738_v44 = vld [vmem:[%s4961_s2 + $0xe4] ss:$8 sps:$4 sm:$0xff]  }
  0x24   :  { %326 = vmatprep.subr.bf16.mxu0 %v3723_v33  ;;  %3569 = vmatpush3.bf16.msra.mxu1 %v4208_v34  ;;  %v3740_v45 = vld [vmem:[%s4961_s2 + $0xe0] ss:$8 sps:$4 sm:$0xff]   ;;  %v3741_v46 = vld [vmem:[%s4961_s2 + $0xf4] ss:$8 sps:$4 sm:$0xff]   ;;  %v3743_v47 = vld [vmem:[%s4961_s2 + $0xf0] ss:$8 sps:$4 sm:$0xff]  }
  0x25   :  { %3570 = vmatprep.subr.bf16.mxu1 %v4039_v2  ;;  %v3749_v48 = vld [vmem:[%s4961_s2 + $0x104] ss:$8 sps:$4 sm:$0xff]   ;;  %v3747_v50 = vld [vmem:[%s4961_s2 + $0x100] ss:$8 sps:$4 sm:$0xff]   ;;  %v3752_v51 = vld [vmem:[%s4961_s2 + $0x114] ss:$8 sps:$4 sm:$0xff]  }
  0x26   :  { %v3744_v49 = vld [vmem:[%s4959_s0] ss:$12 sps:$4 sm:$0xff]   ;;  %v3750_v52 = vld [vmem:[%s4961_s2 + $0x110] ss:$8 sps:$4 sm:$0xff]   ;;  %vm301_vm1 = vcmask 1045504   ;;  %vm297_vm2 = vcmask 359424  }
  0x27   :  { %327 = vmatpush1.bf16.msra.mxu0 %v3725_v35  ;;  %3361 = vmatmul.mubr.f32.vlgmr.msra.gmra.mrb[2].mxu1 %v4041_v4  ;;  %v3753_v53 = vld [vmem:[%s4961_s2 + $0x124] ss:$8 sps:$4 sm:$0x3f]   ;;  %v3755_v54 = vld [vmem:[%s4961_s2 + $0x120] ss:$8 sps:$4 sm:$0x3f]  }
  0x28   :  { %328 = vmatprep.subr.bf16.mxu0 %v3726_v36  ;;  %3572 = vmatpush3.bf16.msra.mxu1 %v4160_v19  ;;  %v303_v55 = vsel %vm301_vm1, %v3755_v54, 0  ;;  %v3756_v56 = vld [vmem:[%s4959_s0 + $0x8] ss:$12 sps:$4 sm:$0xff]   ;;  %v85_v62 = vshrl.u32 %v84_v61, 7  ;;  %v82_v1 = vld [vmem:[%s4962_s3] sm:$0x3] }
  0x29   :  { %3573 = vmatprep.subr.bf16.mxu1 %v4039_v2  ;;  %3371 = vmatprep.mubr.msk.f32.mxu1 %vm4040_vm0, %v4041_v4  ;;  %s4043_s3 = smov 64   ;;  %s4044_s5 = smov 32   ;;  %vm666_vm3 = vcmask 1041409   ;;  %vm403_vm7 = vcmask 261120  }
  0x2a   :  { %v86_v63 = vsub.s32 0, %v85_v62  ;;  %v90_v0 = vsub.s32 1, %v85_v62  ;;  %s4046_s25 = smov [#allocation2]  }
  0x2b   :  { %329 = vmatpush1.bf16.msra.mxu0 %v3728_v37  ;;  %s3140_s26 = sshll.u32 %s4046_s25, 4  ;;  %s3141_s26 = int_to_ptr.vmem [resolvable:$true] %s3140_s26 }
  0x2c   :  { %330 = vmatprep.subr.bf16.mxu0 %v3729_v38  ;;  %3575 = vmatpush3.bf16.msra.mxu1 %v4179_v25  ;;  %v87_v3 = vrot.slane %v82_v1, %v86_v63  ;;  %v91_v5 = vrot.slane %v82_v1, %v90_v0  ;;  %p4020_p1 = scmp.lt.s32.totalorder %s3141_s26, %s3141_s26 }
  0x2d   :  { %3576 = vmatprep.subr.bf16.mxu1 %v4039_v2 }
  0x2f   :  { %331 = vmatpush1.bf16.msra.mxu0 %v3731_v39 }
  0x30   :  { %332 = vmatprep.subr.bf16.mxu0 %v3732_v40 }
  0x33   :  { %333 = vmatpush1.bf16.msra.mxu0 %v3734_v41 }
  0x34   :  { %334 = vmatprep.subr.bf16.mxu0 %v3735_v42 }
  0x37   :  { %335 = vmatpush1.bf16.msra.mxu0 %v3737_v43 }
  0x38   :  { %336 = vmatprep.subr.bf16.mxu0 %v3738_v44 }
  0x3b   :  { %337 = vmatpush1.bf16.msra.mxu0 %v3740_v45 }
  0x3c   :  { %338 = vmatprep.subr.bf16.mxu0 %v3741_v46 }
  0x3f   :  { %339 = vmatpush1.bf16.msra.mxu0 %v3743_v47 }
  0x40   :  { %351 = vmatprep.subr.bf16.mxu0 %v3749_v48 }
  0x42   :  { %341 = vmatmul.mubr.bf16.vlgmr.msra.gmra.mrb[0].mxu0 %v3744_v49 }
  0x43   :  { %352 = vmatpush1.bf16.msra.mxu0 %v3747_v50  ;;  %383 = vmatprep.mubr.bf16.mxu0 %v4042_v6 }
  0x44   :  { %353 = vmatprep.subr.bf16.mxu0 %v3752_v51 }
  0x47   :  { %354 = vmatpush1.bf16.msra.mxu0 %v3750_v52 }
  0x48   :  { %3189 = vmatprep.subr.msk.bf16.mxu0 %vm301_vm1, %v3753_v53 }
  0x4b   :  { %356 = vmatpush1.bf16.msra.mxu0 %v303_v55 }
  0x4c   :  { %3630 = vmatprep.subr.bf16.mxu0 %v4039_v2 }
  0x4e   :  { %3190 = vmatmul.mubr.msk.bf16.vlgmr.msra.gmra.mrb[0].mxu0 %vm297_vm2, %v3756_v56 }
  0x4f   :  { %3632 = vmatpush3.bf16.msra.mxu0 %v4160_v19  ;;  %3481 = vmatprep.mubr.msk.f32.mxu0 %vm4040_vm0, %v4041_v4 }
  0x50   :  { %3633 = vmatprep.subr.bf16.mxu0 %v4039_v2 }
  0x53   :  { %3635 = vmatpush3.bf16.msra.mxu0 %v4179_v25 }
  0x54   :  { %3642 = vmatprep.subr.bf16.mxu0 %v4039_v2 }
  0xe3   :  { %v473_v57 = vpop.f32.mrb[0].mxu1 }
  0xe4   :  { %v3351_v58 = vpop.f32.mrb[1].mxu1  ;;  %v478_v9 = vrot.slane %v473_v57, 1 }
  0xfa   :  { %v549_v59 = vpop.f32.mrb[2].mxu1 }
  0xfb   :  { %v3362_v60 = vpop.f32.mrb[3].mxu1  ;;  %v554_v8 = vrot.slane %v549_v59, 1  ;;  %v555_v14 = vrot.slane %v549_v59, 2 }
 0x121   :  { %v385_v7 = vpop.f32.mrb[0].mxu0 }
 0x122   :  { %v387_v10 = vpop.f32.mrb[1].mxu0  ;;  %v4296_v11 = vadd.f32 %v385_v7, %v87_v3 }
 0x123   :  { %v4298_v12 = vadd.f32 %v387_v10, %v91_v5  ;;  %v389_v13 = vpop.f32.mrb[2].mxu0 }
 0x124   :  { %v4300_v15 = vadd.f32 %v389_v13, %v87_v3  ;;  %v391_v16 = vpop.f32.mrb[3].mxu0  ;;  %v481_v21 = vadd.f32 %v4296_v11, %v473_v57  ;;  %v4324_v13 = vld [vmem:[%s4960_s1] sm:$0x3]  ;;  %s4045_s1 = smov 96  }
 0x125   :  { %v558_v17 = vadd.f32 %v4298_v12, %v554_v8  ;;  %v4303_v18 = vadd.f32 %v391_v16, %v91_v5  ;;  %vm656_vm4 = vcmp.gt.f32.partialorder %v4324_v13, 0.0  ;;  %vm657_vm5 = vcmp.gt.f32.partialorder %v4324_v13, 7.0 }
 0x126   :  { %v482_v20 = vadd.f32 %v4300_v15, %v478_v9  ;;  %v3191_v31 = vmul.f32 -1.442695, %v481_v21  ;;  %vm976_vm9 = vcmp.gt.f32.partialorder %v4324_v13, 6.0  ;;  %vm975_vm10 = vcmp.gt.f32.partialorder %v4324_v13, 1.0 }
 0x127   :  { %3757 = vtanh.f32 %v558_v17  ;;  %v559_v22 = vadd.f32 %v4303_v18, %v555_v14  ;;  %v3193_v30 = vmul.f32 -1.442695, %v558_v17  ;;  %v658_v17 = vsel %vm656_vm4, 1, %v4042_v6 }
 0x128   :  { %3759 = vtanh.f32 %v482_v20  ;;  %v3192_v28 = vmul.f32 -1.442695, %v482_v20  ;;  %vm1295_vm13 = vcmp.gt.f32.partialorder %v4324_v13, 2.0  ;;  %vm1296_vm14 = vcmp.gt.f32.partialorder %v4324_v13, 5.0 }
 0x129   :  { %3761 = vtanh.f32 %v481_v21  ;;  %v3194_v32 = vmul.f32 -1.442695, %v559_v22  ;;  %v680_v21 = vsel %vm657_vm5, 1, %v4042_v6  ;;  %vm1617_vm2 = vcmp.gt.f32.partialorder %v4324_v13, 3.0 }
 0x12a   :  { %3763 = vtanh.f32 %v559_v22  ;;  %vm1618_vm4 = vcmp.gt.f32.partialorder %v4324_v13, 4.0 }
 0x12b   :  { %3765 = vpow2.f32 %v3192_v28 }
 0x12c   :  { %3767 = vpow2.f32 %v3193_v30 }
 0x12d   :  { %3769 = vpow2.f32 %v3191_v31 }
 0x12e   :  { %3771 = vpow2.f32 %v3194_v32 }
 0x131   :  { %v3758_v23 = vpop.eup %3757 }
 0x132   :  { %v3760_v24 = vpop.eup %3759  ;;  %626 = vrot.lane.b32.xlu1 %v3758_v23, %s4043_s3 }
 0x133   :  { %580 = vrot.lane.b32.xlu0 %v3760_v24, %s4043_s3  ;;  %v3762_v26 = vpop.eup %3761 }
 0x134   :  { %v3764_v27 = vpop.eup %3763 }
 0x135   :  { %v3766_v33 = vpop.eup %3765 }
 0x136   :  { %628 = vrot.lane.b32.xlu1 %v3764_v27, %s4043_s3  ;;  %v3768_v35 = vpop.eup %3767  ;;  %v567_v36 = vadd.f32 1.0, %v3766_v33 }
 0x137   :  { %578 = vrot.lane.b32.xlu0 %v3762_v26, %s4043_s3  ;;  %v3770_v37 = vpop.eup %3769  ;;  %v614_v38 = vadd.f32 1.0, %v3768_v35 }
 0x138   :  { %3773 = vrcp.f32 %v567_v36  ;;  %v566_v39 = vadd.f32 1.0, %v3770_v37  ;;  %v3772_v40 = vpop.eup %3771 }
 0x139   :  { %3775 = vrcp.f32 %v614_v38  ;;  %v615_v41 = vadd.f32 1.0, %v3772_v40 }
 0x13a   :  { %3777 = vrcp.f32 %v566_v39 }
 0x13b   :  { %3779 = vrcp.f32 %v615_v41 }
 0x142   :  { %v3774_v42 = vpop.eup %3773 }
 0x143   :  { %v3776_v46 = vpop.eup %3775  ;;  %v575_v54 = vmul.f32 0.0, %v3774_v42 }
 0x144   :  { %v3778_v47 = vpop.eup %3777  ;;  %v622_v57 = vmul.f32 0.0, %v3776_v46 }
 0x145   :  { %v3780_v52 = vpop.eup %3779  ;;  %v574_v58 = vmul.f32 0.0, %v3778_v47 }
 0x146   :  { %v623_v0 = vmul.f32 0.0, %v3780_v52 }
 0x1a4   :  { %v627_v43 = vpop.permute.xlu1 %626 }
 0x1a5   :  { %v581_v44 = vpop.permute.xlu0 %580  ;;  %v632_v49 = vmul.f32 %v3776_v46, %v627_v43 }
 0x1a6   :  { %v585_v45 = vmul.f32 %v3774_v42, %v581_v44 }
 0x1a8   :  { %590 = vrot.lane.b32.xlu0 %v585_v45, %s4044_s5  ;;  %v629_v51 = vpop.permute.xlu1 %628 }
 0x1a9   :  { %v579_v48 = vpop.permute.xlu0 %578  ;;  %v633_v53 = vmul.f32 %v3780_v52, %v629_v51 }
 0x1aa   :  { %v584_v50 = vmul.f32 %v3778_v47, %v579_v48 }
 0x1ac   :  { %636 = vrot.lane.b32.xlu0 %v632_v49, %s4044_s5  ;;  %588 = vrot.lane.b32.xlu1 %v584_v50, %s4044_s5 }
 0x1b0   :  { %638 = vrot.lane.b32.xlu1 %v633_v53, %s4044_s5 }
 0x21a   :  { %v591_v55 = vpop.permute.xlu0 %590 }
 0x21b   :  { %v595_v56 = vadd.f32 %v591_v55, %v575_v54 }
 0x21d   :  { %3781 = vtanh.f32 %v595_v56  ;;  %v674_v61 = vrot.slane %v595_v56, 7 }
 0x21e   :  { %v637_v59 = vpop.permute.xlu0 %636  ;;  %v589_v60 = vpop.permute.xlu1 %588 }
 0x21f   :  { %v642_v62 = vadd.f32 %v637_v59, %v622_v57  ;;  %v594_v63 = vadd.f32 %v589_v60, %v574_v58 }
 0x221   :  { %3783 = vtanh.f32 %v642_v62  ;;  %v675_v1 = vsel %vm666_vm3, %v674_v61, %v594_v63  ;;  %v696_v7 = vrot.slane %v642_v62, 7 }
 0x222   :  { %3785 = vtanh.f32 %v594_v63  ;;  %v639_v3 = vpop.permute.xlu1 %638 }
 0x223   :  { %v643_v5 = vadd.f32 %v639_v3, %v623_v0 }
 0x225   :  { %3787 = vtanh.f32 %v643_v5  ;;  %v697_v8 = vrot.slane %v643_v5, 6 }
 0x227   :  { %v3782_v9 = vpop.eup %3781  ;;  %v4318_v10 = vsel %vm666_vm3, %v697_v8, %v696_v7 }
 0x228   :  { %602 = vrot.lane.b32.xlu0 %v3782_v9, %s4043_s3 }
 0x22b   :  { %v3784_v14 = vpop.eup %3783 }
 0x22c   :  { %v3786_v16 = vpop.eup %3785  ;;  %648 = vrot.lane.b32.xlu0 %v3784_v14, %s4043_s3 }
 0x22d   :  { %600 = vrot.lane.b32.xlu1 %v3786_v16, %s4043_s3 }
 0x22f   :  { %v3788_v20 = vpop.eup %3787 }
 0x230   :  { %660 = vperm.xlu0 %3694, %v658_v17  }
 0x231   :  { %650 = vrot.lane.b32.xlu1 %v3788_v20, %s4043_s3 }
 0x235   :  { %682 = vperm.xlu1 %3695, %v680_v21  }
 0x29a   :  { %v603_v22 = vpop.permute.xlu0 %602 }
 0x29b   :  { %v607_v23 = vmul.f32 %v3774_v42, %v603_v22 }
 0x29d   :  { %v665_v27 = vrot.slane %v607_v23, 7 }
 0x29e   :  { %v649_v24 = vpop.permute.xlu0 %648 }
 0x29f   :  { %v601_v26 = vpop.permute.xlu1 %600  ;;  %v654_v30 = vmul.f32 %v3776_v46, %v649_v24 }
 0x2a0   :  { %v606_v28 = vmul.f32 %v3778_v47, %v601_v26 }
 0x2a1   :  { %v687_v35 = vrot.slane %v654_v30, 7 }
 0x2a2   :  { %v667_v31 = vsel %vm666_vm3, %v665_v27, %v606_v28 }
 0x2a3   :  { %668 = vrot.lane.b32.xlu1 %v667_v31, %s4044_s5  ;;  %v651_v32 = vpop.permute.xlu1 %650 }
 0x2a4   :  { %v655_v33 = vmul.f32 %v3780_v52, %v651_v32 }
 0x2a6   :  { %v688_v36 = vrot.slane %v655_v33, 6 }
 0x2a7   :  { %676 = vrot.lane.b32.xlu1 %v675_v1, %s4045_s1 }
 0x2a8   :  { %v689_v37 = vsel %vm666_vm3, %v688_v36, %v687_v35 }
 0x2a9   :  { %690 = vrot.lane.b32.xlu0 %v689_v37, %s4044_s5 }
 0x2af   :  { %v4340_v39 = vpop.permute.xlu0 %660 }
 0x2b0   :  { %vm662_vm6 = vcmp.eq.s32.totalorder %v4340_v39, 1  ;;  %v3045_v39 = vld [vmem:[%s4968_s9 + $0x10] sm:$0xff] }
 0x2b4   :  { %v4338_v38 = vpop.permute.xlu1 %682 }
 0x2b5   :  { %vm684_vm8 = vcmp.eq.s32.totalorder %v4338_v38, 1  ;;  %v3044_v38 = vld [vmem:[%s4968_s9 + $0x8] sm:$0xff] }
 0x315   :  { %v669_v40 = vpop.permute.xlu1 %668 }
 0x316   :  { %v4345_v41 = vsel %vm662_vm6, %v669_v40, 0.0 }
 0x317   :  { %3372 = vmatmul.mubr.msk.f32.vlgmr.msra.gmra.mrb[4].mxu1 %vm403_vm7, %v4345_v41 }
 0x318   :  { %3578 = vmatpush3.bf16.msra.mxu1 %v4191_v29  ;;  %3382 = vmatprep.mubr.msk.f32.mxu1 %vm4040_vm0, %v4041_v4 }
 0x319   :  { %3579 = vmatprep.subr.bf16.mxu1 %v4039_v2  ;;  %v677_v57 = vpop.permute.xlu1 %676 }
 0x31a   :  { %v4378_v59 = vsel %vm662_vm6, %v677_v57, 0.0 }
 0x31b   :  { %v691_v42 = vpop.permute.xlu0 %690  ;;  %v877_v61 = vrot.slane %v4378_v59, 7 }
 0x31c   :  { %v4356_v43 = vsel %vm684_vm8, %v691_v42, 0.0  ;;  %3581 = vmatpush3.bf16.msra.mxu1 %v4208_v34 }
 0x31d   :  { %3582 = vmatprep.subr.bf16.mxu1 %v4039_v2 }
 0x31f   :  { %3383 = vmatmul.mubr.msk.f32.vlgmr.msra.gmra.mrb[6].mxu1 %vm403_vm7, %v4356_v43 }
 0x320   :  { %3584 = vmatpush3.bf16.msra.mxu1 %v4160_v19  ;;  %3393 = vmatprep.mubr.msk.f32.mxu1 %vm4040_vm0, %v4041_v4 }
 0x321   :  { %3585 = vmatprep.subr.bf16.mxu1 %v4039_v2 }
 0x324   :  { %3587 = vmatpush3.bf16.msra.mxu1 %v4179_v25 }
 0x325   :  { %3588 = vmatprep.subr.bf16.mxu1 %v4039_v2 }
 0x3ea   :  { %v772_v44 = vpop.f32.mrb[4].mxu1 }
 0x3eb   :  { %v777_v45 = vrot.slane %v772_v44, 7  ;;  %v781_v46 = vadd.f32 %v4300_v15, %v772_v44  ;;  %v3373_v47 = vpop.f32.mrb[5].mxu1 }
 0x3ed   :  { %v780_v48 = vadd.f32 %v4296_v11, %v777_v45  ;;  %3789 = vtanh.f32 %v781_v46  ;;  %v3198_v62 = vmul.f32 -1.442695, %v781_v46 }
 0x3ef   :  { %3791 = vtanh.f32 %v780_v48  ;;  %v3197_v63 = vmul.f32 -1.442695, %v780_v48 }
 0x3f2   :  { %v851_v49 = vpop.f32.mrb[6].mxu1 }
 0x3f3   :  { %v856_v50 = vrot.slane %v851_v49, 2  ;;  %v857_v51 = vrot.slane %v851_v49, 3  ;;  %v3384_v52 = vpop.f32.mrb[7].mxu1 }
 0x3f5   :  { %v860_v53 = vadd.f32 %v4298_v12, %v856_v50  ;;  %v861_v54 = vadd.f32 %v4303_v18, %v857_v51 }
 0x3f7   :  { %v3790_v55 = vpop.eup %3789  ;;  %3793 = vtanh.f32 %v860_v53  ;;  %v3200_v0 = vmul.f32 -1.442695, %v861_v54  ;;  %v3199_v1 = vmul.f32 -1.442695, %v860_v53 }
 0x3f8   :  { %3795 = vtanh.f32 %v861_v54  ;;  %890 = vrot.lane.b32.xlu1 %v3790_v55, %s4043_s3 }
 0x3f9   :  { %v3792_v56 = vpop.eup %3791  ;;  %3797 = vpow2.f32 %v3198_v62 }
 0x3fa   :  { %888 = vrot.lane.b32.xlu0 %v3792_v56, %s4043_s3  ;;  %3799 = vpow2.f32 %v3197_v63 }
 0x3fb   :  { %3801 = vpow2.f32 %v3200_v0 }
 0x3fc   :  { %3803 = vpow2.f32 %v3199_v1 }
 0x3fe   :  { %699 = vrot.lane.b32.xlu0 %v4318_v10, %s4045_s1 }
 0x401   :  { %v3794_v58 = vpop.eup %3793 }
 0x402   :  { %v3796_v60 = vpop.eup %3795  ;;  %945 = vrot.lane.b32.xlu1 %v3794_v58, %s4043_s3 }
 0x403   :  { %947 = vrot.lane.b32.xlu0 %v3796_v60, %s4043_s3  ;;  %v3798_v3 = vpop.eup %3797 }
 0x404   :  { %v3800_v5 = vpop.eup %3799  ;;  %v869_v7 = vadd.f32 1.0, %v3798_v3 }
 0x405   :  { %v868_v8 = vadd.f32 1.0, %v3800_v5  ;;  %v3802_v9 = vpop.eup %3801 }
 0x406   :  { %878 = vrot.lane.b32.xlu1 %v877_v61, %s4044_s5  ;;  %3805 = vrcp.f32 %v869_v7  ;;  %v3804_v10 = vpop.eup %3803  ;;  %v925_v14 = vadd.f32 1.0, %v3802_v9  ;;  %v998_v7 = vsel %vm976_vm9, 1, %v4042_v6 }
 0x407   :  { %880 = vrot.lane.b32.xlu0 %v4378_v59, %s4044_s5  ;;  %3807 = vrcp.f32 %v868_v8  ;;  %v924_v16 = vadd.f32 1.0, %v3804_v10  ;;  %v977_v8 = vsel %vm975_vm10, 1, %v4042_v6 }
 0x408   :  { %3809 = vrcp.f32 %v925_v14 }
 0x409   :  { %3811 = vrcp.f32 %v924_v16 }
 0x410   :  { %v4386_v17 = vpop.eup %3805 }
 0x411   :  { %v3808_v22 = vpop.eup %3807 }
 0x412   :  { %v3810_v32 = vpop.eup %3809 }
 0x413   :  { %v3812_v35 = vpop.eup %3811 }
 0x46a   :  { %v891_v20 = vpop.permute.xlu1 %890 }
 0x46b   :  { %v895_v21 = vmul.f32 %v4386_v17, %v891_v20 }
 0x46c   :  { %v889_v23 = vpop.permute.xlu0 %888 }
 0x46d   :  { %900 = vrot.lane.b32.xlu0 %v895_v21, %s4044_s5  ;;  %v894_v24 = vmul.f32 %v3808_v22, %v889_v23 }
 0x46f   :  { %898 = vrot.lane.b32.xlu1 %v894_v24, %s4044_s5 }
 0x470   :  { %v700_v26 = vpop.permute.xlu0 %699 }
 0x471   :  { %v4393_v27 = vsel %vm684_vm8, %v700_v26, 0.0 }
 0x472   :  { %v933_v28 = vrot.slane %v4393_v27, 2  ;;  %v934_v30 = vrot.slane %v4393_v27, 3 }
 0x474   :  { %v946_v31 = vpop.permute.xlu1 %945  ;;  %935 = vrot.lane.b32.xlu1 %v933_v28, %s4044_s5  ;;  %937 = vrot.lane.b32.xlu0 %v934_v30, %s4044_s5 }
 0x475   :  { %v948_v33 = vpop.permute.xlu0 %947  ;;  %v951_v37 = vmul.f32 %v3812_v35, %v946_v31 }
 0x476   :  { %v952_v36 = vmul.f32 %v3810_v32, %v948_v33 }
 0x478   :  { %957 = vrot.lane.b32.xlu0 %v952_v36, %s4044_s5  ;;  %955 = vrot.lane.b32.xlu1 %v951_v37, %s4044_s5  ;;  %v879_v42 = vpop.permute.xlu1 %878 }
 0x479   :  { %v881_v40 = vpop.permute.xlu0 %880  ;;  %v884_v47 = vmul.f32 %v3808_v22, %v879_v42 }
 0x47a   :  { %v885_v44 = vmul.f32 %v4386_v17, %v881_v40 }
 0x4df   :  { %v901_v45 = vpop.permute.xlu0 %900 }
 0x4e0   :  { %v905_v46 = vadd.f32 %v901_v45, %v885_v44 }
 0x4e1   :  { %v899_v48 = vpop.permute.xlu1 %898 }
 0x4e2   :  { %3813 = vtanh.f32 %v905_v46  ;;  %v904_v49 = vadd.f32 %v899_v48, %v884_v47 }
 0x4e4   :  { %3815 = vtanh.f32 %v904_v49  ;;  %v992_v50 = vrot.slane %v904_v49, 1 }
 0x4e6   :  { %v938_v51 = vpop.permute.xlu0 %937  ;;  %v936_v52 = vpop.permute.xlu1 %935  ;;  %v993_v53 = vsel %vm666_vm3, %v905_v46, %v992_v50 }
 0x4e7   :  { %v942_v54 = vmul.f32 %v3810_v32, %v938_v51  ;;  %v941_v55 = vmul.f32 %v3812_v35, %v936_v52 }
 0x4ea   :  { %v958_v56 = vpop.permute.xlu0 %957  ;;  %v956_v57 = vpop.permute.xlu1 %955 }
 0x4eb   :  { %v962_v60 = vadd.f32 %v958_v56, %v942_v54  ;;  %v961_v61 = vadd.f32 %v956_v57, %v941_v55 }
 0x4ec   :  { %v3814_v58 = vpop.eup %3813 }
 0x4ed   :  { %912 = vrot.lane.b32.xlu0 %v3814_v58, %s4043_s3  ;;  %3817 = vtanh.f32 %v962_v60  ;;  %v1015_v62 = vrot.slane %v962_v60, 5  ;;  %v1014_v63 = vrot.slane %v961_v61, 6 }
 0x4ee   :  { %v3816_v0 = vpop.eup %3815  ;;  %3819 = vtanh.f32 %v961_v61 }
 0x4ef   :  { %910 = vrot.lane.b32.xlu1 %v3816_v0, %s4043_s3  ;;  %v4406_v1 = vsel %vm666_vm3, %v1015_v62, %v1014_v63 }
 0x4f7   :  { %v3818_v3 = vpop.eup %3817 }
 0x4f8   :  { %v3820_v5 = vpop.eup %3819  ;;  %969 = vrot.lane.b32.xlu0 %v3818_v3, %s4043_s3 }
 0x4f9   :  { %967 = vrot.lane.b32.xlu1 %v3820_v5, %s4043_s3 }
 0x4fc   :  { %1000 = vperm.xlu0 %3694, %v998_v7  }
 0x4fd   :  { %979 = vperm.xlu1 %3695, %v977_v8  }
 0x55f   :  { %v913_v9 = vpop.permute.xlu0 %912 }
 0x560   :  { %v917_v16 = vmul.f32 %v4386_v17, %v913_v9 }
 0x561   :  { %v911_v10 = vpop.permute.xlu1 %910 }
 0x562   :  { %v916_v14 = vmul.f32 %v3808_v22, %v911_v10 }
 0x564   :  { %v984_v20 = vrot.slane %v916_v14, 1 }
 0x566   :  { %v985_v21 = vsel %vm666_vm3, %v917_v16, %v984_v20 }
 0x567   :  { %986 = vrot.lane.b32.xlu1 %v985_v21, %s4044_s5 }
 0x56a   :  { %v970_v23 = vpop.permute.xlu0 %969 }
 0x56b   :  { %v974_v24 = vmul.f32 %v3810_v32, %v970_v23  ;;  %v968_v26 = vpop.permute.xlu1 %967  ;;  %994 = vrot.lane.b32.xlu1 %v993_v53, %s4045_s1 }
 0x56c   :  { %v973_v28 = vmul.f32 %v3812_v35, %v968_v26 }
 0x56d   :  { %v1006_v30 = vrot.slane %v974_v24, 5 }
 0x56e   :  { %v1005_v31 = vrot.slane %v973_v28, 6 }
 0x570   :  { %v1007_v33 = vsel %vm666_vm3, %v1006_v30, %v1005_v31 }
 0x571   :  { %1008 = vrot.lane.b32.xlu0 %v1007_v33, %s4044_s5 }
 0x57b   :  { %v4434_v32 = vpop.permute.xlu0 %1000 }
 0x57c   :  { %v4420_v22 = vpop.permute.xlu1 %979  ;;  %vm1002_vm12 = vcmp.eq.s32.totalorder %v4434_v32, 1 }
 0x57d   :  { %vm981_vm11 = vcmp.eq.s32.totalorder %v4420_v22, 1 }
 0x5d9   :  { %v987_v17 = vpop.permute.xlu1 %986 }
 0x5da   :  { %v4426_v36 = vsel %vm981_vm11, %v987_v17, %v4345_v41 }
 0x5db   :  { %3394 = vmatmul.mubr.msk.f32.vlgmr.msra.gmra.mrb[8].mxu1 %vm403_vm7, %v4426_v36 }
 0x5dc   :  { %3590 = vmatpush3.bf16.msra.mxu1 %v4191_v29  ;;  %3404 = vmatprep.mubr.msk.f32.mxu1 %vm4040_vm0, %v4041_v4 }
 0x5dd   :  { %3591 = vmatprep.subr.bf16.mxu1 %v4039_v2  ;;  %v995_v54 = vpop.permute.xlu1 %994 }
 0x5de   :  { %v4463_v56 = vsel %vm981_vm11, %v995_v54, %v4378_v59 }
 0x5df   :  { %v1196_v58 = vrot.slane %v4463_v56, 6  ;;  %v1197_v60 = vrot.slane %v4463_v56, 7 }
 0x5e0   :  { %3593 = vmatpush3.bf16.msra.mxu1 %v4208_v34 }
 0x5e1   :  { %3594 = vmatprep.subr.bf16.mxu1 %v4039_v2 }
 0x5e3   :  { %v1009_v41 = vpop.permute.xlu0 %1008 }
 0x5e4   :  { %v4442_v35 = vsel %vm1002_vm12, %v1009_v41, %v4356_v43 }
 0x5e5   :  { %3405 = vmatmul.mubr.msk.f32.vlgmr.msra.gmra.mrb[10].mxu1 %vm403_vm7, %v4442_v35 }
 0x5e6   :  { %3596 = vmatpush3.bf16.msra.mxu1 %v4160_v19  ;;  %3415 = vmatprep.mubr.msk.f32.mxu1 %vm4040_vm0, %v4041_v4 }
 0x5e7   :  { %3597 = vmatprep.subr.bf16.mxu1 %v4039_v2 }
 0x5ea   :  { %3599 = vmatpush3.bf16.msra.mxu1 %v4179_v25 }
 0x5eb   :  { %3600 = vmatprep.subr.bf16.mxu1 %v4039_v2 }
 0x6ae   :  { %v1090_v37 = vpop.f32.mrb[8].mxu1 }
 0x6af   :  { %v1095_v40 = vrot.slane %v1090_v37, 6  ;;  %v1096_v42 = vrot.slane %v1090_v37, 7  ;;  %v3395_v44 = vpop.f32.mrb[9].mxu1 }
 0x6b1   :  { %v1099_v43 = vadd.f32 %v4296_v11, %v1095_v40  ;;  %v1100_v45 = vadd.f32 %v4300_v15, %v1096_v42 }
 0x6b3   :  { %3821 = vtanh.f32 %v1099_v43  ;;  %v3203_v61 = vmul.f32 -1.442695, %v1099_v43  ;;  %v3204_v62 = vmul.f32 -1.442695, %v1100_v45 }
 0x6b4   :  { %3823 = vtanh.f32 %v1100_v45 }
 0x6b8   :  { %v1170_v46 = vpop.f32.mrb[10].mxu1 }
 0x6b9   :  { %v1175_v47 = vrot.slane %v1170_v46, 3  ;;  %v1176_v48 = vrot.slane %v1170_v46, 4  ;;  %v3406_v49 = vpop.f32.mrb[11].mxu1 }
 0x6bb   :  { %v1179_v50 = vadd.f32 %v4298_v12, %v1175_v47  ;;  %v1180_v51 = vadd.f32 %v4303_v18, %v1176_v48 }
 0x6bd   :  { %v3822_v52 = vpop.eup %3821  ;;  %3825 = vtanh.f32 %v1179_v50  ;;  %v3205_v63 = vmul.f32 -1.442695, %v1179_v50  ;;  %v3206_v59 = vmul.f32 -1.442695, %v1180_v51 }
 0x6be   :  { %v3824_v53 = vpop.eup %3823  ;;  %3827 = vtanh.f32 %v1180_v51  ;;  %1208 = vrot.lane.b32.xlu0 %v3822_v52, %s4043_s3 }
 0x6bf   :  { %1210 = vrot.lane.b32.xlu1 %v3824_v53, %s4043_s3  ;;  %3829 = vpow2.f32 %v3203_v61 }
 0x6c0   :  { %3831 = vpow2.f32 %v3204_v62 }
 0x6c1   :  { %3833 = vpow2.f32 %v3205_v63 }
 0x6c2   :  { %1017 = vrot.lane.b32.xlu0 %v4406_v1, %s4045_s1  ;;  %3835 = vpow2.f32 %v3206_v59 }
 0x6c7   :  { %v3826_v55 = vpop.eup %3825 }
 0x6c8   :  { %v3828_v57 = vpop.eup %3827  ;;  %1265 = vrot.lane.b32.xlu1 %v3826_v55, %s4043_s3 }
 0x6c9   :  { %1267 = vrot.lane.b32.xlu0 %v3828_v57, %s4043_s3  ;;  %v3830_v0 = vpop.eup %3829 }
 0x6ca   :  { %v3832_v1 = vpop.eup %3831  ;;  %v1187_v3 = vadd.f32 1.0, %v3830_v0 }
 0x6cb   :  { %v1188_v5 = vadd.f32 1.0, %v3832_v1  ;;  %v3834_v7 = vpop.eup %3833 }
 0x6cc   :  { %1198 = vrot.lane.b32.xlu1 %v1196_v58, %s4044_s5  ;;  %3837 = vrcp.f32 %v1187_v3  ;;  %v3836_v8 = vpop.eup %3835  ;;  %v1244_v9 = vadd.f32 1.0, %v3834_v7 }
 0x6cd   :  { %1200 = vrot.lane.b32.xlu0 %v1197_v60, %s4044_s5  ;;  %3839 = vrcp.f32 %v1188_v5  ;;  %v1245_v10 = vadd.f32 1.0, %v3836_v8  ;;  %v1297_v8 = vsel %vm1295_vm13, 1, %v4042_v6 }
 0x6ce   :  { %3841 = vrcp.f32 %v1244_v9  ;;  %v1320_v9 = vsel %vm1296_vm14, 1, %v4042_v6 }
 0x6cf   :  { %3843 = vrcp.f32 %v1245_v10 }
 0x6d6   :  { %v4471_v14 = vpop.eup %3837 }
 0x6d7   :  { %v4473_v20 = vpop.eup %3839 }
 0x6d8   :  { %v3842_v33 = vpop.eup %3841 }
 0x6d9   :  { %v3844_v41 = vpop.eup %3843 }
 0x730   :  { %v1209_v16 = vpop.permute.xlu0 %1208 }
 0x731   :  { %v1214_v21 = vmul.f32 %v4471_v14, %v1209_v16  ;;  %v1211_v23 = vpop.permute.xlu1 %1210 }
 0x732   :  { %v1215_v24 = vmul.f32 %v4473_v20, %v1211_v23 }
 0x733   :  { %1218 = vrot.lane.b32.xlu1 %v1214_v21, %s4044_s5 }
 0x734   :  { %1220 = vrot.lane.b32.xlu0 %v1215_v24, %s4044_s5  ;;  %v1018_v26 = vpop.permute.xlu0 %1017 }
 0x735   :  { %v4482_v28 = vsel %vm1002_vm12, %v1018_v26, %v4393_v27 }
 0x736   :  { %v1253_v30 = vrot.slane %v4482_v28, 3  ;;  %v1254_v31 = vrot.slane %v4482_v28, 4 }
 0x738   :  { %1255 = vrot.lane.b32.xlu1 %v1253_v30, %s4044_s5  ;;  %1257 = vrot.lane.b32.xlu0 %v1254_v31, %s4044_s5 }
 0x73a   :  { %v1266_v17 = vpop.permute.xlu1 %1265 }
 0x73b   :  { %v1268_v37 = vpop.permute.xlu0 %1267  ;;  %v1271_v40 = vmul.f32 %v3842_v33, %v1266_v17 }
 0x73c   :  { %v1272_v42 = vmul.f32 %v3844_v41, %v1268_v37 }
 0x73d   :  { %1275 = vrot.lane.b32.xlu1 %v1271_v40, %s4044_s5 }
 0x73e   :  { %1277 = vrot.lane.b32.xlu0 %v1272_v42, %s4044_s5  ;;  %v1199_v27 = vpop.permute.xlu1 %1198 }
 0x73f   :  { %v1201_v44 = vpop.permute.xlu0 %1200  ;;  %v1204_v43 = vmul.f32 %v4471_v14, %v1199_v27 }
 0x740   :  { %v1205_v45 = vmul.f32 %v4473_v20, %v1201_v44 }
 0x7a5   :  { %v1219_v46 = vpop.permute.xlu1 %1218 }
 0x7a6   :  { %v1221_v47 = vpop.permute.xlu0 %1220  ;;  %v1224_v48 = vadd.f32 %v1219_v46, %v1204_v43 }
 0x7a7   :  { %v1225_v49 = vadd.f32 %v1221_v47, %v1205_v45 }
 0x7a8   :  { %3845 = vtanh.f32 %v1224_v48  ;;  %v1313_v50 = vrot.slane %v1224_v48, 2 }
 0x7a9   :  { %3847 = vtanh.f32 %v1225_v49  ;;  %v1314_v51 = vrot.slane %v1225_v49, 1 }
 0x7aa   :  { %v1258_v52 = vpop.permute.xlu0 %1257  ;;  %v1256_v53 = vpop.permute.xlu1 %1255 }
 0x7ab   :  { %v1315_v54 = vsel %vm666_vm3, %v1314_v51, %v1313_v50  ;;  %v1261_v55 = vmul.f32 %v3842_v33, %v1256_v53  ;;  %v1262_v57 = vmul.f32 %v3844_v41, %v1258_v52 }
 0x7af   :  { %v1276_v58 = vpop.permute.xlu1 %1275 }
 0x7b0   :  { %v1278_v60 = vpop.permute.xlu0 %1277  ;;  %v1281_v61 = vadd.f32 %v1276_v58, %v1261_v55 }
 0x7b1   :  { %v1282_v62 = vadd.f32 %v1278_v60, %v1262_v57 }
 0x7b2   :  { %v3846_v63 = vpop.eup %3845  ;;  %3849 = vtanh.f32 %v1281_v61  ;;  %v1336_v59 = vrot.slane %v1281_v61, 5 }
 0x7b3   :  { %v3848_v0 = vpop.eup %3847  ;;  %3851 = vtanh.f32 %v1282_v62  ;;  %v1337_v1 = vrot.slane %v1282_v62, 4  ;;  %1230 = vrot.lane.b32.xlu1 %v3846_v63, %s4043_s3 }
 0x7b4   :  { %1232 = vrot.lane.b32.xlu0 %v3848_v0, %s4043_s3 }
 0x7b5   :  { %v4496_v3 = vsel %vm666_vm3, %v1337_v1, %v1336_v59 }
 0x7bc   :  { %v3850_v5 = vpop.eup %3849 }
 0x7bd   :  { %v3852_v7 = vpop.eup %3851  ;;  %1287 = vrot.lane.b32.xlu1 %v3850_v5, %s4043_s3 }
 0x7be   :  { %1289 = vrot.lane.b32.xlu0 %v3852_v7, %s4043_s3 }
 0x7c1   :  { %1299 = vperm.xlu1 %3695, %v1297_v8  }
 0x7c2   :  { %1322 = vperm.xlu0 %3694, %v1320_v9  }
 0x825   :  { %v1231_v10 = vpop.permute.xlu1 %1230 }
 0x826   :  { %v1233_v16 = vpop.permute.xlu0 %1232  ;;  %v1236_v21 = vmul.f32 %v4471_v14, %v1231_v10 }
 0x827   :  { %v1237_v23 = vmul.f32 %v4473_v20, %v1233_v16 }
 0x828   :  { %v1304_v24 = vrot.slane %v1236_v21, 2 }
 0x829   :  { %v1305_v26 = vrot.slane %v1237_v23, 1 }
 0x82b   :  { %v1306_v30 = vsel %vm666_vm3, %v1305_v26, %v1304_v24 }
 0x82c   :  { %1307 = vrot.lane.b32.xlu1 %v1306_v30, %s4044_s5 }
 0x82f   :  { %v1288_v31 = vpop.permute.xlu1 %1287 }
 0x830   :  { %v1290_v17 = vpop.permute.xlu0 %1289  ;;  %v1293_v37 = vmul.f32 %v3842_v33, %v1288_v31  ;;  %1316 = vrot.lane.b32.xlu1 %v1315_v54, %s4045_s1 }
 0x831   :  { %v1294_v40 = vmul.f32 %v3844_v41, %v1290_v17 }
 0x832   :  { %v1327_v42 = vrot.slane %v1293_v37, 5 }
 0x833   :  { %v1328_v27 = vrot.slane %v1294_v40, 4 }
 0x835   :  { %v1329_v44 = vsel %vm666_vm3, %v1328_v27, %v1327_v42 }
 0x836   :  { %1330 = vrot.lane.b32.xlu0 %v1329_v44, %s4044_s5 }
 0x840   :  { %v4511_v14 = vpop.permute.xlu1 %1299 }
 0x841   :  { %vm1301_vm15 = vcmp.eq.s32.totalorder %v4511_v14, 1  ;;  %v4525_v33 = vpop.permute.xlu0 %1322 }
 0x842   :  { %vm1324_vm1 = vcmp.eq.s32.totalorder %v4525_v33, 1 }
 0x89e   :  { %v1308_v20 = vpop.permute.xlu1 %1307 }
 0x89f   :  { %v4517_v43 = vsel %vm1301_vm15, %v1308_v20, %v4426_v36 }
 0x8a0   :  { %3416 = vmatmul.mubr.msk.f32.vlgmr.msra.gmra.mrb[12].mxu1 %vm403_vm7, %v4517_v43 }
 0x8a1   :  { %3602 = vmatpush3.bf16.msra.mxu1 %v4191_v29  ;;  %3426 = vmatprep.mubr.msk.f32.mxu1 %vm4040_vm0, %v4041_v4 }
 0x8a2   :  { %3603 = vmatprep.subr.bf16.mxu1 %v4039_v2  ;;  %v1317_v60 = vpop.permute.xlu1 %1316 }
 0x8a3   :  { %v4554_v62 = vsel %vm1301_vm15, %v1317_v60, %v4463_v56 }
 0x8a4   :  { %v1518_v59 = vrot.slane %v4554_v62, 5  ;;  %v1519_v0 = vrot.slane %v4554_v62, 6 }
 0x8a5   :  { %3605 = vmatpush3.bf16.msra.mxu1 %v4208_v34 }
 0x8a6   :  { %3606 = vmatprep.subr.bf16.mxu1 %v4039_v2 }
 0x8a8   :  { %v1331_v36 = vpop.permute.xlu0 %1330 }
 0x8a9   :  { %v4533_v41 = vsel %vm1324_vm1, %v1331_v36, %v4442_v35 }
 0x8aa   :  { %3427 = vmatmul.mubr.msk.f32.vlgmr.msra.gmra.mrb[14].mxu1 %vm403_vm7, %v4533_v41 }
 0x8ab   :  { %3608 = vmatpush3.bf16.msra.mxu1 %v4160_v19  ;;  %3437 = vmatprep.mubr.msk.f32.mxu1 %vm4040_vm0, %v4041_v4 }
 0x8ac   :  { %3609 = vmatprep.subr.bf16.mxu1 %v4039_v2 }
 0x8af   :  { %3611 = vmatpush3.bf16.msra.mxu1 %v4179_v25 }
 0x8b0   :  { %3612 = vmatprep.subr.bf16.mxu1 %v4039_v2 }
 0x973   :  { %v1412_v45 = vpop.f32.mrb[12].mxu1 }
 0x974   :  { %v1417_v46 = vrot.slane %v1412_v45, 5  ;;  %v1418_v47 = vrot.slane %v1412_v45, 6  ;;  %v3417_v48 = vpop.f32.mrb[13].mxu1 }
 0x976   :  { %v1421_v35 = vadd.f32 %v4296_v11, %v1417_v46  ;;  %v1422_v49 = vadd.f32 %v4300_v15, %v1418_v47 }
 0x978   :  { %3853 = vtanh.f32 %v1421_v35  ;;  %v3209_v1 = vmul.f32 -1.442695, %v1421_v35 }
 0x979   :  { %3855 = vtanh.f32 %v1422_v49 }
 0x97d   :  { %v1492_v50 = vpop.f32.mrb[14].mxu1 }
 0x97e   :  { %v1497_v51 = vrot.slane %v1492_v50, 4  ;;  %v1498_v52 = vrot.slane %v1492_v50, 5  ;;  %v3428_v53 = vpop.f32.mrb[15].mxu1 }
 0x980   :  { %v1501_v54 = vadd.f32 %v4298_v12, %v1497_v51  ;;  %v1502_v55 = vadd.f32 %v4303_v18, %v1498_v52 }
 0x982   :  { %v3854_v57 = vpop.eup %3853  ;;  %3857 = vtanh.f32 %v1501_v54  ;;  %v3211_v5 = vmul.f32 -1.442695, %v1501_v54  ;;  %v3212_v56 = vmul.f32 -1.442695, %v1502_v55 }
 0x983   :  { %v3856_v58 = vpop.eup %3855  ;;  %3859 = vtanh.f32 %v1502_v55  ;;  %1530 = vrot.lane.b32.xlu0 %v3854_v57, %s4043_s3 }
 0x984   :  { %1532 = vrot.lane.b32.xlu1 %v3856_v58, %s4043_s3  ;;  %3861 = vpow2.f32 %v3209_v1 }
 0x987   :  { %1339 = vrot.lane.b32.xlu0 %v4496_v3, %s4045_s1  ;;  %v3210_v3 = vmul.f32 -1.442695, %v1422_v49 }
 0x989   :  { %3863 = vpow2.f32 %v3210_v3 }
 0x98a   :  { %3865 = vpow2.f32 %v3211_v5 }
 0x98b   :  { %3867 = vpow2.f32 %v3212_v56 }
 0x98c   :  { %v3858_v61 = vpop.eup %3857 }
 0x98d   :  { %v3860_v63 = vpop.eup %3859  ;;  %1587 = vrot.lane.b32.xlu1 %v3858_v61, %s4043_s3 }
 0x98e   :  { %1589 = vrot.lane.b32.xlu0 %v3860_v63, %s4043_s3  ;;  %v3862_v7 = vpop.eup %3861 }
 0x98f   :  { %v1509_v9 = vadd.f32 1.0, %v3862_v7 }
 0x991   :  { %1520 = vrot.lane.b32.xlu1 %v1518_v59, %s4044_s5  ;;  %3869 = vrcp.f32 %v1509_v9 }
 0x992   :  { %1522 = vrot.lane.b32.xlu0 %v1519_v0, %s4044_s5 }
 0x993   :  { %v3864_v8 = vpop.eup %3863 }
 0x994   :  { %v1510_v10 = vadd.f32 1.0, %v3864_v8  ;;  %v3866_v16 = vpop.eup %3865 }
 0x995   :  { %v3868_v21 = vpop.eup %3867  ;;  %v1566_v23 = vadd.f32 1.0, %v3866_v16 }
 0x996   :  { %3871 = vrcp.f32 %v1510_v10  ;;  %v1567_v24 = vadd.f32 1.0, %v3868_v21 }
 0x997   :  { %3873 = vrcp.f32 %v1566_v23 }
 0x998   :  { %3875 = vrcp.f32 %v1567_v24  ;;  %v1619_v24 = vsel %vm1617_vm2, 1, %v4042_v6 }
 0x99b   :  { %v4562_v26 = vpop.eup %3869 }
 0x9a0   :  { %v4564_v31 = vpop.eup %3871 }
 0x9a1   :  { %v3874_v36 = vpop.eup %3873 }
 0x9a2   :  { %v3876_v46 = vpop.eup %3875 }
 0x9f5   :  { %v1531_v30 = vpop.permute.xlu0 %1530 }
 0x9f6   :  { %v1536_v17 = vmul.f32 %v4562_v26, %v1531_v30  ;;  %v1533_v37 = vpop.permute.xlu1 %1532  ;;  %v1642_v30 = vsel %vm1618_vm4, 1, %v4042_v6 }
 0x9f7   :  { %v1537_v40 = vmul.f32 %v4564_v31, %v1533_v37 }
 0x9f8   :  { %1540 = vrot.lane.b32.xlu1 %v1536_v17, %s4044_s5 }
 0x9f9   :  { %1542 = vrot.lane.b32.xlu0 %v1537_v40, %s4044_s5  ;;  %v1340_v42 = vpop.permute.xlu0 %1339 }
 0x9fa   :  { %v4573_v27 = vsel %vm1324_vm1, %v1340_v42, %v4482_v28 }
 0x9fb   :  { %v1575_v44 = vrot.slane %v4573_v27, 4  ;;  %v1576_v20 = vrot.slane %v4573_v27, 5 }
 0x9fd   :  { %1577 = vrot.lane.b32.xlu1 %v1575_v44, %s4044_s5  ;;  %1579 = vrot.lane.b32.xlu0 %v1576_v20, %s4044_s5 }
 0x9ff   :  { %v1588_v45 = vpop.permute.xlu1 %1587 }
 0xa00   :  { %v1590_v47 = vpop.permute.xlu0 %1589  ;;  %v1593_v48 = vmul.f32 %v3874_v36, %v1588_v45 }
 0xa01   :  { %v1594_v35 = vmul.f32 %v3876_v46, %v1590_v47 }
 0xa02   :  { %1597 = vrot.lane.b32.xlu1 %v1593_v48, %s4044_s5 }
 0xa03   :  { %1599 = vrot.lane.b32.xlu0 %v1594_v35, %s4044_s5  ;;  %v1521_v28 = vpop.permute.xlu1 %1520 }
 0xa04   :  { %v1523_v49 = vpop.permute.xlu0 %1522  ;;  %v1526_v50 = vmul.f32 %v4562_v26, %v1521_v28 }
 0xa05   :  { %v1527_v51 = vmul.f32 %v4564_v31, %v1523_v49 }
 0xa6a   :  { %v1541_v52 = vpop.permute.xlu1 %1540 }
 0xa6b   :  { %v1543_v53 = vpop.permute.xlu0 %1542  ;;  %v1546_v54 = vadd.f32 %v1541_v52, %v1526_v50 }
 0xa6c   :  { %v1547_v55 = vadd.f32 %v1543_v53, %v1527_v51 }
 0xa6d   :  { %3877 = vtanh.f32 %v1546_v54  ;;  %v1635_v57 = vrot.slane %v1546_v54, 3 }
 0xa6e   :  { %3879 = vtanh.f32 %v1547_v55  ;;  %v1636_v58 = vrot.slane %v1547_v55, 2 }
 0xa6f   :  { %v1580_v60 = vpop.permute.xlu0 %1579  ;;  %v1578_v61 = vpop.permute.xlu1 %1577 }
 0xa70   :  { %v1637_v63 = vsel %vm666_vm3, %v1636_v58, %v1635_v57  ;;  %v1583_v59 = vmul.f32 %v3874_v36, %v1578_v61  ;;  %v1584_v0 = vmul.f32 %v3876_v46, %v1580_v60 }
 0xa74   :  { %v1598_v1 = vpop.permute.xlu1 %1597 }
 0xa75   :  { %v1600_v3 = vpop.permute.xlu0 %1599  ;;  %v1603_v5 = vadd.f32 %v1598_v1, %v1583_v59 }
 0xa76   :  { %v1604_v56 = vadd.f32 %v1600_v3, %v1584_v0 }
 0xa77   :  { %v3878_v7 = vpop.eup %3877  ;;  %3881 = vtanh.f32 %v1603_v5  ;;  %v1658_v8 = vrot.slane %v1603_v5, 4 }
 0xa78   :  { %v3880_v9 = vpop.eup %3879  ;;  %3883 = vtanh.f32 %v1604_v56  ;;  %v1659_v10 = vrot.slane %v1604_v56, 3  ;;  %1552 = vrot.lane.b32.xlu1 %v3878_v7, %s4043_s3 }
 0xa79   :  { %1554 = vrot.lane.b32.xlu0 %v3880_v9, %s4043_s3 }
 0xa7a   :  { %v4587_v16 = vsel %vm666_vm3, %v1659_v10, %v1658_v8 }
 0xa81   :  { %v3882_v21 = vpop.eup %3881 }
 0xa82   :  { %v3884_v23 = vpop.eup %3883  ;;  %1609 = vrot.lane.b32.xlu1 %v3882_v21, %s4043_s3 }
 0xa83   :  { %1611 = vrot.lane.b32.xlu0 %v3884_v23, %s4043_s3 }
 0xa86   :  { %1621 = vperm.xlu1 %3695, %v1619_v24  }
 0xa87   :  { %1644 = vperm.xlu0 %3694, %v1642_v30  }
 0xaea   :  { %v1553_v17 = vpop.permute.xlu1 %1552 }
 0xaeb   :  { %v1555_v37 = vpop.permute.xlu0 %1554  ;;  %v1558_v40 = vmul.f32 %v4562_v26, %v1553_v17 }
 0xaec   :  { %v1559_v42 = vmul.f32 %v4564_v31, %v1555_v37 }
 0xaed   :  { %v1626_v44 = vrot.slane %v1558_v40, 3 }
 0xaee   :  { %v1627_v20 = vrot.slane %v1559_v42, 2 }
 0xaf0   :  { %v1628_v13 = vsel %vm666_vm3, %v1627_v20, %v1626_v44 }
 0xaf1   :  { %1629 = vrot.lane.b32.xlu1 %v1628_v13, %s4044_s5 }
 0xaf4   :  { %v1610_v45 = vpop.permute.xlu1 %1609 }
 0xaf5   :  { %v1612_v47 = vpop.permute.xlu0 %1611  ;;  %v1615_v48 = vmul.f32 %v3874_v36, %v1610_v45  ;;  %1638 = vrot.lane.b32.xlu1 %v1637_v63, %s4045_s1 }
 0xaf6   :  { %v1616_v6 = vmul.f32 %v3876_v46, %v1612_v47 }
 0xaf7   :  { %v1649_v35 = vrot.slane %v1615_v48, 4 }
 0xaf8   :  { %v1650_v28 = vrot.slane %v1616_v6, 3 }
 0xafa   :  { %v1651_v49 = vsel %vm666_vm3, %v1650_v28, %v1649_v35 }
 0xafb   :  { %1652 = vrot.lane.b32.xlu0 %v1651_v49, %s4044_s5 }
 0xb05   :  { %v4602_v26 = vpop.permute.xlu1 %1621 }
 0xb06   :  { %vm1623_vm5 = vcmp.eq.s32.totalorder %v4602_v26, 1  ;;  %v4616_v36 = vpop.permute.xlu0 %1644 }
 0xb07   :  { %vm1646_vm9 = vcmp.eq.s32.totalorder %v4616_v36, 1 }
 0xb63   :  { %v1630_v31 = vpop.permute.xlu1 %1629 }
 0xb64   :  { %v4608_v50 = vsel %vm1623_vm5, %v1630_v31, %v4517_v43 }
 0xb65   :  { %3438 = vmatmul.mubr.msk.f32.vlgmr.msra.gmra.mrb[16].mxu1 %vm403_vm7, %v4608_v50 }
 0xb66   :  { %3614 = vmatpush3.bf16.msra.mxu1 %v4191_v29  ;;  %3448 = vmatprep.mubr.msk.f32.mxu1 %vm4040_vm0, %v4041_v4 }
 0xb67   :  { %3615 = vmatprep.subr.bf16.mxu1 %v4039_v2  ;;  %v1639_v3 = vpop.permute.xlu1 %1638 }
 0xb68   :  { %v4645_v56 = vsel %vm1623_vm5, %v1639_v3, %v4554_v62 }
 0xb69   :  { %v1840_v8 = vrot.slane %v4645_v56, 4  ;;  %v1841_v9 = vrot.slane %v4645_v56, 5 }
 0xb6a   :  { %3617 = vmatpush3.bf16.msra.mxu1 %v4208_v34 }
 0xb6b   :  { %3618 = vmatprep.subr.bf16.mxu1 %v4039_v2 }
 0xb6d   :  { %v1653_v43 = vpop.permute.xlu0 %1652 }
 0xb6e   :  { %v4624_v46 = vsel %vm1646_vm9, %v1653_v43, %v4533_v41 }
 0xb6f   :  { %3449 = vmatmul.mubr.msk.f32.vlgmr.msra.gmra.mrb[18].mxu1 %vm403_vm7, %v4624_v46 }
 0xb70   :  { %3620 = vmatpush3.bf16.msra.mxu1 %v4160_v19  ;;  %3459 = vmatprep.mubr.msk.f32.mxu1 %vm4040_vm0, %v4041_v4 }
 0xb71   :  { %3621 = vmatprep.subr.bf16.mxu1 %v4039_v2 }
 0xb74   :  { %3623 = vmatpush3.bf16.msra.mxu1 %v4179_v25 }
 0xb75   :  { %3624 = vmatprep.subr.bf16.mxu1 %v4039_v2 }
 0xc38   :  { %v1734_v51 = vpop.f32.mrb[16].mxu1 }
 0xc39   :  { %v1739_v52 = vrot.slane %v1734_v51, 4  ;;  %v1740_v53 = vrot.slane %v1734_v51, 5  ;;  %v3439_v54 = vpop.f32.mrb[17].mxu1 }
 0xc3b   :  { %v1743_v41 = vadd.f32 %v4296_v11, %v1739_v52  ;;  %v1744_v55 = vadd.f32 %v4300_v15, %v1740_v53 }
 0xc3d   :  { %3885 = vtanh.f32 %v1743_v41  ;;  %v3215_v10 = vmul.f32 -1.442695, %v1743_v41 }
 0xc3e   :  { %3887 = vtanh.f32 %v1744_v55 }
 0xc42   :  { %v1814_v57 = vpop.f32.mrb[18].mxu1 }
 0xc43   :  { %v1819_v58 = vrot.slane %v1814_v57, 5  ;;  %v1820_v60 = vrot.slane %v1814_v57, 6  ;;  %v3450_v61 = vpop.f32.mrb[19].mxu1 }
 0xc45   :  { %v1823_v63 = vadd.f32 %v4298_v12, %v1819_v58  ;;  %v1824_v59 = vadd.f32 %v4303_v18, %v1820_v60 }
 0xc47   :  { %v3886_v0 = vpop.eup %3885  ;;  %3889 = vtanh.f32 %v1823_v63  ;;  %v3217_v21 = vmul.f32 -1.442695, %v1823_v63  ;;  %v3218_v62 = vmul.f32 -1.442695, %v1824_v59 }
 0xc48   :  { %v3888_v1 = vpop.eup %3887  ;;  %3891 = vtanh.f32 %v1824_v59  ;;  %1852 = vrot.lane.b32.xlu0 %v3886_v0, %s4043_s3 }
 0xc49   :  { %1854 = vrot.lane.b32.xlu1 %v3888_v1, %s4043_s3  ;;  %3893 = vpow2.f32 %v3215_v10 }
 0xc4c   :  { %1661 = vrot.lane.b32.xlu0 %v4587_v16, %s4045_s1  ;;  %v3216_v16 = vmul.f32 -1.442695, %v1744_v55 }
 0xc4e   :  { %3895 = vpow2.f32 %v3216_v16 }
 0xc4f   :  { %3897 = vpow2.f32 %v3217_v21 }
 0xc50   :  { %3899 = vpow2.f32 %v3218_v62 }
 0xc51   :  { %v3890_v5 = vpop.eup %3889 }
 0xc52   :  { %v3892_v7 = vpop.eup %3891  ;;  %1909 = vrot.lane.b32.xlu1 %v3890_v5, %s4043_s3 }
 0xc53   :  { %1911 = vrot.lane.b32.xlu0 %v3892_v7, %s4043_s3  ;;  %v3894_v23 = vpop.eup %3893 }
 0xc54   :  { %v1831_v30 = vadd.f32 1.0, %v3894_v23 }
 0xc56   :  { %1842 = vrot.lane.b32.xlu1 %v1840_v8, %s4044_s5  ;;  %3901 = vrcp.f32 %v1831_v30 }
 0xc57   :  { %1844 = vrot.lane.b32.xlu0 %v1841_v9, %s4044_s5 }
 0xc58   :  { %v3896_v24 = vpop.eup %3895 }
 0xc59   :  { %v1832_v17 = vadd.f32 1.0, %v3896_v24  ;;  %v3898_v37 = vpop.eup %3897 }
 0xc5a   :  { %v3900_v40 = vpop.eup %3899  ;;  %v1888_v42 = vadd.f32 1.0, %v3898_v37 }
 0xc5b   :  { %3903 = vrcp.f32 %v1832_v17  ;;  %v1889_v44 = vadd.f32 1.0, %v3900_v40 }
 0xc5c   :  { %3905 = vrcp.f32 %v1888_v42 }
 0xc5d   :  { %3907 = vrcp.f32 %v1889_v44 }
 0xc60   :  { %v3902_v20 = vpop.eup %3901 }
 0xc65   :  { %v3904_v45 = vpop.eup %3903 }
 0xc66   :  { %v3906_v43 = vpop.eup %3905 }
 0xc67   :  { %v3908_v52 = vpop.eup %3907 }
 0xcba   :  { %v1853_v13 = vpop.permute.xlu0 %1852 }
 0xcbb   :  { %v1858_v47 = vmul.f32 %v3902_v20, %v1853_v13  ;;  %v1855_v48 = vpop.permute.xlu1 %1854 }
 0xcbc   :  { %v1859_v6 = vmul.f32 %v3904_v45, %v1855_v48 }
 0xcbd   :  { %1862 = vrot.lane.b32.xlu1 %v1858_v47, %s4044_s5 }
 0xcbe   :  { %1864 = vrot.lane.b32.xlu0 %v1859_v6, %s4044_s5  ;;  %v1662_v35 = vpop.permute.xlu0 %1661 }
 0xcbf   :  { %v4658_v28 = vsel %vm1646_vm9, %v1662_v35, %v4573_v27 }
 0xcc0   :  { %v1897_v49 = vrot.slane %v4658_v28, 5  ;;  %v1898_v31 = vrot.slane %v4658_v28, 6 }
 0xcc2   :  { %1899 = vrot.lane.b32.xlu1 %v1897_v49, %s4044_s5  ;;  %1901 = vrot.lane.b32.xlu0 %v1898_v31, %s4044_s5 }
 0xcc4   :  { %v1910_v51 = vpop.permute.xlu1 %1909 }
 0xcc5   :  { %v1912_v53 = vpop.permute.xlu0 %1911  ;;  %v1915_v54 = vmul.f32 %v3906_v43, %v1910_v51 }
 0xcc6   :  { %v1916_v41 = vmul.f32 %v3908_v52, %v1912_v53 }
 0xcc7   :  { %1919 = vrot.lane.b32.xlu1 %v1915_v54, %s4044_s5 }
 0xcc8   :  { %1921 = vrot.lane.b32.xlu0 %v1916_v41, %s4044_s5  ;;  %v1843_v27 = vpop.permute.xlu1 %1842 }
 0xcc9   :  { %v1845_v55 = vpop.permute.xlu0 %1844  ;;  %v1848_v57 = vmul.f32 %v3902_v20, %v1843_v27 }
 0xcca   :  { %v1849_v58 = vmul.f32 %v3904_v45, %v1845_v55 }
 0xd2f   :  { %v1863_v60 = vpop.permute.xlu1 %1862 }
 0xd30   :  { %v1865_v61 = vpop.permute.xlu0 %1864  ;;  %v1868_v63 = vadd.f32 %v1863_v60, %v1848_v57 }
 0xd31   :  { %v1869_v59 = vadd.f32 %v1865_v61, %v1849_v58 }
 0xd32   :  { %3909 = vtanh.f32 %v1868_v63  ;;  %v1950_v0 = vrot.slane %v1868_v63, 4 }
 0xd33   :  { %3911 = vtanh.f32 %v1869_v59  ;;  %v1951_v1 = vrot.slane %v1869_v59, 3 }
 0xd34   :  { %v1902_v3 = vpop.permute.xlu0 %1901  ;;  %v1900_v5 = vpop.permute.xlu1 %1899 }
 0xd35   :  { %v1952_v7 = vsel %vm666_vm3, %v1951_v1, %v1950_v0  ;;  %v1905_v8 = vmul.f32 %v3906_v43, %v1900_v5  ;;  %v1906_v9 = vmul.f32 %v3908_v52, %v1902_v3 }
 0xd39   :  { %v1920_v10 = vpop.permute.xlu1 %1919 }
 0xd3a   :  { %v1922_v16 = vpop.permute.xlu0 %1921  ;;  %v1925_v21 = vadd.f32 %v1920_v10, %v1905_v8 }
 0xd3b   :  { %v1926_v62 = vadd.f32 %v1922_v16, %v1906_v9 }
 0xd3c   :  { %v3910_v23 = vpop.eup %3909  ;;  %3913 = vtanh.f32 %v1925_v21  ;;  %v1968_v24 = vrot.slane %v1925_v21, 3 }
 0xd3d   :  { %v3912_v30 = vpop.eup %3911  ;;  %3915 = vtanh.f32 %v1926_v62  ;;  %v1969_v17 = vrot.slane %v1926_v62, 2  ;;  %1874 = vrot.lane.b32.xlu1 %v3910_v23, %s4043_s3 }
 0xd3e   :  { %1876 = vrot.lane.b32.xlu0 %v3912_v30, %s4043_s3 }
 0xd3f   :  { %v1970_v37 = vsel %vm666_vm3, %v1969_v17, %v1968_v24 }
 0xd46   :  { %v3914_v40 = vpop.eup %3913 }
 0xd47   :  { %v3916_v42 = vpop.eup %3915  ;;  %1931 = vrot.lane.b32.xlu1 %v3914_v40, %s4043_s3 }
 0xd48   :  { %1933 = vrot.lane.b32.xlu0 %v3916_v42, %s4043_s3 }
 0xdaf   :  { %v1875_v44 = vpop.permute.xlu1 %1874 }
 0xdb0   :  { %v1877_v13 = vpop.permute.xlu0 %1876  ;;  %v1880_v47 = vmul.f32 %v3902_v20, %v1875_v44 }
 0xdb1   :  { %v1881_v48 = vmul.f32 %v3904_v45, %v1877_v13 }
 0xdb2   :  { %v1941_v6 = vrot.slane %v1880_v47, 4 }
 0xdb3   :  { %v1942_v35 = vrot.slane %v1881_v48, 3 }
 0xdb5   :  { %v1943_v49 = vsel %vm666_vm3, %v1942_v35, %v1941_v6 }
 0xdb6   :  { %1944 = vrot.lane.b32.xlu1 %v1943_v49, %s4044_s5 }
 0xdb9   :  { %v1932_v31 = vpop.permute.xlu1 %1931 }
 0xdba   :  { %v1934_v51 = vpop.permute.xlu0 %1933  ;;  %v1937_v53 = vmul.f32 %v3906_v43, %v1932_v31  ;;  %1953 = vrot.lane.b32.xlu1 %v1952_v7, %s4045_s1 }
 0xdbb   :  { %v1938_v54 = vmul.f32 %v3908_v52, %v1934_v51 }
 0xdbc   :  { %v1959_v41 = vrot.slane %v1937_v53, 3 }
 0xdbd   :  { %v1960_v27 = vrot.slane %v1938_v54, 2 }
 0xdbf   :  { %v1961_v55 = vsel %vm666_vm3, %v1960_v27, %v1959_v41 }
 0xdc0   :  { %1962 = vrot.lane.b32.xlu0 %v1961_v55, %s4044_s5 }
 0xdc4   :  { %1971 = vrot.lane.b32.xlu0 %v1970_v37, %s4045_s1 }
 0xe28   :  { %v1945_v20 = vpop.permute.xlu1 %1944 }
 0xe29   :  { %v4681_v45 = vsel %vm1646_vm9, %v1945_v20, %v4608_v50 }
 0xe2a   :  { %3460 = vmatmul.mubr.msk.f32.vlgmr.msra.gmra.mrb[20].mxu1 %vm403_vm7, %v4681_v45 }
 0xe2b   :  { %3626 = vmatpush3.bf16.msra.mxu1 %v4191_v29  ;;  %3470 = vmatprep.mubr.msk.f32.mxu1 %vm4040_vm0, %v4041_v4 }
 0xe2c   :  { %3627 = vmatprep.subr.bf16.mxu1 %v4039_v2  ;;  %v1954_v9 = vpop.permute.xlu1 %1953 }
 0xe2d   :  { %v4713_v16 = vsel %vm1646_vm9, %v1954_v9, %v4645_v56 }
 0xe2e   :  { %v2150_v23 = vrot.slane %v4713_v16, 3  ;;  %v2151_v24 = vrot.slane %v4713_v16, 4 }
 0xe2f   :  { %3629 = vmatpush3.bf16.msra.mxu1 %v4208_v34 }
 0xe30   :  { %3636 = vmatprep.subr.bf16.mxu1 %v4039_v2 }
 0xe32   :  { %v1963_v43 = vpop.permute.xlu0 %1962 }
 0xe33   :  { %v4694_v50 = vsel %vm1623_vm5, %v1963_v43, %v4624_v46 }
 0xe34   :  { %3471 = vmatmul.mubr.msk.f32.vlgmr.msra.gmra.mrb[22].mxu1 %vm403_vm7, %v4694_v50 }
 0xe35   :  { %3638 = vmatpush3.bf16.msra.mxu1 %v4191_v29  ;;  %3492 = vmatprep.mubr.msk.f32.mxu1 %vm4040_vm0, %v4041_v4 }
 0xe36   :  { %3639 = vmatprep.subr.bf16.mxu1 %v4039_v2  ;;  %v1972_v62 = vpop.permute.xlu0 %1971 }
 0xe37   :  { %v4722_v30 = vsel %vm1623_vm5, %v1972_v62, %v4658_v28 }
 0xe38   :  { %v2207_v36 = vrot.slane %v4722_v30, 6  ;;  %v2208_v56 = vrot.slane %v4722_v30, 7 }
 0xe39   :  { %3641 = vmatpush3.bf16.msra.mxu1 %v4208_v34 }
 0xe3a   :  { %3648 = vmatprep.subr.bf16.mxu1 %v4039_v2 }
 0xefd   :  { %v2044_v52 = vpop.f32.mrb[20].mxu1 }
 0xefe   :  { %v2049_v57 = vrot.slane %v2044_v52, 3  ;;  %v2050_v58 = vrot.slane %v2044_v52, 4  ;;  %v3461_v60 = vpop.f32.mrb[21].mxu1 }
 0xf00   :  { %v2053_v46 = vadd.f32 %v4296_v11, %v2049_v57  ;;  %v2054_v61 = vadd.f32 %v4300_v15, %v2050_v58 }
 0xf02   :  { %3917 = vtanh.f32 %v2053_v46  ;;  %v3221_v17 = vmul.f32 -1.442695, %v2053_v46  ;;  %v3222_v37 = vmul.f32 -1.442695, %v2054_v61 }
 0xf03   :  { %3919 = vtanh.f32 %v2054_v61 }
 0xf07   :  { %v2124_v63 = vpop.f32.mrb[22].mxu1 }
 0xf08   :  { %v2129_v59 = vrot.slane %v2124_v63, 6  ;;  %v2130_v0 = vrot.slane %v2124_v63, 7  ;;  %v3472_v1 = vpop.f32.mrb[23].mxu1 }
 0xf0a   :  { %v2133_v3 = vadd.f32 %v4298_v12, %v2129_v59  ;;  %v2134_v5 = vadd.f32 %v4303_v18, %v2130_v0 }
 0xf0c   :  { %v3918_v7 = vpop.eup %3917  ;;  %3921 = vtanh.f32 %v2133_v3  ;;  %v3223_v40 = vmul.f32 -1.442695, %v2133_v3  ;;  %v3224_v26 = vmul.f32 -1.442695, %v2134_v5 }
 0xf0d   :  { %v3920_v8 = vpop.eup %3919  ;;  %3923 = vtanh.f32 %v2134_v5  ;;  %2162 = vrot.lane.b32.xlu1 %v3918_v7, %s4043_s3 }
 0xf0e   :  { %2164 = vrot.lane.b32.xlu0 %v3920_v8, %s4043_s3  ;;  %3925 = vpow2.f32 %v3221_v17 }
 0xf0f   :  { %3927 = vpow2.f32 %v3222_v37 }
 0xf10   :  { %3929 = vpow2.f32 %v3223_v40 }
 0xf11   :  { %3931 = vpow2.f32 %v3224_v26 }
 0xf16   :  { %v3922_v10 = vpop.eup %3921 }
 0xf17   :  { %v3924_v21 = vpop.eup %3923  ;;  %2219 = vrot.lane.b32.xlu1 %v3922_v10, %s4043_s3 }
 0xf18   :  { %2221 = vrot.lane.b32.xlu0 %v3924_v21, %s4043_s3  ;;  %v3926_v28 = vpop.eup %3925 }
 0xf19   :  { %v3928_v42 = vpop.eup %3927  ;;  %v2141_v44 = vadd.f32 1.0, %v3926_v28 }
 0xf1a   :  { %v2142_v13 = vadd.f32 1.0, %v3928_v42  ;;  %v3930_v47 = vpop.eup %3929 }
 0xf1b   :  { %2152 = vrot.lane.b32.xlu1 %v2150_v23, %s4044_s5  ;;  %3933 = vrcp.f32 %v2141_v44  ;;  %v3932_v48 = vpop.eup %3931  ;;  %v2198_v6 = vadd.f32 1.0, %v3930_v47 }
 0xf1c   :  { %2154 = vrot.lane.b32.xlu0 %v2151_v24, %s4044_s5  ;;  %3935 = vrcp.f32 %v2142_v13  ;;  %v2199_v35 = vadd.f32 1.0, %v3932_v48 }
 0xf1d   :  { %3937 = vrcp.f32 %v2198_v6 }
 0xf1e   :  { %3939 = vrcp.f32 %v2199_v35 }
 0xf1f   :  { %2209 = vrot.lane.b32.xlu1 %v2207_v36, %s4044_s5 }
 0xf20   :  { %2211 = vrot.lane.b32.xlu0 %v2208_v56, %s4044_s5 }
 0xf25   :  { %v3934_v49 = vpop.eup %3933 }
 0xf26   :  { %v3936_v51 = vpop.eup %3935 }
 0xf27   :  { %v3938_v27 = vpop.eup %3937 }
 0xf28   :  { %v3940_v20 = vpop.eup %3939 }
 0xf7f   :  { %v2163_v31 = vpop.permute.xlu1 %2162 }
 0xf80   :  { %v2165_v53 = vpop.permute.xlu0 %2164  ;;  %v2168_v54 = vmul.f32 %v3934_v49, %v2163_v31 }
 0xf81   :  { %v2169_v41 = vmul.f32 %v3936_v51, %v2165_v53 }
 0xf82   :  { %2172 = vrot.lane.b32.xlu1 %v2168_v54, %s4044_s5 }
 0xf83   :  { %2174 = vrot.lane.b32.xlu0 %v2169_v41, %s4044_s5 }
 0xf89   :  { %v2220_v55 = vpop.permute.xlu1 %2219 }
 0xf8a   :  { %v2222_v43 = vpop.permute.xlu0 %2221  ;;  %v2225_v52 = vmul.f32 %v3938_v27, %v2220_v55 }
 0xf8b   :  { %v2226_v57 = vmul.f32 %v3940_v20, %v2222_v43 }
 0xf8c   :  { %2229 = vrot.lane.b32.xlu1 %v2225_v52, %s4044_s5 }
 0xf8d   :  { %2231 = vrot.lane.b32.xlu0 %v2226_v57, %s4044_s5  ;;  %v2153_v58 = vpop.permute.xlu1 %2152 }
 0xf8e   :  { %v2155_v60 = vpop.permute.xlu0 %2154  ;;  %v2158_v63 = vmul.f32 %v3934_v49, %v2153_v58 }
 0xf8f   :  { %v2159_v59 = vmul.f32 %v3936_v51, %v2155_v60 }
 0xf91   :  { %v2210_v46 = vpop.permute.xlu1 %2209 }
 0xf92   :  { %v2212_v61 = vpop.permute.xlu0 %2211  ;;  %v2215_v10 = vmul.f32 %v3938_v27, %v2210_v46 }
 0xf93   :  { %v2216_v21 = vmul.f32 %v3940_v20, %v2212_v61 }
 0xff4   :  { %v2173_v0 = vpop.permute.xlu1 %2172 }
 0xff5   :  { %v2175_v1 = vpop.permute.xlu0 %2174  ;;  %v2178_v3 = vadd.f32 %v2173_v0, %v2158_v63 }
 0xff6   :  { %v2179_v5 = vadd.f32 %v2175_v1, %v2159_v59 }
 0xff7   :  { %3941 = vtanh.f32 %v2178_v3  ;;  %v2260_v7 = vrot.slane %v2178_v3, 5 }
 0xff8   :  { %3943 = vtanh.f32 %v2179_v5  ;;  %v2261_v8 = vrot.slane %v2179_v5, 4 }
 0xffa   :  { %v2262_v9 = vsel %vm666_vm3, %v2261_v8, %v2260_v7 }
 0xffe   :  { %v2230_v62 = vpop.permute.xlu1 %2229 }
 0xfff   :  { %v2232_v23 = vpop.permute.xlu0 %2231  ;;  %v2235_v24 = vadd.f32 %v2230_v62, %v2215_v10 }
0x1000   :  { %v2236_v36 = vadd.f32 %v2232_v23, %v2216_v21 }
0x1001   :  { %v3942_v56 = vpop.eup %3941  ;;  %3945 = vtanh.f32 %v2235_v24  ;;  %v2278_v17 = vrot.slane %v2235_v24, 2 }
0x1002   :  { %v3944_v37 = vpop.eup %3943  ;;  %3947 = vtanh.f32 %v2236_v36  ;;  %v2279_v40 = vrot.slane %v2236_v36, 1  ;;  %2184 = vrot.lane.b32.xlu1 %v3942_v56, %s4043_s3 }
0x1003   :  { %2186 = vrot.lane.b32.xlu0 %v3944_v37, %s4043_s3 }
0x1004   :  { %v2280_v26 = vsel %vm666_vm3, %v2279_v40, %v2278_v17 }
0x100b   :  { %v3946_v28 = vpop.eup %3945 }
0x100c   :  { %v3948_v42 = vpop.eup %3947  ;;  %2241 = vrot.lane.b32.xlu1 %v3946_v28, %s4043_s3 }
0x100d   :  { %2243 = vrot.lane.b32.xlu0 %v3948_v42, %s4043_s3 }
0x1074   :  { %v2185_v44 = vpop.permute.xlu1 %2184 }
0x1075   :  { %v2187_v13 = vpop.permute.xlu0 %2186  ;;  %v2190_v47 = vmul.f32 %v3934_v49, %v2185_v44 }
0x1076   :  { %v2191_v48 = vmul.f32 %v3936_v51, %v2187_v13 }
0x1077   :  { %v2251_v6 = vrot.slane %v2190_v47, 5 }
0x1078   :  { %v2252_v35 = vrot.slane %v2191_v48, 4 }
0x107a   :  { %v2253_v31 = vsel %vm666_vm3, %v2252_v35, %v2251_v6 }
0x107b   :  { %2254 = vrot.lane.b32.xlu1 %v2253_v31, %s4044_s5 }
0x107e   :  { %v2242_v53 = vpop.permute.xlu1 %2241 }
0x107f   :  { %v2244_v54 = vpop.permute.xlu0 %2243  ;;  %v2247_v41 = vmul.f32 %v3938_v27, %v2242_v53  ;;  %2263 = vrot.lane.b32.xlu1 %v2262_v9, %s4045_s1 }
0x1080   :  { %v2248_v55 = vmul.f32 %v3940_v20, %v2244_v54 }
0x1081   :  { %v2269_v43 = vrot.slane %v2247_v41, 2 }
0x1082   :  { %v2270_v52 = vrot.slane %v2248_v55, 1 }
0x1084   :  { %v2271_v57 = vsel %vm666_vm3, %v2270_v52, %v2269_v43 }
0x1085   :  { %2272 = vrot.lane.b32.xlu0 %v2271_v57, %s4044_s5 }
0x1089   :  { %2281 = vrot.lane.b32.xlu0 %v2280_v26, %s4045_s1 }
0x10ed   :  { %v2255_v49 = vpop.permute.xlu1 %2254 }
0x10ee   :  { %v4749_v51 = vsel %vm1324_vm1, %v2255_v49, %v4681_v45 }
0x10ef   :  { %3482 = vmatmul.mubr.msk.f32.vlgmr.msra.gmra.mrb[4].mxu0 %vm403_vm7, %v4749_v51 }
0x10f0   :  { %3644 = vmatpush3.bf16.msra.mxu0 %v4160_v19  ;;  %3503 = vmatprep.mubr.msk.f32.mxu0 %vm4040_vm0, %v4041_v4 }
0x10f1   :  { %3645 = vmatprep.subr.bf16.mxu0 %v4039_v2  ;;  %v2264_v1 = vpop.permute.xlu1 %2263 }
0x10f2   :  { %v4781_v5 = vsel %vm1324_vm1, %v2264_v1, %v4713_v16 }
0x10f3   :  { %v2460_v8 = vrot.slane %v4781_v5, 3  ;;  %v2459_v10 = vrot.slane %v4781_v5, 2 }
0x10f4   :  { %3647 = vmatpush3.bf16.msra.mxu0 %v4179_v25 }
0x10f5   :  { %3654 = vmatprep.subr.bf16.mxu0 %v4039_v2 }
0x10f7   :  { %v2273_v27 = vpop.permute.xlu0 %2272 }
0x10f8   :  { %v4762_v45 = vsel %vm1301_vm15, %v2273_v27, %v4694_v50 }
0x10f9   :  { %3493 = vmatmul.mubr.msk.f32.vlgmr.msra.gmra.mrb[24].mxu1 %vm403_vm7, %v4762_v45 }
0x10fa   :  { %3650 = vmatpush3.bf16.msra.mxu1 %v4191_v29  ;;  %3514 = vmatprep.mubr.msk.f32.mxu1 %vm4040_vm0, %v4041_v4 }
0x10fb   :  { %3651 = vmatprep.subr.bf16.mxu1 %v4039_v2  ;;  %v2282_v9 = vpop.permute.xlu0 %2281 }
0x10fc   :  { %v4791_v21 = vsel %vm1301_vm15, %v2282_v9, %v4722_v30 }
0x10fd   :  { %v2516_v33 = vrot.slane %v4791_v21, 7 }
0x10fe   :  { %3653 = vmatpush3.bf16.msra.mxu1 %v4208_v34 }
0x10ff   :  { %3660 = vmatprep.subr.bf16.mxu1 %v4039_v2 }
0x11c2   :  { %v2354_v19 = vpop.f32.mrb[4].mxu0 }
0x11c3   :  { %v2359_v25 = vrot.slane %v2354_v19, 2  ;;  %v2360_v20 = vrot.slane %v2354_v19, 3  ;;  %v3483_v58 = vpop.f32.mrb[5].mxu0 }
0x11c5   :  { %v2363_v50 = vadd.f32 %v4296_v11, %v2359_v25  ;;  %v2364_v60 = vadd.f32 %v4300_v15, %v2360_v20 }
0x11c7   :  { %3949 = vtanh.f32 %v2363_v50  ;;  %v3227_v16 = vmul.f32 -1.442695, %v2363_v50  ;;  %v3228_v62 = vmul.f32 -1.442695, %v2364_v60 }
0x11c8   :  { %3951 = vtanh.f32 %v2364_v60 }
0x11cc   :  { %v2434_v29 = vpop.f32.mrb[24].mxu1 }
0x11cd   :  { %v2439_v46 = vrot.slane %v2434_v29, 7  ;;  %v2443_v61 = vadd.f32 %v4303_v18, %v2434_v29  ;;  %v3494_v63 = vpop.f32.mrb[25].mxu1 }
0x11cf   :  { %v2442_v59 = vadd.f32 %v4298_v12, %v2439_v46  ;;  %3953 = vtanh.f32 %v2443_v61  ;;  %v3230_v23 = vmul.f32 -1.442695, %v2443_v61 }
0x11d1   :  { %v3950_v34 = vpop.eup %3949  ;;  %3955 = vtanh.f32 %v2442_v59  ;;  %v3229_v24 = vmul.f32 -1.442695, %v2442_v59 }
0x11d2   :  { %v3952_v0 = vpop.eup %3951  ;;  %2471 = vrot.lane.b32.xlu1 %v3950_v34, %s4043_s3  ;;  %3957 = vpow2.f32 %v3227_v16 }
0x11d3   :  { %2473 = vrot.lane.b32.xlu0 %v3952_v0, %s4043_s3  ;;  %3959 = vpow2.f32 %v3228_v62 }
0x11d4   :  { %3961 = vpow2.f32 %v3230_v23 }
0x11d5   :  { %3963 = vpow2.f32 %v3229_v24 }
0x11d9   :  { %v3954_v3 = vpop.eup %3953 }
0x11da   :  { %2529 = vrot.lane.b32.xlu0 %v3954_v3, %s4043_s3 }
0x11db   :  { %v3956_v7 = vpop.eup %3955 }
0x11dc   :  { %2527 = vrot.lane.b32.xlu1 %v3956_v7, %s4043_s3  ;;  %v3958_v36 = vpop.eup %3957 }
0x11dd   :  { %v3960_v14 = vpop.eup %3959  ;;  %v2450_v30 = vadd.f32 1.0, %v3958_v36 }
0x11de   :  { %2463 = vrot.lane.b32.xlu0 %v2460_v8, %s4044_s5  ;;  %v2451_v56 = vadd.f32 1.0, %v3960_v14  ;;  %v3962_v17 = vpop.eup %3961 }
0x11df   :  { %3965 = vrcp.f32 %v2450_v30  ;;  %v3964_v37 = vpop.eup %3963  ;;  %v2508_v40 = vadd.f32 1.0, %v3962_v17 }
0x11e0   :  { %2461 = vrot.lane.b32.xlu1 %v2459_v10, %s4044_s5  ;;  %3967 = vrcp.f32 %v2451_v56  ;;  %v2507_v26 = vadd.f32 1.0, %v3964_v37 }
0x11e1   :  { %3969 = vrcp.f32 %v2508_v40 }
0x11e2   :  { %2519 = vrot.lane.b32.xlu0 %v4791_v21, %s4044_s5  ;;  %3971 = vrcp.f32 %v2507_v26 }
0x11e4   :  { %2517 = vrot.lane.b32.xlu1 %v2516_v33, %s4044_s5 }
0x11e9   :  { %v3966_v28 = vpop.eup %3965 }
0x11ea   :  { %v3968_v44 = vpop.eup %3967 }
0x11eb   :  { %v3970_v6 = vpop.eup %3969 }
0x11ec   :  { %v3972_v53 = vpop.eup %3971 }
0x1244   :  { %v2472_v42 = vpop.permute.xlu1 %2471 }
0x1245   :  { %v2474_v13 = vpop.permute.xlu0 %2473  ;;  %v2477_v47 = vmul.f32 %v3966_v28, %v2472_v42 }
0x1246   :  { %v2478_v48 = vmul.f32 %v3968_v44, %v2474_v13 }
0x1247   :  { %2481 = vrot.lane.b32.xlu0 %v2477_v47, %s4044_s5 }
0x1248   :  { %2483 = vrot.lane.b32.xlu1 %v2478_v48, %s4044_s5 }
0x124c   :  { %v2530_v35 = vpop.permute.xlu0 %2529 }
0x124d   :  { %v2534_v31 = vmul.f32 %v3970_v6, %v2530_v35 }
0x124e   :  { %v2528_v54 = vpop.permute.xlu1 %2527 }
0x124f   :  { %2539 = vrot.lane.b32.xlu0 %v2534_v31, %s4044_s5  ;;  %v2533_v41 = vmul.f32 %v3972_v53, %v2528_v54 }
0x1250   :  { %v2464_v55 = vpop.permute.xlu0 %2463 }
0x1251   :  { %2537 = vrot.lane.b32.xlu1 %v2533_v41, %s4044_s5  ;;  %v2468_v27 = vmul.f32 %v3968_v44, %v2464_v55 }
0x1252   :  { %v2462_v43 = vpop.permute.xlu1 %2461 }
0x1253   :  { %v2467_v49 = vmul.f32 %v3966_v28, %v2462_v43 }
0x1254   :  { %v2520_v52 = vpop.permute.xlu0 %2519 }
0x1255   :  { %v2524_v46 = vmul.f32 %v3970_v6, %v2520_v52 }
0x1256   :  { %v2518_v57 = vpop.permute.xlu1 %2517 }
0x1257   :  { %v2523_v59 = vmul.f32 %v3972_v53, %v2518_v57 }
0x12b9   :  { %v2482_v19 = vpop.permute.xlu0 %2481 }
0x12ba   :  { %v2487_v25 = vadd.f32 %v2482_v19, %v2467_v49  ;;  %v2484_v20 = vpop.permute.xlu1 %2483 }
0x12bb   :  { %v2488_v58 = vadd.f32 %v2484_v20, %v2468_v27 }
0x12bc   :  { %3973 = vtanh.f32 %v2487_v25  ;;  %v2568_v50 = vrot.slane %v2487_v25, 6 }
0x12bd   :  { %3975 = vtanh.f32 %v2488_v58  ;;  %v2569_v60 = vrot.slane %v2488_v58, 5 }
0x12bf   :  { %v2570_v29 = vsel %vm666_vm3, %v2569_v60, %v2568_v50 }
0x12c1   :  { %v2540_v61 = vpop.permute.xlu0 %2539 }
0x12c2   :  { %v2544_v63 = vadd.f32 %v2540_v61, %v2524_v46 }
0x12c3   :  { %v2538_v34 = vpop.permute.xlu1 %2537 }
0x12c4   :  { %3977 = vtanh.f32 %v2544_v63  ;;  %v2543_v0 = vadd.f32 %v2538_v34, %v2523_v59 }
0x12c6   :  { %v3974_v1 = vpop.eup %3973  ;;  %3979 = vtanh.f32 %v2543_v0  ;;  %v2585_v7 = vrot.slane %v2543_v0, 1 }
0x12c7   :  { %v3976_v3 = vpop.eup %3975  ;;  %2493 = vrot.lane.b32.xlu1 %v3974_v1, %s4043_s3 }
0x12c8   :  { %2495 = vrot.lane.b32.xlu0 %v3976_v3, %s4043_s3  ;;  %v2586_v8 = vsel %vm666_vm3, %v2544_v63, %v2585_v7 }
0x12ce   :  { %v3978_v9 = vpop.eup %3977 }
0x12cf   :  { %2551 = vrot.lane.b32.xlu0 %v3978_v9, %s4043_s3 }
0x12d0   :  { %v3980_v10 = vpop.eup %3979 }
0x12d1   :  { %2549 = vrot.lane.b32.xlu1 %v3980_v10, %s4043_s3 }
0x1339   :  { %v2494_v33 = vpop.permute.xlu1 %2493 }
0x133a   :  { %v2496_v16 = vpop.permute.xlu0 %2495  ;;  %v2499_v62 = vmul.f32 %v3966_v28, %v2494_v33 }
0x133b   :  { %v2500_v23 = vmul.f32 %v3968_v44, %v2496_v16 }
0x133c   :  { %v2559_v24 = vrot.slane %v2499_v62, 6 }
0x133d   :  { %v2560_v36 = vrot.slane %v2500_v23, 5 }
0x133f   :  { %v2561_v14 = vsel %vm666_vm3, %v2560_v36, %v2559_v24 }
0x1340   :  { %2562 = vrot.lane.b32.xlu1 %v2561_v14, %s4044_s5 }
0x1341   :  { %v2552_v30 = vpop.permute.xlu0 %2551 }
0x1342   :  { %v2556_v37 = vmul.f32 %v3970_v6, %v2552_v30 }
0x1343   :  { %v2550_v56 = vpop.permute.xlu1 %2549 }
0x1344   :  { %2571 = vrot.lane.b32.xlu1 %v2570_v29, %s4045_s1  ;;  %v2555_v17 = vmul.f32 %v3972_v53, %v2550_v56 }
0x1346   :  { %v2577_v40 = vrot.slane %v2555_v17, 1 }
0x1348   :  { %v2578_v26 = vsel %vm666_vm3, %v2556_v37, %v2577_v40 }
0x1349   :  { %2579 = vrot.lane.b32.xlu0 %v2578_v26, %s4044_s5 }
0x134d   :  { %2587 = vrot.lane.b32.xlu0 %v2586_v8, %s4045_s1 }
0x13b2   :  { %v2563_v28 = vpop.permute.xlu1 %2562 }
0x13b3   :  { %v4817_v42 = vsel %vm1002_vm12, %v2563_v28, %v4749_v51 }
0x13b4   :  { %3504 = vmatmul.mubr.msk.f32.vlgmr.msra.gmra.mrb[6].mxu0 %vm403_vm7, %v4817_v42 }
0x13b5   :  { %3525 = vmatprep.mubr.msk.f32.mxu0 %vm4040_vm0, %v4041_v4 }
0x13bb   :  { %v2580_v44 = vpop.permute.xlu0 %2579 }
0x13bc   :  { %v4826_v13 = vsel %vm981_vm11, %v2580_v44, %v4762_v45 }
0x13bd   :  { %3515 = vmatmul.mubr.msk.f32.vlgmr.msra.gmra.mrb[26].mxu1 %vm403_vm7, %v4826_v13 }
0x13be   :  { %3536 = vmatprep.mubr.msk.f32.mxu1 %vm4040_vm0, %v4041_v4 }
0x13bf   :  { %v2588_v27 = vpop.permute.xlu0 %2587 }
0x13c0   :  { %v2590_v19 = vsel %vm981_vm11, %v2588_v27, %v4791_v21  ;;  %v2887_v27 = vld [vmem:[%s4966_s7 + $0x18] sm:$0xff] }
0x13c1   :  { %v2822_v32 = vrot.slane %v2590_v19, 1 }
0x1487   :  { %v2660_v51 = vpop.f32.mrb[6].mxu0 }
0x1488   :  { %v2665_v47 = vrot.slane %v2660_v51, 1  ;;  %v2666_v48 = vrot.slane %v2660_v51, 2  ;;  %v3505_v6 = vpop.f32.mrb[7].mxu0 }
0x148a   :  { %v2669_v35 = vadd.f32 %v4296_v11, %v2665_v47  ;;  %v2670_v31 = vadd.f32 %v4300_v15, %v2666_v48  ;;  %v2572_v11 = vpop.permute.xlu1 %2571 }
0x148b   :  { %v2574_v15 = vsel %vm1002_vm12, %v2572_v11, %v4781_v5 }
0x148c   :  { %3981 = vtanh.f32 %v2669_v35  ;;  %v2766_v49 = vrot.slane %v2574_v15, 2  ;;  %v3233_v5 = vmul.f32 -1.442695, %v2669_v35  ;;  %v3234_v25 = vmul.f32 -1.442695, %v2670_v31 }
0x148d   :  { %3983 = vtanh.f32 %v2670_v31 }
0x1490   :  { %v2740_v53 = vpop.f32.mrb[26].mxu1 }
0x1491   :  { %v2745_v54 = vrot.slane %v2740_v53, 1  ;;  %v2748_v45 = vadd.f32 %v4298_v12, %v2740_v53  ;;  %v3516_v41 = vpop.f32.mrb[27].mxu1  ;;  %v2880_v53 = vld [vmem:[%s4965_s6] sm:$0xff] }
0x1493   :  { %v2749_v55 = vadd.f32 %v4303_v18, %v2745_v54  ;;  %3985 = vtanh.f32 %v2748_v45  ;;  %v2765_v18 = vrot.slane %v2574_v15, 1  ;;  %v3235_v20 = vmul.f32 -1.442695, %v2748_v45  ;;  %v2881_v54 = vld [vmem:[%s4965_s6 + $0x8] sm:$0xff]  ;;  %v2882_v45 = vld [vmem:[%s4965_s6 + $0x10] sm:$0xff] }
0x1494   :  { %v3661_v41 = vpack.c.bf16 %v2881_v54, %v2880_v53  ;;  %v2885_v15 = vld [vmem:[%s4966_s7 + $0x8] sm:$0xff] }
0x1495   :  { %3987 = vtanh.f32 %v2749_v55  ;;  %v3236_v58 = vmul.f32 -1.442695, %v2749_v55  ;;  %v2883_v55 = vld [vmem:[%s4965_s6 + $0x18] sm:$0xff] }
0x1496   :  { %v3982_v43 = vpop.eup %3981  ;;  %3989 = vpow2.f32 %v3233_v5  ;;  %3662 = vmatpush3.bf16.msra.mxu1 %v3661_v41 }
0x1497   :  { %v3984_v52 = vpop.eup %3983  ;;  %2777 = vrot.lane.b32.xlu1 %v3982_v43, %s4043_s3  ;;  %3991 = vpow2.f32 %v3234_v25  ;;  %v3664_v43 = vpack.c.bf16 %v2883_v55, %v2882_v45  ;;  %3663 = vmatprep.subr.bf16.mxu1 %v4039_v2 }
0x1498   :  { %2779 = vrot.lane.b32.xlu0 %v3984_v52, %s4043_s3  ;;  %3993 = vpow2.f32 %v3235_v20 }
0x1499   :  { %3995 = vpow2.f32 %v3236_v58 }
0x149a   :  { %3665 = vmatpush3.bf16.msra.mxu1 %v3664_v43 }
0x149d   :  { %v3986_v57 = vpop.eup %3985 }
0x149e   :  { %2833 = vrot.lane.b32.xlu0 %v3986_v57, %s4043_s3  ;;  %v2884_v57 = vld [vmem:[%s4966_s7] sm:$0xff] }
0x149f   :  { %v3988_v12 = vpop.eup %3987 }
0x14a0   :  { %2835 = vrot.lane.b32.xlu1 %v3988_v12, %s4043_s3  ;;  %v3990_v50 = vpop.eup %3989  ;;  %v2886_v12 = vld [vmem:[%s4966_s7 + $0x10] sm:$0xff] }
0x14a1   :  { %v3992_v60 = vpop.eup %3991  ;;  %v2756_v29 = vadd.f32 1.0, %v3990_v50 }
0x14a2   :  { %2769 = vrot.lane.b32.xlu0 %v2766_v49, %s4044_s5  ;;  %v2757_v22 = vadd.f32 1.0, %v3992_v60  ;;  %v3994_v21 = vpop.eup %3993  ;;  %v3655_v49 = vpack.c.bf16 %v2885_v15, %v2884_v57 }
0x14a3   :  { %3997 = vrcp.f32 %v2756_v29  ;;  %v3996_v46 = vpop.eup %3995  ;;  %v2813_v61 = vadd.f32 1.0, %v3994_v21 }
0x14a4   :  { %2767 = vrot.lane.b32.xlu1 %v2765_v18, %s4044_s5  ;;  %3999 = vrcp.f32 %v2757_v22  ;;  %v2814_v63 = vadd.f32 1.0, %v3996_v46  ;;  %3656 = vmatpush3.bf16.msra.mxu0 %v3655_v49  ;;  %v3658_v18 = vpack.c.bf16 %v2887_v27, %v2886_v12 }
0x14a5   :  { %4001 = vrcp.f32 %v2813_v61  ;;  %3657 = vmatprep.subr.bf16.mxu0 %v4039_v2 }
0x14a6   :  { %2823 = vrot.lane.b32.xlu0 %v2590_v19, %s4044_s5  ;;  %4003 = vrcp.f32 %v2814_v63 }
0x14a8   :  { %2825 = vrot.lane.b32.xlu1 %v2822_v32, %s4044_s5  ;;  %3659 = vmatpush3.bf16.msra.mxu0 %v3658_v18 }
0x14a9   :  { %3666 = vmatprep.subr.bf16.mxu0 %v4039_v2 }
0x14ad   :  { %v4850_v59 = vpop.eup %3997 }
0x14ae   :  { %v4852_v0 = vpop.eup %3999 }
0x14af   :  { %v4858_v8 = vpop.eup %4001 }
0x14b0   :  { %v4004_v33 = vpop.eup %4003 }
0x1509   :  { %v2778_v34 = vpop.permute.xlu1 %2777 }
0x150a   :  { %v2780_v1 = vpop.permute.xlu0 %2779  ;;  %v2783_v3 = vmul.f32 %v4850_v59, %v2778_v34 }
0x150b   :  { %v2784_v7 = vmul.f32 %v4852_v0, %v2780_v1  ;;  %v3043_v1 = vld [vmem:[%s4968_s9] sm:$0xff] }
0x150c   :  { %2787 = vrot.lane.b32.xlu0 %v2783_v3, %s4044_s5  ;;  %v3047_v3 = vld [vmem:[%s4968_s9 + $0x20] sm:$0xff] }
0x150d   :  { %2789 = vrot.lane.b32.xlu1 %v2784_v7, %s4044_s5  ;;  %v3048_v7 = vld [vmem:[%s4968_s9 + $0x28] sm:$0xff] }
0x1510   :  { %v2834_v9 = vpop.permute.xlu0 %2833 }
0x1511   :  { %v2839_v10 = vmul.f32 %v4858_v8, %v2834_v9  ;;  %v3049_v9 = vld [vmem:[%s4968_s9 + $0x30] sm:$0xff] }
0x1512   :  { %v2836_v16 = vpop.permute.xlu1 %2835 }
0x1513   :  { %2843 = vrot.lane.b32.xlu0 %v2839_v10, %s4044_s5  ;;  %v2840_v62 = vmul.f32 %v4004_v33, %v2836_v16  ;;  %v3050_v10 = vld [vmem:[%s4968_s9 + $0x38] sm:$0xff] }
0x1514   :  { %v2770_v23 = vpop.permute.xlu0 %2769 }
0x1515   :  { %2845 = vrot.lane.b32.xlu1 %v2840_v62, %s4044_s5  ;;  %v2774_v56 = vmul.f32 %v4852_v0, %v2770_v23 }
0x1516   :  { %v2768_v24 = vpop.permute.xlu1 %2767 }
0x1517   :  { %v2773_v30 = vmul.f32 %v4850_v59, %v2768_v24  ;;  %v3239_v24 = vld [vmem:[%s4967_s8] ss:$0 sm:$0xff]  ;;  %s4015_s8 = scalar_lea.vmem %s3141_s26, 32 }
0x1518   :  { %v2824_v36 = vpop.permute.xlu0 %2823  ;;  %p4016_p0 = scmp.ne.s32.totalorder %s3141_s26, %s4015_s8  ;;  %p4021_p2 = scmp.lt.s32.totalorder %s4015_s8, %s4015_s8 }
0x1519   :  { %v2829_v28 = vmul.f32 %v4858_v8, %v2824_v36 }
0x151a   :  { %v2826_v14 = vpop.permute.xlu1 %2825  ;;  %p4022_p3 = por %p4021_p2, %p4020_p1 }
0x151b   :  { %v2830_v47 = vmul.f32 %v4004_v33, %v2826_v14 }
0x151c   :  { %p4023_p4 = pnand %p4022_p3, %p4016_p0 }
0x157e   :  { %v2788_v17 = vpop.permute.xlu0 %2787 }
0x157f   :  { %v2793_v37 = vadd.f32 %v2788_v17, %v2773_v30  ;;  %v2790_v40 = vpop.permute.xlu1 %2789  ;;  %v3240_v17 = vld [vmem:[%s4969_s10] ss:$0 sm:$0xff] }
0x1580   :  { %v2794_v26 = vadd.f32 %v2790_v40, %v2774_v56 }
0x1581   :  { %4005 = vtanh.f32 %v2793_v37 }
0x1582   :  { %4007 = vtanh.f32 %v2794_v26 }
0x1585   :  { %v2844_v44 = vpop.permute.xlu0 %2843 }
0x1586   :  { %v2849_v51 = vadd.f32 %v2844_v44, %v2829_v28 }
0x1587   :  { %v2846_v48 = vpop.permute.xlu1 %2845 }
0x1588   :  { %4009 = vtanh.f32 %v2849_v51  ;;  %v2850_v6 = vadd.f32 %v2846_v48, %v2830_v47 }
0x158a   :  { %4011 = vtanh.f32 %v2850_v6 }
0x158b   :  { %v4006_v35 = vpop.eup %4005 }
0x158c   :  { %v4008_v31 = vpop.eup %4007  ;;  %2799 = vrot.lane.b32.xlu1 %v4006_v35, %s4043_s3 }
0x158d   :  { %2801 = vrot.lane.b32.xlu0 %v4008_v31, %s4043_s3 }
0x1592   :  { %v4010_v52 = vpop.eup %4009 }
0x1593   :  { %2855 = vrot.lane.b32.xlu0 %v4010_v52, %s4043_s3 }
0x1594   :  { %v4012_v11 = vpop.eup %4011 }
0x1595   :  { %2857 = vrot.lane.b32.xlu1 %v4012_v11, %s4043_s3 }
0x15fe   :  { %v2800_v19 = vpop.permute.xlu1 %2799 }
0x15ff   :  { %v2802_v32 = vpop.permute.xlu0 %2801  ;;  %v2805_v5 = vmul.f32 %v4850_v59, %v2800_v19 }
0x1600   :  { %v2806_v25 = vmul.f32 %v4852_v0, %v2802_v32 }
0x1601   :  { %v2865_v20 = vrot.slane %v2805_v5, 7 }
0x1602   :  { %v2866_v58 = vrot.slane %v2806_v25, 6 }
0x1604   :  { %v2867_v50 = vsel %vm666_vm3, %v2866_v58, %v2865_v20 }
0x1605   :  { %2868 = vrot.lane.b32.xlu1 %v2867_v50, %s4044_s5  ;;  %v2856_v60 = vpop.permute.xlu0 %2855 }
0x1606   :  { %v2861_v21 = vmul.f32 %v4858_v8, %v2856_v60  ;;  %v3673_v8 = vpack.c.bf16 %v3048_v7, %v3047_v3 }
0x1607   :  { %v2858_v29 = vpop.permute.xlu1 %2857 }
0x1608   :  { %v2862_v22 = vmul.f32 %v4004_v33, %v2858_v29  ;;  %v3676_v33 = vpack.c.bf16 %v3050_v10, %v3049_v9 }
0x160a   :  { %v2874_v46 = vrot.slane %v2862_v22, 7 }
0x160c   :  { %v2875_v61 = vsel %vm666_vm3, %v2874_v46, %v2861_v21  ;;  %vm3132_vm3 = vcmask 17408  }
0x160d   :  { %2876 = vrot.lane.b32.xlu0 %v2875_v61, %s4044_s5 }
0x1677   :  { %v2869_v63 = vpop.permute.xlu1 %2868 }
0x1678   :  { %v2871_v59 = vsel %vm684_vm8, %v2869_v63, %v4817_v42  ;;  %v3667_v42 = vpack.c.bf16 %v3044_v38, %v3043_v1 }
0x1679   :  { %3537 = vmatmul.mubr.msk.f32.vlgmr.msra.gmra.mrb[28].mxu1 %vm403_vm7, %v2871_v59 }
0x167f   :  { %v2877_v34 = vpop.permute.xlu0 %2876 }
0x1680   :  { %v2879_v0 = vsel %vm662_vm6, %v2877_v34, %v4826_v13 }
0x1681   :  { %3526 = vmatmul.mubr.msk.f32.vlgmr.msra.gmra.mrb[8].mxu0 %vm403_vm7, %v2879_v0 }
0x1682   :  { %3555 = vmatprep.mubr.msk.f32.mxu0 %vm4040_vm0, %v4041_v4  ;;  %3668 = vmatpush3.bf16.msra.mxu0 %v3667_v42  ;;  %v3046_v4 = vld [vmem:[%s4968_s9 + $0x18] sm:$0xff]  ;;  %vm3058_vm0 = vcmask 523264  }
0x1683   :  { %3669 = vmatprep.subr.bf16.mxu0 %v4039_v2  ;;  %v3670_v13 = vpack.c.bf16 %v3046_v4, %v3045_v39 }
0x1686   :  { %3671 = vmatpush3.bf16.msra.mxu0 %v3670_v13 }
0x1687   :  { %3672 = vmatprep.subr.bf16.mxu0 %v4039_v2 }
0x168a   :  { %3674 = vmatpush3.bf16.msra.mxu0 %v3673_v8 }
0x168b   :  { %3675 = vmatprep.subr.bf16.mxu0 %v4039_v2 }
0x168e   :  { %3677 = vmatpush3.bf16.msra.mxu0 %v3676_v33 }
0x174c   :  { %v3030_v16 = vpop.f32.mrb[28].mxu1 }
0x174d   :  { %v3538_v62 = vpop.f32.mrb[29].mxu1 }
0x1754   :  { %v2957_v23 = vpop.f32.mrb[8].mxu0 }
0x1755   :  { %v3031_v36 = vadd.f32 %v3030_v16, %v2957_v23  ;;  %v3527_v14 = vpop.f32.mrb[9].mxu0 }
0x1757   :  { %v3041_v30 = vadd.f32 %v3239_v24, %v3031_v36 }
0x1759   :  { %4013 = vtanh.f32 %v3041_v30 }
0x1763   :  { %v4014_v56 = vpop.eup %4013 }
0x1764   :  { %3556 = vmatmul.mubr.msk.f32.vlgmr.msra.gmra.mrb[10].mxu0 %vm3058_vm0, %v4014_v56 }
0x1837   :  { %v3128_v2 = vpop.f32.mrb[10].mxu0 }
0x1838   :  { %v3129_v37 = vadd.f32 %v3240_v17, %v3128_v2  ;;  %v3557_v40 = vpop.f32.mrb[11].mxu0 }
0x183a   :  { %3133 = vst.msk [vmem:[#allocation2] sm:$0x3] %vm3132_vm3, %v3129_v37 }
0x183b   :  { %4026 = shalt.err (!%p4023_p4)
}
0x183c   :  { %s4027_s6 = scalar_lea.hbm %s4970_s11, 32 }
0x183d   :  { %p4028_p5 = scmp.ne.s32.totalorder %s4970_s11, %s4027_s6  ;;  %p4031_p6 = scmp.lt.u32.totalorder %s4027_s6, %s4970_s11 }
0x183f   :  { %p4033_p7 = pnand %p4031_p6, %p4028_p5 }
0x1841   :  { %4036 = shalt.err (!%p4033_p7)
}
0x1842   :  { %3143 = dma.vmem_to_hbm [thread:$0]  %s3141_s26, 32, %s4970_s11, [#allocation3]  }
0x1843   :  { %4037 = dma.done.wait [#allocation3], 32  }
0x1844   :  { %4038 = vsyncadd [#allocation3], 4294967264 }
0x1845   :  { %3147 = vsyncpa [#allocation3], 1 }

</bundles_post_ra>
